<compile_context>
chip_gen: v5e
topology: v5e:2x2
jax: 0.10.0
libtpu: 0.0.40
codegen_flags: <defaults>
</compile_context>

<pallas_src>
import functools

import jax
import jax.numpy as jnp
from jax.experimental import pallas as pl
from jax.experimental.pallas import tpu as pltpu


# ----------------------------------------------------------------------------
# in-kernel helpers
# ----------------------------------------------------------------------------

def _halo(W):
    # zero-halo rows on each side of the flattened (L, C) slab; >= W+1 and rounded
    # up to a multiple of 8 so the interior scratch write is sublane aligned.
    return ((W + 1 + 7) // 8) * 8


def _erf(x):
    # Abramowitz & Stegun 7.1.26 polynomial (|err| < 1.5e-7): exact-GELU behaviour
    # of nn.GELU using only exp/mul/add/div/where (no erf lowering needed).
    t = 1.0 / (1.0 + 0.3275911 * jnp.abs(x))
    poly = t * (0.254829592 + t * (-0.284496736 + t * (1.421413741
           + t * (-1.453152027 + t * 1.061405429))))
    e = 1.0 - poly * jnp.exp(-x * x)
    return jnp.where(x >= 0.0, e, -e)


def _gelu_exact(x):
    return 0.5 * x * (1.0 + _erf(x * 0.7071067811865476))


def _silu(x):
    return x * (1.0 / (1.0 + jnp.exp(-x)))


def _layernorm(x, g, b):
    mu = jnp.mean(x, axis=-1, keepdims=True)
    xc = x - mu
    var = jnp.mean(xc * xc, axis=-1, keepdims=True)        # biased, like PyTorch
    return xc * jax.lax.rsqrt(var + 1e-5) * g + b


def _dwconv3x3_tokens(pad_ref, x, w_ref, b_ref, mask_l, mask_r, H, W):
    """Depthwise 3x3 conv (padding=1) on row-major (L=H*W, C) tokens.

    pad_ref is a zero-bordered VMEM scratch of shape (L + 2*_halo(W), C); only its
    interior is (re)written here, so the (never-written) zero border provides the
    vertical halo.  Horizontal wrap-around between image rows is removed with the
    precomputed left/right edge masks.  w_ref is (9, C) (taps in row-major kh*3+kw
    order), b_ref is (1, C).
    """
    L, C = x.shape
    P = _halo(W)
    pad_ref[pl.ds(P, L), :] = x                            # aligned interior write
    acc = jnp.zeros((L, C), jnp.float32)
    for oi in (-1, 0, 1):
        for oj in (-1, 0, 1):
            tap = w_ref[pl.ds((oi + 1) * 3 + (oj + 1), 1), :]      # (1, C)
            t = pad_ref[pl.ds(P + oi * W + oj, L), :]              # (L, C)
            if oj == -1:
                t = t * mask_l
            elif oj == 1:
                t = t * mask_r
            acc = acc + t * tap
    return acc + b_ref[...]


# ----------------------------------------------------------------------------
# fused MLLA block kernel (grid over batch, sequential -> LIF state in scratch)
# ----------------------------------------------------------------------------

def _mlla_block_kernel(x_ref, mask_l_ref, mask_r_ref,
                       cpe1_w_ref, cpe1_b_ref, n1g_ref, n1b_ref,
                       apw_ref, apb_ref, ipw_ref, ipb_ref,
                       dwcw_ref, dwcb_ref,
                       qkwq_ref, qkbq_ref, qkwk_ref, qkbk_ref,
                       bnsc_ref, bnsh_ref,
                       cos_ref, sin_ref, rot_ref, hmask_ref,
                       lepe_w_ref, lepe_b_ref, opw_ref, opb_ref,
                       cpe2_w_ref, cpe2_b_ref, n2g_ref, n2b_ref,
                       fc1w_ref, fc1b_ref, fc2w_ref, fc2b_ref,
                       out_ref,
                       pad_ref, vq_ref, vk_ref, *, H, W):
    L = H * W
    b = pl.program_id(0)

    @pl.when(b == 0)
    def _():
        # Zero the conv halo (its interior is overwritten on every use) and the
        # LIF membrane potentials; both persist across the batch/"time" grid axis.
        pad_ref[...] = jnp.zeros_like(pad_ref)
        vq_ref[...] = jnp.zeros_like(vq_ref)
        vk_ref[...] = jnp.zeros_like(vk_ref)

    mask_l = mask_l_ref[...]
    mask_r = mask_r_ref[...]

    # ---- cpe1 (depthwise 3x3) + residual; this is the block's shortcut ----
    x = x_ref[0]                                                     # (L, C)
    x = x + _dwconv3x3_tokens(pad_ref, x, cpe1_w_ref, cpe1_b_ref, mask_l, mask_r, H, W)
    shortcut = x

    # ---- norm1 -> act_proj (twice, as in the reference) -> in_proj -> dwc+SiLU ----
    xn = _layernorm(x, n1g_ref[...], n1b_ref[...])
    xp = jnp.dot(xn, apw_ref[...], preferred_element_type=jnp.float32) + apb_ref[...]
    act_res = _silu(jnp.dot(xp, apw_ref[...],
                            preferred_element_type=jnp.float32) + apb_ref[...])
    xi = jnp.dot(xp, ipw_ref[...], preferred_element_type=jnp.float32) + ipb_ref[...]
    xd = _silu(_dwconv3x3_tokens(pad_ref, xi, dwcw_ref, dwcb_ref, mask_l, mask_r, H, W))

    # ---- qk projection (pre-split weights) + BatchNorm1d(eval) + LIF + elu+1 ----
    # (Dropout before qk_bn is inference-mode identity.)
    qraw = jnp.dot(xd, qkwq_ref[...], preferred_element_type=jnp.float32) + qkbq_ref[...]
    kraw = jnp.dot(xd, qkwk_ref[...], preferred_element_type=jnp.float32) + qkbk_ref[...]
    scale = bnsc_ref[...]
    shift = bnsh_ref[...]
    yq = qraw * scale + shift
    yk = kraw * scale + shift
    hq = vq_ref[...] + (yq - vq_ref[...]) * 0.5            # LIF charge, tau = 2
    hk = vk_ref[...] + (yk - vk_ref[...]) * 0.5
    sq = jnp.where(hq >= 1.0, 1.0, 0.0)                    # Heaviside spike
    sk = jnp.where(hk >= 1.0, 1.0, 0.0)
    vq_ref[...] = hq * (1.0 - sq)                          # hard reset to 0
    vk_ref[...] = hk * (1.0 - sk)
    q = sq + 1.0                                           # elu(spike)+1 == spike+1
    k = sk + 1.0
    v = xd

    # ---- RoPE: elementwise cos + tiny pair-rotation matmul (lane-dense) ----
    cosf = cos_ref[...]
    sinf = sin_ref[...]
    rot = rot_ref[...]
    hmask = hmask_ref[...]
    q_rope = q * cosf + jnp.dot(q, rot, preferred_element_type=jnp.float32) * sinf
    k_rope = k * cosf + jnp.dot(k, rot, preferred_element_type=jnp.float32) * sinf

    # ---- multi-head linear attention (heads batched via block-diag mask) ----
    k_mean = jnp.mean(k, axis=0, keepdims=True)                      # (1, C)
    denom = jnp.dot(q * k_mean, hmask, preferred_element_type=jnp.float32)
    z = 1.0 / (denom + 1e-6)
    kv = jax.lax.dot_general(k_rope, v, (((0,), (0,)), ((), ())),
                             preferred_element_type=jnp.float32) * (1.0 / L)   # (C, C)
    attn = jnp.dot(q_rope, kv * hmask, preferred_element_type=jnp.float32) * z
    # LePE: depthwise conv on v, added to the attention output.
    attn = attn + _dwconv3x3_tokens(pad_ref, v, lepe_w_ref, lepe_b_ref, mask_l, mask_r, H, W)

    # ---- out_proj(attn * act_res) + shortcut (drop_path = identity) ----
    xo = jnp.dot(attn * act_res, opw_ref[...],
                 preferred_element_type=jnp.float32) + opb_ref[...]
    x = shortcut + xo

    # ---- cpe2 + residual ----
    x = x + _dwconv3x3_tokens(pad_ref, x, cpe2_w_ref, cpe2_b_ref, mask_l, mask_r, H, W)

    # ---- MLP (Mlp.forward never uses its BN/LIF members): norm2 -> fc1 -> GELU -> fc2 ----
    xn2 = _layernorm(x, n2g_ref[...], n2b_ref[...])
    h = jnp.dot(xn2, fc1w_ref[...], preferred_element_type=jnp.float32) + fc1b_ref[...]
    h = _gelu_exact(h)
    h = jnp.dot(h, fc2w_ref[...], preferred_element_type=jnp.float32) + fc2b_ref[...]
    out_ref[0] = (x + h).astype(out_ref.dtype)


# ----------------------------------------------------------------------------
# wrapper: parameter prep + single pallas_call
# ----------------------------------------------------------------------------

def mlla_block(x, p, *, H, W, num_heads):
    B, L, C = x.shape
    assert L == H * W and C % num_heads == 0
    hd = C // num_heads
    f32 = jnp.float32

    # ---- parameter-only preprocessing (tiny; folded by XLA) ----
    qk_w_q, qk_w_k = p['qk_w'][:, :C], p['qk_w'][:, C:]
    qk_b_q = p['qk_b'][:C].reshape(1, C)
    qk_b_k = p['qk_b'][C:].reshape(1, C)
    # BatchNorm1d(dim*4) on (B, L, 2C) normalizes per token position l (requires
    # L == 4*dim); eval-mode scale/shift tables pre-broadcast to (L, C).
    bn_scale = p['qk_bn_w'] * jax.lax.rsqrt(p['qk_bn_rv'] + 1e-5)        # (L,) == (4C,)
    bn_shift = p['qk_bn_b'] - p['qk_bn_rm'] * bn_scale
    scale_tbl = jnp.broadcast_to(bn_scale[:, None], (L, C)).astype(f32)
    shift_tbl = jnp.broadcast_to(bn_shift[:, None], (L, C)).astype(f32)

    cosf = jnp.repeat(p['rope_cos'], 2, axis=-1).astype(f32)             # (L, C)
    sinf = jnp.repeat(p['rope_sin'], 2, axis=-1).astype(f32)

    # RoPE pair-rotation matrix:  (x @ rot)[2m] = -x[2m+1],  (x @ rot)[2m+1] = x[2m]
    idx = jnp.arange(C)
    rot = (jnp.where((idx[:, None] % 2 == 0) & (idx[None, :] == idx[:, None] + 1), 1.0, 0.0)
           - jnp.where((idx[:, None] % 2 == 1) & (idx[None, :] == idx[:, None] - 1), 1.0, 0.0)
           ).astype(f32)
    # block-diagonal head mask (heads are contiguous channel groups of size hd)
    head_id = idx // hd
    hmask = (head_id[:, None] == head_id[None, :]).astype(f32)
    # horizontal edge masks for the flattened depthwise conv
    colx = jnp.arange(L) % W
    mask_l = jnp.broadcast_to((colx != 0).astype(f32)[:, None], (L, C))
    mask_r = jnp.broadcast_to((colx != W - 1).astype(f32)[:, None], (L, C))

    cpe1_b = p['cpe1_b'].reshape(1, C)
    dwc_b = p['dwc_b'].reshape(1, C)
    lepe_b = p['lepe_b'].reshape(1, C)
    cpe2_b = p['cpe2_b'].reshape(1, C)
    n1g = p['norm1_g'].reshape(1, C)
    n1b = p['norm1_b'].reshape(1, C)
    n2g = p['norm2_g'].reshape(1, C)
    n2b = p['norm2_b'].reshape(1, C)
    apb = p['act_proj_b'].reshape(1, C)
    ipb = p['in_proj_b'].reshape(1, C)
    opb = p['out_proj_b'].reshape(1, C)
    fc1_b = p['fc1_b'].reshape(1, -1)
    fc2_b = p['fc2_b'].reshape(1, C)

    inputs = (x, mask_l, mask_r,
              p['cpe1_w'], cpe1_b, n1g, n1b,
              p['act_proj_w'], apb, p['in_proj_w'], ipb,
              p['dwc_w'], dwc_b,
              qk_w_q, qk_b_q, qk_w_k, qk_b_k,
              scale_tbl, shift_tbl,
              cosf, sinf, rot, hmask,
              p['lepe_w'], lepe_b, p['out_proj_w'], opb,
              p['cpe2_w'], cpe2_b, n2g, n2b,
              p['fc1_w'], fc1_b, p['fc2_w'], fc2_b)

    tok_spec = pl.BlockSpec((1, L, C), lambda b: (b, 0, 0))
    # constant (grid-invariant) parameter blocks: same block index every step,
    # so the Pallas pipeline fetches them once and keeps them VMEM-resident.
    in_specs = [tok_spec] + [pl.BlockSpec(t.shape, lambda b: (0,) * t.ndim)
                             for t in inputs[1:]]

    pad_rows = L + 2 * _halo(W)

    out = pl.pallas_call(
        functools.partial(_mlla_block_kernel, H=H, W=W),
        out_shape=jax.ShapeDtypeStruct((B, L, C), x.dtype),
        grid=(B,),
        in_specs=in_specs,
        out_specs=tok_spec,
        scratch_shapes=[pltpu.VMEM((pad_rows, C), f32),   # zero-haloed conv slab
                        pltpu.VMEM((L, C), f32),          # LIF membrane potential (q)
                        pltpu.VMEM((L, C), f32)],         # LIF membrane potential (k)
        # The LIF recurrence runs over the batch ("time") axis, so this grid axis
        # MUST be sequential/in-order -> "arbitrary", state carried in scratch.
        compiler_params=pltpu.CompilerParams(dimension_semantics=("arbitrary",)),
    )(*inputs)
    return out


# ----------------------------------------------------------------------------
# RoPE tables and parameter init
# ----------------------------------------------------------------------------

def make_rope_tables(H, W, C, base=10000.0):
    k_max = C // 4                    # feature_dim // (2 * len(channel_dims))
    theta = 1.0 / (base ** (jnp.arange(k_max, dtype=jnp.float32) / k_max))
    ii, jj = jnp.meshgrid(jnp.arange(H, dtype=jnp.float32),
                          jnp.arange(W, dtype=jnp.float32), indexing='ij')
    angles = jnp.concatenate([ii[..., None] * theta, jj[..., None] * theta], axis=-1)
    return (jnp.cos(angles).reshape(H * W, C // 2),
            jnp.sin(angles).reshape(H * W, C // 2))


def init_params(key, C, H, W, mlp_ratio=4.0):
    hidden = int(C * mlp_ratio)
    keys = iter(jax.random.split(key, 48))

    def nrm(shape, scale=0.1):
        return jax.random.normal(next(keys), shape, jnp.float32) * scale

    p = {
        # depthwise 3x3 conv weights stored as (kh*kw, C) = (9, C)
        'cpe1_w': nrm((9, C), 0.2), 'cpe1_b': nrm((C,), 0.05),
        'dwc_w':  nrm((9, C), 0.2), 'dwc_b':  nrm((C,), 0.05),
        'lepe_w': nrm((9, C), 0.2), 'lepe_b': nrm((C,), 0.05),
        'cpe2_w': nrm((9, C), 0.2), 'cpe2_b': nrm((C,), 0.05),
        # layer norms
        'norm1_g': 1.0 + nrm((C,), 0.05), 'norm1_b': nrm((C,), 0.05),
        'norm2_g': 1.0 + nrm((C,), 0.05), 'norm2_b': nrm((C,), 0.05),
        # linear projections stored as (in, out); y = x @ W + b
        'in_proj_w':  nrm((C, C), C ** -0.5), 'in_proj_b':  nrm((C,), 0.05),
        'act_proj_w': nrm((C, C), C ** -0.5), 'act_proj_b': nrm((C,), 0.05),
        'out_proj_w': nrm((C, C), C ** -0.5), 'out_proj_b': nrm((C,), 0.05),
        # MLP
        'fc1_w': nrm((C, hidden), C ** -0.5), 'fc1_b': nrm((hidden,), 0.05),
        'fc2_w': nrm((hidden, C), hidden ** -0.5), 'fc2_b': nrm((C,), 0.05),
        # attention qk projection
        'qk_w': nrm((C, 2 * C), C ** -0.5), 'qk_b': nrm((2 * C,), 0.05),
        # BatchNorm1d(dim*4) affine + running stats (eval mode); requires L == 4*dim
        'qk_bn_w': 1.0 + nrm((4 * C,), 0.05),
        'qk_bn_b': nrm((4 * C,), 0.05),
        'qk_bn_rm': nrm((4 * C,), 0.05),
        'qk_bn_rv': jnp.ones((4 * C,), jnp.float32),
    }
    cos, sin = make_rope_tables(H, W, C)
    p['rope_cos'], p['rope_sin'] = cos, sin
    return p


if __name__ == "__main__":
    # dim=16, resolution 8x8 -> L=64 tokens; BatchNorm1d(dim*4) requires L == 4*dim.
    B, C, H, W = 2, 16, 8, 8
    L = H * W
    num_heads = 4
    assert L == 4 * C

    key = jax.random.PRNGKey(0)
    kx, kp = jax.random.split(key)
    x = jax.random.normal(kx, (B, L, C), jnp.float32)
    params = init_params(kp, C, H, W, mlp_ratio=4.0)

    fwd = jax.jit(functools.partial(mlla_block, H=H, W=W, num_heads=num_heads))
    out = fwd(x, params)
    jax.block_until_ready(out)
    assert out.shape == (B, L, C) and out.dtype == jnp.float32
    assert bool(jnp.all(jnp.isfinite(out)))
    print("KERNEL_OK")
</pallas_src>

<mosaic_0001>
module attributes {stable_mosaic.version = 11 : i64} {
  func.func @_mlla_block_kernel(%arg0: i32, %arg1: memref<1x64x16xf32, #tpu.memory_space<vmem>>, %arg2: memref<64x16xf32, #tpu.memory_space<vmem>>, %arg3: memref<64x16xf32, #tpu.memory_space<vmem>>, %arg4: memref<9x16xf32, #tpu.memory_space<vmem>>, %arg5: memref<1x16xf32, #tpu.memory_space<vmem>>, %arg6: memref<1x16xf32, #tpu.memory_space<vmem>>, %arg7: memref<1x16xf32, #tpu.memory_space<vmem>>, %arg8: memref<16x16xf32, #tpu.memory_space<vmem>>, %arg9: memref<1x16xf32, #tpu.memory_space<vmem>>, %arg10: memref<16x16xf32, #tpu.memory_space<vmem>>, %arg11: memref<1x16xf32, #tpu.memory_space<vmem>>, %arg12: memref<9x16xf32, #tpu.memory_space<vmem>>, %arg13: memref<1x16xf32, #tpu.memory_space<vmem>>, %arg14: memref<16x16xf32, #tpu.memory_space<vmem>>, %arg15: memref<1x16xf32, #tpu.memory_space<vmem>>, %arg16: memref<16x16xf32, #tpu.memory_space<vmem>>, %arg17: memref<1x16xf32, #tpu.memory_space<vmem>>, %arg18: memref<64x16xf32, #tpu.memory_space<vmem>>, %arg19: memref<64x16xf32, #tpu.memory_space<vmem>>, %arg20: memref<64x16xf32, #tpu.memory_space<vmem>>, %arg21: memref<64x16xf32, #tpu.memory_space<vmem>>, %arg22: memref<16x16xf32, #tpu.memory_space<vmem>>, %arg23: memref<16x16xf32, #tpu.memory_space<vmem>>, %arg24: memref<9x16xf32, #tpu.memory_space<vmem>>, %arg25: memref<1x16xf32, #tpu.memory_space<vmem>>, %arg26: memref<16x16xf32, #tpu.memory_space<vmem>>, %arg27: memref<1x16xf32, #tpu.memory_space<vmem>>, %arg28: memref<9x16xf32, #tpu.memory_space<vmem>>, %arg29: memref<1x16xf32, #tpu.memory_space<vmem>>, %arg30: memref<1x16xf32, #tpu.memory_space<vmem>>, %arg31: memref<1x16xf32, #tpu.memory_space<vmem>>, %arg32: memref<16x64xf32, #tpu.memory_space<vmem>>, %arg33: memref<1x64xf32, #tpu.memory_space<vmem>>, %arg34: memref<64x16xf32, #tpu.memory_space<vmem>>, %arg35: memref<1x16xf32, #tpu.memory_space<vmem>>, %arg36: memref<1x64x16xf32, #tpu.memory_space<vmem>>, %arg37: memref<96x16xf32, #tpu.memory_space<vmem>>, %arg38: memref<64x16xf32, #tpu.memory_space<vmem>>, %arg39: memref<64x16xf32, #tpu.memory_space<vmem>>) attributes {dimension_semantics = [#tpu.dimension_semantics<arbitrary>], iteration_bounds = array<i64: 2>, scalar_prefetch = 0 : i64, scratch_operands = 3 : i64, tpu.core_type = #tpu.core_type<tc>, window_params = [{transform_indices = @transform_0, window_bounds = array<i64: 1, 64, 16>}, {pipeline_mode = #tpu.pipeline_mode<synchronous>, transform_indices = @transform_1, window_bounds = array<i64: 64, 16>}, {pipeline_mode = #tpu.pipeline_mode<synchronous>, transform_indices = @transform_2, window_bounds = array<i64: 64, 16>}, {pipeline_mode = #tpu.pipeline_mode<synchronous>, transform_indices = @transform_3, window_bounds = array<i64: 9, 16>}, {pipeline_mode = #tpu.pipeline_mode<synchronous>, transform_indices = @transform_4, window_bounds = array<i64: 1, 16>}, {pipeline_mode = #tpu.pipeline_mode<synchronous>, transform_indices = @transform_5, window_bounds = array<i64: 1, 16>}, {pipeline_mode = #tpu.pipeline_mode<synchronous>, transform_indices = @transform_6, window_bounds = array<i64: 1, 16>}, {pipeline_mode = #tpu.pipeline_mode<synchronous>, transform_indices = @transform_7, window_bounds = array<i64: 16, 16>}, {pipeline_mode = #tpu.pipeline_mode<synchronous>, transform_indices = @transform_8, window_bounds = array<i64: 1, 16>}, {pipeline_mode = #tpu.pipeline_mode<synchronous>, transform_indices = @transform_9, window_bounds = array<i64: 16, 16>}, {pipeline_mode = #tpu.pipeline_mode<synchronous>, transform_indices = @transform_10, window_bounds = array<i64: 1, 16>}, {pipeline_mode = #tpu.pipeline_mode<synchronous>, transform_indices = @transform_11, window_bounds = array<i64: 9, 16>}, {pipeline_mode = #tpu.pipeline_mode<synchronous>, transform_indices = @transform_12, window_bounds = array<i64: 1, 16>}, {pipeline_mode = #tpu.pipeline_mode<synchronous>, transform_indices = @transform_13, window_bounds = array<i64: 16, 16>}, {pipeline_mode = #tpu.pipeline_mode<synchronous>, transform_indices = @transform_14, window_bounds = array<i64: 1, 16>}, {pipeline_mode = #tpu.pipeline_mode<synchronous>, transform_indices = @transform_15, window_bounds = array<i64: 16, 16>}, {pipeline_mode = #tpu.pipeline_mode<synchronous>, transform_indices = @transform_16, window_bounds = array<i64: 1, 16>}, {pipeline_mode = #tpu.pipeline_mode<synchronous>, transform_indices = @transform_17, window_bounds = array<i64: 64, 16>}, {pipeline_mode = #tpu.pipeline_mode<synchronous>, transform_indices = @transform_18, window_bounds = array<i64: 64, 16>}, {pipeline_mode = #tpu.pipeline_mode<synchronous>, transform_indices = @transform_19, window_bounds = array<i64: 64, 16>}, {pipeline_mode = #tpu.pipeline_mode<synchronous>, transform_indices = @transform_20, window_bounds = array<i64: 64, 16>}, {pipeline_mode = #tpu.pipeline_mode<synchronous>, transform_indices = @transform_21, window_bounds = array<i64: 16, 16>}, {pipeline_mode = #tpu.pipeline_mode<synchronous>, transform_indices = @transform_22, window_bounds = array<i64: 16, 16>}, {pipeline_mode = #tpu.pipeline_mode<synchronous>, transform_indices = @transform_23, window_bounds = array<i64: 9, 16>}, {pipeline_mode = #tpu.pipeline_mode<synchronous>, transform_indices = @transform_24, window_bounds = array<i64: 1, 16>}, {pipeline_mode = #tpu.pipeline_mode<synchronous>, transform_indices = @transform_25, window_bounds = array<i64: 16, 16>}, {pipeline_mode = #tpu.pipeline_mode<synchronous>, transform_indices = @transform_26, window_bounds = array<i64: 1, 16>}, {pipeline_mode = #tpu.pipeline_mode<synchronous>, transform_indices = @transform_27, window_bounds = array<i64: 9, 16>}, {pipeline_mode = #tpu.pipeline_mode<synchronous>, transform_indices = @transform_28, window_bounds = array<i64: 1, 16>}, {pipeline_mode = #tpu.pipeline_mode<synchronous>, transform_indices = @transform_29, window_bounds = array<i64: 1, 16>}, {pipeline_mode = #tpu.pipeline_mode<synchronous>, transform_indices = @transform_30, window_bounds = array<i64: 1, 16>}, {pipeline_mode = #tpu.pipeline_mode<synchronous>, transform_indices = @transform_31, window_bounds = array<i64: 16, 64>}, {pipeline_mode = #tpu.pipeline_mode<synchronous>, transform_indices = @transform_32, window_bounds = array<i64: 1, 64>}, {pipeline_mode = #tpu.pipeline_mode<synchronous>, transform_indices = @transform_33, window_bounds = array<i64: 64, 16>}, {pipeline_mode = #tpu.pipeline_mode<synchronous>, transform_indices = @transform_34, window_bounds = array<i64: 1, 16>}, {transform_indices = @transform_35, window_bounds = array<i64: 1, 64, 16>}]} {
    %c0_i32 = arith.constant 0 : i32
    %0 = arith.cmpi eq, %arg0, %c0_i32 : i32
    %1 = arith.extui %0 : i1 to i32
    %c0_i32_0 = arith.constant 0 : i32
    %2 = arith.cmpi ne, %1, %c0_i32_0 : i32
    scf.if %2 {
      %cst_283 = arith.constant 0.000000e+00 : f32
      %449 = vector.broadcast %cst_283 : f32 to vector<96x16xf32>
      %c0_284 = arith.constant 0 : index
      %c0_285 = arith.constant 0 : index
      %450 = vector.load %arg37[%c0_284, %c0_285] : memref<96x16xf32, #tpu.memory_space<vmem>>, vector<96x16xf32>
      tpu.vector_store %arg37[%c0_284, %c0_285], %449 {strides = array<i32>} : memref<96x16xf32, #tpu.memory_space<vmem>>, vector<96x16xf32>,
      %cst_286 = arith.constant 0.000000e+00 : f32
      %451 = vector.broadcast %cst_286 : f32 to vector<64x16xf32>
      %c0_287 = arith.constant 0 : index
      %c0_288 = arith.constant 0 : index
      %452 = vector.load %arg38[%c0_287, %c0_288] : memref<64x16xf32, #tpu.memory_space<vmem>>, vector<64x16xf32>
      tpu.vector_store %arg38[%c0_287, %c0_288], %451 {strides = array<i32>} : memref<64x16xf32, #tpu.memory_space<vmem>>, vector<64x16xf32>,
      %cst_289 = arith.constant 0.000000e+00 : f32
      %453 = vector.broadcast %cst_289 : f32 to vector<64x16xf32>
      %c0_290 = arith.constant 0 : index
      %c0_291 = arith.constant 0 : index
      %454 = vector.load %arg39[%c0_290, %c0_291] : memref<64x16xf32, #tpu.memory_space<vmem>>, vector<64x16xf32>
      tpu.vector_store %arg39[%c0_290, %c0_291], %453 {strides = array<i32>} : memref<64x16xf32, #tpu.memory_space<vmem>>, vector<64x16xf32>,
    } else {
    }
    %c0 = arith.constant 0 : index
    %c0_1 = arith.constant 0 : index
    %3 = vector.load %arg2[%c0, %c0_1] : memref<64x16xf32, #tpu.memory_space<vmem>>, vector<64x16xf32>
    %c0_2 = arith.constant 0 : index
    %c0_3 = arith.constant 0 : index
    %4 = vector.load %arg3[%c0_2, %c0_3] : memref<64x16xf32, #tpu.memory_space<vmem>>, vector<64x16xf32>
    %c0_4 = arith.constant 0 : index
    %c0_5 = arith.constant 0 : index
    %c0_6 = arith.constant 0 : index
    %5 = vector.load %arg1[%c0_4, %c0_5, %c0_6] : memref<1x64x16xf32, #tpu.memory_space<vmem>>, vector<1x64x16xf32>
    %6 = vector.shape_cast %5 : vector<1x64x16xf32> to vector<64x16xf32>
    %c16 = arith.constant 16 : index
    %c0_7 = arith.constant 0 : index
    %7 = vector.load %arg37[%c16, %c0_7] : memref<96x16xf32, #tpu.memory_space<vmem>>, vector<64x16xf32>
    tpu.vector_store %arg37[%c16, %c0_7], %6 {strides = array<i32>} : memref<96x16xf32, #tpu.memory_space<vmem>>, vector<64x16xf32>,
    %cst = arith.constant 0.000000e+00 : f32
    %8 = vector.broadcast %cst : f32 to vector<64x16xf32>
    %c0_8 = arith.constant 0 : index
    %c0_9 = arith.constant 0 : index
    %9 = vector.load %arg4[%c0_8, %c0_9] : memref<9x16xf32, #tpu.memory_space<vmem>>, vector<1x16xf32>
    %c7 = arith.constant 7 : index
    %c0_10 = arith.constant 0 : index
    %10 = vector.load %arg37[%c7, %c0_10] : memref<96x16xf32, #tpu.memory_space<vmem>>, vector<64x16xf32>
    %11 = arith.mulf %10, %3 : vector<64x16xf32>
    %12 = vector.broadcast %9 : vector<1x16xf32> to vector<64x16xf32>
    %13 = arith.mulf %11, %12 : vector<64x16xf32>
    %14 = arith.addf %8, %13 : vector<64x16xf32>
    %c1 = arith.constant 1 : index
    %c0_11 = arith.constant 0 : index
    %15 = vector.load %arg4[%c1, %c0_11] : memref<9x16xf32, #tpu.memory_space<vmem>>, vector<1x16xf32>
    %c8 = arith.constant 8 : index
    %c0_12 = arith.constant 0 : index
    %16 = vector.load %arg37[%c8, %c0_12] : memref<96x16xf32, #tpu.memory_space<vmem>>, vector<64x16xf32>
    %17 = vector.broadcast %15 : vector<1x16xf32> to vector<64x16xf32>
    %18 = arith.mulf %16, %17 : vector<64x16xf32>
    %19 = arith.addf %14, %18 : vector<64x16xf32>
    %c2 = arith.constant 2 : index
    %c0_13 = arith.constant 0 : index
    %20 = vector.load %arg4[%c2, %c0_13] : memref<9x16xf32, #tpu.memory_space<vmem>>, vector<1x16xf32>
    %c9 = arith.constant 9 : index
    %c0_14 = arith.constant 0 : index
    %21 = vector.load %arg37[%c9, %c0_14] : memref<96x16xf32, #tpu.memory_space<vmem>>, vector<64x16xf32>
    %22 = arith.mulf %21, %4 : vector<64x16xf32>
    %23 = vector.broadcast %20 : vector<1x16xf32> to vector<64x16xf32>
    %24 = arith.mulf %22, %23 : vector<64x16xf32>
    %25 = arith.addf %19, %24 : vector<64x16xf32>
    %c3 = arith.constant 3 : index
    %c0_15 = arith.constant 0 : index
    %26 = vector.load %arg4[%c3, %c0_15] : memref<9x16xf32, #tpu.memory_space<vmem>>, vector<1x16xf32>
    %c15 = arith.constant 15 : index
    %c0_16 = arith.constant 0 : index
    %27 = vector.load %arg37[%c15, %c0_16] : memref<96x16xf32, #tpu.memory_space<vmem>>, vector<64x16xf32>
    %28 = arith.mulf %27, %3 : vector<64x16xf32>
    %29 = vector.broadcast %26 : vector<1x16xf32> to vector<64x16xf32>
    %30 = arith.mulf %28, %29 : vector<64x16xf32>
    %31 = arith.addf %25, %30 : vector<64x16xf32>
    %c4 = arith.constant 4 : index
    %c0_17 = arith.constant 0 : index
    %32 = vector.load %arg4[%c4, %c0_17] : memref<9x16xf32, #tpu.memory_space<vmem>>, vector<1x16xf32>
    %c16_18 = arith.constant 16 : index
    %c0_19 = arith.constant 0 : index
    %33 = vector.load %arg37[%c16_18, %c0_19] : memref<96x16xf32, #tpu.memory_space<vmem>>, vector<64x16xf32>
    %34 = vector.broadcast %32 : vector<1x16xf32> to vector<64x16xf32>
    %35 = arith.mulf %33, %34 : vector<64x16xf32>
    %36 = arith.addf %31, %35 : vector<64x16xf32>
    %c5 = arith.constant 5 : index
    %c0_20 = arith.constant 0 : index
    %37 = vector.load %arg4[%c5, %c0_20] : memref<9x16xf32, #tpu.memory_space<vmem>>, vector<1x16xf32>
    %c17 = arith.constant 17 : index
    %c0_21 = arith.constant 0 : index
    %38 = vector.load %arg37[%c17, %c0_21] : memref<96x16xf32, #tpu.memory_space<vmem>>, vector<64x16xf32>
    %39 = arith.mulf %38, %4 : vector<64x16xf32>
    %40 = vector.broadcast %37 : vector<1x16xf32> to vector<64x16xf32>
    %41 = arith.mulf %39, %40 : vector<64x16xf32>
    %42 = arith.addf %36, %41 : vector<64x16xf32>
    %c6 = arith.constant 6 : index
    %c0_22 = arith.constant 0 : index
    %43 = vector.load %arg4[%c6, %c0_22] : memref<9x16xf32, #tpu.memory_space<vmem>>, vector<1x16xf32>
    %c23 = arith.constant 23 : index
    %c0_23 = arith.constant 0 : index
    %44 = vector.load %arg37[%c23, %c0_23] : memref<96x16xf32, #tpu.memory_space<vmem>>, vector<64x16xf32>
    %45 = arith.mulf %44, %3 : vector<64x16xf32>
    %46 = vector.broadcast %43 : vector<1x16xf32> to vector<64x16xf32>
    %47 = arith.mulf %45, %46 : vector<64x16xf32>
    %48 = arith.addf %42, %47 : vector<64x16xf32>
    %c7_24 = arith.constant 7 : index
    %c0_25 = arith.constant 0 : index
    %49 = vector.load %arg4[%c7_24, %c0_25] : memref<9x16xf32, #tpu.memory_space<vmem>>, vector<1x16xf32>
    %c24 = arith.constant 24 : index
    %c0_26 = arith.constant 0 : index
    %50 = vector.load %arg37[%c24, %c0_26] : memref<96x16xf32, #tpu.memory_space<vmem>>, vector<64x16xf32>
    %51 = vector.broadcast %49 : vector<1x16xf32> to vector<64x16xf32>
    %52 = arith.mulf %50, %51 : vector<64x16xf32>
    %53 = arith.addf %48, %52 : vector<64x16xf32>
    %c8_27 = arith.constant 8 : index
    %c0_28 = arith.constant 0 : index
    %54 = vector.load %arg4[%c8_27, %c0_28] : memref<9x16xf32, #tpu.memory_space<vmem>>, vector<1x16xf32>
    %c25 = arith.constant 25 : index
    %c0_29 = arith.constant 0 : index
    %55 = vector.load %arg37[%c25, %c0_29] : memref<96x16xf32, #tpu.memory_space<vmem>>, vector<64x16xf32>
    %56 = arith.mulf %55, %4 : vector<64x16xf32>
    %57 = vector.broadcast %54 : vector<1x16xf32> to vector<64x16xf32>
    %58 = arith.mulf %56, %57 : vector<64x16xf32>
    %59 = arith.addf %53, %58 : vector<64x16xf32>
    %c0_30 = arith.constant 0 : index
    %c0_31 = arith.constant 0 : index
    %60 = vector.load %arg5[%c0_30, %c0_31] : memref<1x16xf32, #tpu.memory_space<vmem>>, vector<1x16xf32>
    %61 = vector.broadcast %60 : vector<1x16xf32> to vector<64x16xf32>
    %62 = arith.addf %59, %61 : vector<64x16xf32>
    %63 = arith.addf %6, %62 : vector<64x16xf32>
    %c0_32 = arith.constant 0 : index
    %c0_33 = arith.constant 0 : index
    %64 = vector.load %arg6[%c0_32, %c0_33] : memref<1x16xf32, #tpu.memory_space<vmem>>, vector<1x16xf32>
    %c0_34 = arith.constant 0 : index
    %c0_35 = arith.constant 0 : index
    %65 = vector.load %arg7[%c0_34, %c0_35] : memref<1x16xf32, #tpu.memory_space<vmem>>, vector<1x16xf32>
    %cst_36 = arith.constant dense<0.000000e+00> : vector<64xf32>
    %66 = vector.multi_reduction <add>, %63, %cst_36 [1] : vector<64x16xf32> to vector<64xf32>
    %67 = vector.shape_cast %66 : vector<64xf32> to vector<64x1xf32>
    %cst_37 = arith.constant 1.600000e+01 : f32
    %68 = vector.broadcast %cst_37 : f32 to vector<64x1xf32>
    %69 = arith.divf %67, %68 : vector<64x1xf32>
    %70 = vector.broadcast %69 : vector<64x1xf32> to vector<64x16xf32>
    %71 = arith.subf %63, %70 : vector<64x16xf32>
    %72 = arith.mulf %71, %71 : vector<64x16xf32>
    %cst_38 = arith.constant dense<0.000000e+00> : vector<64xf32>
    %73 = vector.multi_reduction <add>, %72, %cst_38 [1] : vector<64x16xf32> to vector<64xf32>
    %74 = vector.shape_cast %73 : vector<64xf32> to vector<64x1xf32>
    %cst_39 = arith.constant 1.600000e+01 : f32
    %75 = vector.broadcast %cst_39 : f32 to vector<64x1xf32>
    %76 = arith.divf %74, %75 : vector<64x1xf32>
    %cst_40 = arith.constant 9.99999974E-6 : f32
    %77 = vector.broadcast %cst_40 : f32 to vector<64x1xf32>
    %78 = arith.addf %76, %77 : vector<64x1xf32>
    %79 = math.rsqrt %78 : vector<64x1xf32>
    %80 = vector.broadcast %79 : vector<64x1xf32> to vector<64x16xf32>
    %81 = arith.mulf %71, %80 : vector<64x16xf32>
    %82 = vector.broadcast %64 : vector<1x16xf32> to vector<64x16xf32>
    %83 = arith.mulf %81, %82 : vector<64x16xf32>
    %84 = vector.broadcast %65 : vector<1x16xf32> to vector<64x16xf32>
    %85 = arith.addf %83, %84 : vector<64x16xf32>
    %c0_41 = arith.constant 0 : index
    %c0_42 = arith.constant 0 : index
    %86 = vector.load %arg8[%c0_41, %c0_42] : memref<16x16xf32, #tpu.memory_space<vmem>>, vector<16x16xf32>
    %cst_43 = arith.constant dense<0.000000e+00> : vector<64x16xf32>
    %87 = tpu.matmul %85, %86, %cst_43 {dimension_numbers = #tpu.dot_dimension_numbers<[1], [0], [0], [1], [0, 0, 1, 1], [], []>} : vector<64x16xf32>, vector<16x16xf32>, vector<64x16xf32> -> vector<64x16xf32>
    %c0_44 = arith.constant 0 : index
    %c0_45 = arith.constant 0 : index
    %88 = vector.load %arg9[%c0_44, %c0_45] : memref<1x16xf32, #tpu.memory_space<vmem>>, vector<1x16xf32>
    %89 = vector.broadcast %88 : vector<1x16xf32> to vector<64x16xf32>
    %90 = arith.addf %87, %89 : vector<64x16xf32>
    %c0_46 = arith.constant 0 : index
    %c0_47 = arith.constant 0 : index
    %91 = vector.load %arg8[%c0_46, %c0_47] : memref<16x16xf32, #tpu.memory_space<vmem>>, vector<16x16xf32>
    %cst_48 = arith.constant dense<0.000000e+00> : vector<64x16xf32>
    %92 = tpu.matmul %90, %91, %cst_48 {dimension_numbers = #tpu.dot_dimension_numbers<[1], [0], [0], [1], [0, 0, 1, 1], [], []>} : vector<64x16xf32>, vector<16x16xf32>, vector<64x16xf32> -> vector<64x16xf32>
    %c0_49 = arith.constant 0 : index
    %c0_50 = arith.constant 0 : index
    %93 = vector.load %arg9[%c0_49, %c0_50] : memref<1x16xf32, #tpu.memory_space<vmem>>, vector<1x16xf32>
    %94 = vector.broadcast %93 : vector<1x16xf32> to vector<64x16xf32>
    %95 = arith.addf %92, %94 : vector<64x16xf32>
    %cst_51 = arith.constant 0.000000e+00 : f32
    %96 = vector.broadcast %cst_51 : f32 to vector<64x16xf32>
    %97 = arith.subf %96, %95 : vector<64x16xf32>
    %98 = math.exp %97 : vector<64x16xf32>
    %cst_52 = arith.constant 1.000000e+00 : f32
    %99 = vector.broadcast %cst_52 : f32 to vector<64x16xf32>
    %100 = arith.addf %99, %98 : vector<64x16xf32>
    %cst_53 = arith.constant 1.000000e+00 : f32
    %101 = vector.broadcast %cst_53 : f32 to vector<64x16xf32>
    %102 = arith.divf %101, %100 : vector<64x16xf32>
    %103 = arith.mulf %95, %102 : vector<64x16xf32>
    %c0_54 = arith.constant 0 : index
    %c0_55 = arith.constant 0 : index
    %104 = vector.load %arg10[%c0_54, %c0_55] : memref<16x16xf32, #tpu.memory_space<vmem>>, vector<16x16xf32>
    %cst_56 = arith.constant dense<0.000000e+00> : vector<64x16xf32>
    %105 = tpu.matmul %90, %104, %cst_56 {dimension_numbers = #tpu.dot_dimension_numbers<[1], [0], [0], [1], [0, 0, 1, 1], [], []>} : vector<64x16xf32>, vector<16x16xf32>, vector<64x16xf32> -> vector<64x16xf32>
    %c0_57 = arith.constant 0 : index
    %c0_58 = arith.constant 0 : index
    %106 = vector.load %arg11[%c0_57, %c0_58] : memref<1x16xf32, #tpu.memory_space<vmem>>, vector<1x16xf32>
    %107 = vector.broadcast %106 : vector<1x16xf32> to vector<64x16xf32>
    %108 = arith.addf %105, %107 : vector<64x16xf32>
    %c16_59 = arith.constant 16 : index
    %c0_60 = arith.constant 0 : index
    %109 = vector.load %arg37[%c16_59, %c0_60] : memref<96x16xf32, #tpu.memory_space<vmem>>, vector<64x16xf32>
    tpu.vector_store %arg37[%c16_59, %c0_60], %108 {strides = array<i32>} : memref<96x16xf32, #tpu.memory_space<vmem>>, vector<64x16xf32>,
    %cst_61 = arith.constant 0.000000e+00 : f32
    %110 = vector.broadcast %cst_61 : f32 to vector<64x16xf32>
    %c0_62 = arith.constant 0 : index
    %c0_63 = arith.constant 0 : index
    %111 = vector.load %arg12[%c0_62, %c0_63] : memref<9x16xf32, #tpu.memory_space<vmem>>, vector<1x16xf32>
    %c7_64 = arith.constant 7 : index
    %c0_65 = arith.constant 0 : index
    %112 = vector.load %arg37[%c7_64, %c0_65] : memref<96x16xf32, #tpu.memory_space<vmem>>, vector<64x16xf32>
    %113 = arith.mulf %112, %3 : vector<64x16xf32>
    %114 = vector.broadcast %111 : vector<1x16xf32> to vector<64x16xf32>
    %115 = arith.mulf %113, %114 : vector<64x16xf32>
    %116 = arith.addf %110, %115 : vector<64x16xf32>
    %c1_66 = arith.constant 1 : index
    %c0_67 = arith.constant 0 : index
    %117 = vector.load %arg12[%c1_66, %c0_67] : memref<9x16xf32, #tpu.memory_space<vmem>>, vector<1x16xf32>
    %c8_68 = arith.constant 8 : index
    %c0_69 = arith.constant 0 : index
    %118 = vector.load %arg37[%c8_68, %c0_69] : memref<96x16xf32, #tpu.memory_space<vmem>>, vector<64x16xf32>
    %119 = vector.broadcast %117 : vector<1x16xf32> to vector<64x16xf32>
    %120 = arith.mulf %118, %119 : vector<64x16xf32>
    %121 = arith.addf %116, %120 : vector<64x16xf32>
    %c2_70 = arith.constant 2 : index
    %c0_71 = arith.constant 0 : index
    %122 = vector.load %arg12[%c2_70, %c0_71] : memref<9x16xf32, #tpu.memory_space<vmem>>, vector<1x16xf32>
    %c9_72 = arith.constant 9 : index
    %c0_73 = arith.constant 0 : index
    %123 = vector.load %arg37[%c9_72, %c0_73] : memref<96x16xf32, #tpu.memory_space<vmem>>, vector<64x16xf32>
    %124 = arith.mulf %123, %4 : vector<64x16xf32>
    %125 = vector.broadcast %122 : vector<1x16xf32> to vector<64x16xf32>
    %126 = arith.mulf %124, %125 : vector<64x16xf32>
    %127 = arith.addf %121, %126 : vector<64x16xf32>
    %c3_74 = arith.constant 3 : index
    %c0_75 = arith.constant 0 : index
    %128 = vector.load %arg12[%c3_74, %c0_75] : memref<9x16xf32, #tpu.memory_space<vmem>>, vector<1x16xf32>
    %c15_76 = arith.constant 15 : index
    %c0_77 = arith.constant 0 : index
    %129 = vector.load %arg37[%c15_76, %c0_77] : memref<96x16xf32, #tpu.memory_space<vmem>>, vector<64x16xf32>
    %130 = arith.mulf %129, %3 : vector<64x16xf32>
    %131 = vector.broadcast %128 : vector<1x16xf32> to vector<64x16xf32>
    %132 = arith.mulf %130, %131 : vector<64x16xf32>
    %133 = arith.addf %127, %132 : vector<64x16xf32>
    %c4_78 = arith.constant 4 : index
    %c0_79 = arith.constant 0 : index
    %134 = vector.load %arg12[%c4_78, %c0_79] : memref<9x16xf32, #tpu.memory_space<vmem>>, vector<1x16xf32>
    %c16_80 = arith.constant 16 : index
    %c0_81 = arith.constant 0 : index
    %135 = vector.load %arg37[%c16_80, %c0_81] : memref<96x16xf32, #tpu.memory_space<vmem>>, vector<64x16xf32>
    %136 = vector.broadcast %134 : vector<1x16xf32> to vector<64x16xf32>
    %137 = arith.mulf %135, %136 : vector<64x16xf32>
    %138 = arith.addf %133, %137 : vector<64x16xf32>
    %c5_82 = arith.constant 5 : index
    %c0_83 = arith.constant 0 : index
    %139 = vector.load %arg12[%c5_82, %c0_83] : memref<9x16xf32, #tpu.memory_space<vmem>>, vector<1x16xf32>
    %c17_84 = arith.constant 17 : index
    %c0_85 = arith.constant 0 : index
    %140 = vector.load %arg37[%c17_84, %c0_85] : memref<96x16xf32, #tpu.memory_space<vmem>>, vector<64x16xf32>
    %141 = arith.mulf %140, %4 : vector<64x16xf32>
    %142 = vector.broadcast %139 : vector<1x16xf32> to vector<64x16xf32>
    %143 = arith.mulf %141, %142 : vector<64x16xf32>
    %144 = arith.addf %138, %143 : vector<64x16xf32>
    %c6_86 = arith.constant 6 : index
    %c0_87 = arith.constant 0 : index
    %145 = vector.load %arg12[%c6_86, %c0_87] : memref<9x16xf32, #tpu.memory_space<vmem>>, vector<1x16xf32>
    %c23_88 = arith.constant 23 : index
    %c0_89 = arith.constant 0 : index
    %146 = vector.load %arg37[%c23_88, %c0_89] : memref<96x16xf32, #tpu.memory_space<vmem>>, vector<64x16xf32>
    %147 = arith.mulf %146, %3 : vector<64x16xf32>
    %148 = vector.broadcast %145 : vector<1x16xf32> to vector<64x16xf32>
    %149 = arith.mulf %147, %148 : vector<64x16xf32>
    %150 = arith.addf %144, %149 : vector<64x16xf32>
    %c7_90 = arith.constant 7 : index
    %c0_91 = arith.constant 0 : index
    %151 = vector.load %arg12[%c7_90, %c0_91] : memref<9x16xf32, #tpu.memory_space<vmem>>, vector<1x16xf32>
    %c24_92 = arith.constant 24 : index
    %c0_93 = arith.constant 0 : index
    %152 = vector.load %arg37[%c24_92, %c0_93] : memref<96x16xf32, #tpu.memory_space<vmem>>, vector<64x16xf32>
    %153 = vector.broadcast %151 : vector<1x16xf32> to vector<64x16xf32>
    %154 = arith.mulf %152, %153 : vector<64x16xf32>
    %155 = arith.addf %150, %154 : vector<64x16xf32>
    %c8_94 = arith.constant 8 : index
    %c0_95 = arith.constant 0 : index
    %156 = vector.load %arg12[%c8_94, %c0_95] : memref<9x16xf32, #tpu.memory_space<vmem>>, vector<1x16xf32>
    %c25_96 = arith.constant 25 : index
    %c0_97 = arith.constant 0 : index
    %157 = vector.load %arg37[%c25_96, %c0_97] : memref<96x16xf32, #tpu.memory_space<vmem>>, vector<64x16xf32>
    %158 = arith.mulf %157, %4 : vector<64x16xf32>
    %159 = vector.broadcast %156 : vector<1x16xf32> to vector<64x16xf32>
    %160 = arith.mulf %158, %159 : vector<64x16xf32>
    %161 = arith.addf %155, %160 : vector<64x16xf32>
    %c0_98 = arith.constant 0 : index
    %c0_99 = arith.constant 0 : index
    %162 = vector.load %arg13[%c0_98, %c0_99] : memref<1x16xf32, #tpu.memory_space<vmem>>, vector<1x16xf32>
    %163 = vector.broadcast %162 : vector<1x16xf32> to vector<64x16xf32>
    %164 = arith.addf %161, %163 : vector<64x16xf32>
    %cst_100 = arith.constant 0.000000e+00 : f32
    %165 = vector.broadcast %cst_100 : f32 to vector<64x16xf32>
    %166 = arith.subf %165, %164 : vector<64x16xf32>
    %167 = math.exp %166 : vector<64x16xf32>
    %cst_101 = arith.constant 1.000000e+00 : f32
    %168 = vector.broadcast %cst_101 : f32 to vector<64x16xf32>
    %169 = arith.addf %168, %167 : vector<64x16xf32>
    %cst_102 = arith.constant 1.000000e+00 : f32
    %170 = vector.broadcast %cst_102 : f32 to vector<64x16xf32>
    %171 = arith.divf %170, %169 : vector<64x16xf32>
    %172 = arith.mulf %164, %171 : vector<64x16xf32>
    %c0_103 = arith.constant 0 : index
    %c0_104 = arith.constant 0 : index
    %173 = vector.load %arg14[%c0_103, %c0_104] : memref<16x16xf32, #tpu.memory_space<vmem>>, vector<16x16xf32>
    %cst_105 = arith.constant dense<0.000000e+00> : vector<64x16xf32>
    %174 = tpu.matmul %172, %173, %cst_105 {dimension_numbers = #tpu.dot_dimension_numbers<[1], [0], [0], [1], [0, 0, 1, 1], [], []>} : vector<64x16xf32>, vector<16x16xf32>, vector<64x16xf32> -> vector<64x16xf32>
    %c0_106 = arith.constant 0 : index
    %c0_107 = arith.constant 0 : index
    %175 = vector.load %arg15[%c0_106, %c0_107] : memref<1x16xf32, #tpu.memory_space<vmem>>, vector<1x16xf32>
    %176 = vector.broadcast %175 : vector<1x16xf32> to vector<64x16xf32>
    %177 = arith.addf %174, %176 : vector<64x16xf32>
    %c0_108 = arith.constant 0 : index
    %c0_109 = arith.constant 0 : index
    %178 = vector.load %arg16[%c0_108, %c0_109] : memref<16x16xf32, #tpu.memory_space<vmem>>, vector<16x16xf32>
    %cst_110 = arith.constant dense<0.000000e+00> : vector<64x16xf32>
    %179 = tpu.matmul %172, %178, %cst_110 {dimension_numbers = #tpu.dot_dimension_numbers<[1], [0], [0], [1], [0, 0, 1, 1], [], []>} : vector<64x16xf32>, vector<16x16xf32>, vector<64x16xf32> -> vector<64x16xf32>
    %c0_111 = arith.constant 0 : index
    %c0_112 = arith.constant 0 : index
    %180 = vector.load %arg17[%c0_111, %c0_112] : memref<1x16xf32, #tpu.memory_space<vmem>>, vector<1x16xf32>
    %181 = vector.broadcast %180 : vector<1x16xf32> to vector<64x16xf32>
    %182 = arith.addf %179, %181 : vector<64x16xf32>
    %c0_113 = arith.constant 0 : index
    %c0_114 = arith.constant 0 : index
    %183 = vector.load %arg18[%c0_113, %c0_114] : memref<64x16xf32, #tpu.memory_space<vmem>>, vector<64x16xf32>
    %c0_115 = arith.constant 0 : index
    %c0_116 = arith.constant 0 : index
    %184 = vector.load %arg19[%c0_115, %c0_116] : memref<64x16xf32, #tpu.memory_space<vmem>>, vector<64x16xf32>
    %185 = arith.mulf %177, %183 : vector<64x16xf32>
    %186 = arith.addf %185, %184 : vector<64x16xf32>
    %187 = arith.mulf %182, %183 : vector<64x16xf32>
    %188 = arith.addf %187, %184 : vector<64x16xf32>
    %c0_117 = arith.constant 0 : index
    %c0_118 = arith.constant 0 : index
    %189 = vector.load %arg38[%c0_117, %c0_118] : memref<64x16xf32, #tpu.memory_space<vmem>>, vector<64x16xf32>
    %c0_119 = arith.constant 0 : index
    %c0_120 = arith.constant 0 : index
    %190 = vector.load %arg38[%c0_119, %c0_120] : memref<64x16xf32, #tpu.memory_space<vmem>>, vector<64x16xf32>
    %191 = arith.subf %186, %190 : vector<64x16xf32>
    %cst_121 = arith.constant 5.000000e-01 : f32
    %192 = vector.broadcast %cst_121 : f32 to vector<64x16xf32>
    %193 = arith.mulf %191, %192 : vector<64x16xf32>
    %194 = arith.addf %189, %193 : vector<64x16xf32>
    %c0_122 = arith.constant 0 : index
    %c0_123 = arith.constant 0 : index
    %195 = vector.load %arg39[%c0_122, %c0_123] : memref<64x16xf32, #tpu.memory_space<vmem>>, vector<64x16xf32>
    %c0_124 = arith.constant 0 : index
    %c0_125 = arith.constant 0 : index
    %196 = vector.load %arg39[%c0_124, %c0_125] : memref<64x16xf32, #tpu.memory_space<vmem>>, vector<64x16xf32>
    %197 = arith.subf %188, %196 : vector<64x16xf32>
    %cst_126 = arith.constant 5.000000e-01 : f32
    %198 = vector.broadcast %cst_126 : f32 to vector<64x16xf32>
    %199 = arith.mulf %197, %198 : vector<64x16xf32>
    %200 = arith.addf %195, %199 : vector<64x16xf32>
    %cst_127 = arith.constant 1.000000e+00 : f32
    %201 = vector.broadcast %cst_127 : f32 to vector<64x16xf32>
    %202 = arith.cmpf oge, %194, %201 : vector<64x16xf32>
    %cst_128 = arith.constant 1.000000e+00 : f32
    %cst_129 = arith.constant 0.000000e+00 : f32
    %203 = vector.broadcast %cst_128 : f32 to vector<64x16xf32>
    %204 = vector.broadcast %cst_129 : f32 to vector<64x16xf32>
    %205 = arith.select %202, %203, %204 : vector<64x16xi1>, vector<64x16xf32>
    %cst_130 = arith.constant 1.000000e+00 : f32
    %206 = vector.broadcast %cst_130 : f32 to vector<64x16xf32>
    %207 = arith.cmpf oge, %200, %206 : vector<64x16xf32>
    %cst_131 = arith.constant 1.000000e+00 : f32
    %cst_132 = arith.constant 0.000000e+00 : f32
    %208 = vector.broadcast %cst_131 : f32 to vector<64x16xf32>
    %209 = vector.broadcast %cst_132 : f32 to vector<64x16xf32>
    %210 = arith.select %207, %208, %209 : vector<64x16xi1>, vector<64x16xf32>
    %cst_133 = arith.constant 1.000000e+00 : f32
    %211 = vector.broadcast %cst_133 : f32 to vector<64x16xf32>
    %212 = arith.subf %211, %205 : vector<64x16xf32>
    %213 = arith.mulf %194, %212 : vector<64x16xf32>
    %c0_134 = arith.constant 0 : index
    %c0_135 = arith.constant 0 : index
    %214 = vector.load %arg38[%c0_134, %c0_135] : memref<64x16xf32, #tpu.memory_space<vmem>>, vector<64x16xf32>
    tpu.vector_store %arg38[%c0_134, %c0_135], %213 {strides = array<i32>} : memref<64x16xf32, #tpu.memory_space<vmem>>, vector<64x16xf32>,
    %cst_136 = arith.constant 1.000000e+00 : f32
    %215 = vector.broadcast %cst_136 : f32 to vector<64x16xf32>
    %216 = arith.subf %215, %210 : vector<64x16xf32>
    %217 = arith.mulf %200, %216 : vector<64x16xf32>
    %c0_137 = arith.constant 0 : index
    %c0_138 = arith.constant 0 : index
    %218 = vector.load %arg39[%c0_137, %c0_138] : memref<64x16xf32, #tpu.memory_space<vmem>>, vector<64x16xf32>
    tpu.vector_store %arg39[%c0_137, %c0_138], %217 {strides = array<i32>} : memref<64x16xf32, #tpu.memory_space<vmem>>, vector<64x16xf32>,
    %cst_139 = arith.constant 1.000000e+00 : f32
    %219 = vector.broadcast %cst_139 : f32 to vector<64x16xf32>
    %220 = arith.addf %205, %219 : vector<64x16xf32>
    %cst_140 = arith.constant 1.000000e+00 : f32
    %221 = vector.broadcast %cst_140 : f32 to vector<64x16xf32>
    %222 = arith.addf %210, %221 : vector<64x16xf32>
    %c0_141 = arith.constant 0 : index
    %c0_142 = arith.constant 0 : index
    %223 = vector.load %arg20[%c0_141, %c0_142] : memref<64x16xf32, #tpu.memory_space<vmem>>, vector<64x16xf32>
    %c0_143 = arith.constant 0 : index
    %c0_144 = arith.constant 0 : index
    %224 = vector.load %arg21[%c0_143, %c0_144] : memref<64x16xf32, #tpu.memory_space<vmem>>, vector<64x16xf32>
    %c0_145 = arith.constant 0 : index
    %c0_146 = arith.constant 0 : index
    %225 = vector.load %arg22[%c0_145, %c0_146] : memref<16x16xf32, #tpu.memory_space<vmem>>, vector<16x16xf32>
    %c0_147 = arith.constant 0 : index
    %c0_148 = arith.constant 0 : index
    %226 = vector.load %arg23[%c0_147, %c0_148] : memref<16x16xf32, #tpu.memory_space<vmem>>, vector<16x16xf32>
    %227 = arith.mulf %220, %223 : vector<64x16xf32>
    %cst_149 = arith.constant dense<0.000000e+00> : vector<64x16xf32>
    %228 = tpu.matmul %220, %225, %cst_149 {dimension_numbers = #tpu.dot_dimension_numbers<[1], [0], [0], [1], [0, 0, 1, 1], [], []>} : vector<64x16xf32>, vector<16x16xf32>, vector<64x16xf32> -> vector<64x16xf32>
    %229 = arith.mulf %228, %224 : vector<64x16xf32>
    %230 = arith.addf %227, %229 : vector<64x16xf32>
    %231 = arith.mulf %222, %223 : vector<64x16xf32>
    %cst_150 = arith.constant dense<0.000000e+00> : vector<64x16xf32>
    %232 = tpu.matmul %222, %225, %cst_150 {dimension_numbers = #tpu.dot_dimension_numbers<[1], [0], [0], [1], [0, 0, 1, 1], [], []>} : vector<64x16xf32>, vector<16x16xf32>, vector<64x16xf32> -> vector<64x16xf32>
    %233 = arith.mulf %232, %224 : vector<64x16xf32>
    %234 = arith.addf %231, %233 : vector<64x16xf32>
    %cst_151 = arith.constant dense<0.000000e+00> : vector<16xf32>
    %235 = vector.multi_reduction <add>, %222, %cst_151 [0] : vector<64x16xf32> to vector<16xf32>
    %236 = vector.shape_cast %235 : vector<16xf32> to vector<1x16xf32>
    %cst_152 = arith.constant 6.400000e+01 : f32
    %237 = vector.broadcast %cst_152 : f32 to vector<1x16xf32>
    %238 = arith.divf %236, %237 : vector<1x16xf32>
    %239 = vector.broadcast %238 : vector<1x16xf32> to vector<64x16xf32>
    %240 = arith.mulf %220, %239 : vector<64x16xf32>
    %cst_153 = arith.constant dense<0.000000e+00> : vector<64x16xf32>
    %241 = tpu.matmul %240, %226, %cst_153 {dimension_numbers = #tpu.dot_dimension_numbers<[1], [0], [0], [1], [0, 0, 1, 1], [], []>} : vector<64x16xf32>, vector<16x16xf32>, vector<64x16xf32> -> vector<64x16xf32>
    %cst_154 = arith.constant 9.99999997E-7 : f32
    %242 = vector.broadcast %cst_154 : f32 to vector<64x16xf32>
    %243 = arith.addf %241, %242 : vector<64x16xf32>
    %cst_155 = arith.constant 1.000000e+00 : f32
    %244 = vector.broadcast %cst_155 : f32 to vector<64x16xf32>
    %245 = arith.divf %244, %243 : vector<64x16xf32>
    %cst_156 = arith.constant dense<0.000000e+00> : vector<16x16xf32>
    %246 = tpu.matmul %234, %172, %cst_156 {dimension_numbers = #tpu.dot_dimension_numbers<[0], [0], [1], [1], [0, 1, 1, 1], [], []>} : vector<64x16xf32>, vector<64x16xf32>, vector<16x16xf32> -> vector<16x16xf32>
    %cst_157 = arith.constant 1.562500e-02 : f32
    %247 = vector.broadcast %cst_157 : f32 to vector<16x16xf32>
    %248 = arith.mulf %246, %247 : vector<16x16xf32>
    %249 = arith.mulf %248, %226 : vector<16x16xf32>
    %cst_158 = arith.constant dense<0.000000e+00> : vector<64x16xf32>
    %250 = tpu.matmul %230, %249, %cst_158 {dimension_numbers = #tpu.dot_dimension_numbers<[1], [0], [0], [1], [0, 0, 1, 1], [], []>} : vector<64x16xf32>, vector<16x16xf32>, vector<64x16xf32> -> vector<64x16xf32>
    %251 = arith.mulf %250, %245 : vector<64x16xf32>
    %c16_159 = arith.constant 16 : index
    %c0_160 = arith.constant 0 : index
    %252 = vector.load %arg37[%c16_159, %c0_160] : memref<96x16xf32, #tpu.memory_space<vmem>>, vector<64x16xf32>
    tpu.vector_store %arg37[%c16_159, %c0_160], %172 {strides = array<i32>} : memref<96x16xf32, #tpu.memory_space<vmem>>, vector<64x16xf32>,
    %cst_161 = arith.constant 0.000000e+00 : f32
    %253 = vector.broadcast %cst_161 : f32 to vector<64x16xf32>
    %c0_162 = arith.constant 0 : index
    %c0_163 = arith.constant 0 : index
    %254 = vector.load %arg24[%c0_162, %c0_163] : memref<9x16xf32, #tpu.memory_space<vmem>>, vector<1x16xf32>
    %c7_164 = arith.constant 7 : index
    %c0_165 = arith.constant 0 : index
    %255 = vector.load %arg37[%c7_164, %c0_165] : memref<96x16xf32, #tpu.memory_space<vmem>>, vector<64x16xf32>
    %256 = arith.mulf %255, %3 : vector<64x16xf32>
    %257 = vector.broadcast %254 : vector<1x16xf32> to vector<64x16xf32>
    %258 = arith.mulf %256, %257 : vector<64x16xf32>
    %259 = arith.addf %253, %258 : vector<64x16xf32>
    %c1_166 = arith.constant 1 : index
    %c0_167 = arith.constant 0 : index
    %260 = vector.load %arg24[%c1_166, %c0_167] : memref<9x16xf32, #tpu.memory_space<vmem>>, vector<1x16xf32>
    %c8_168 = arith.constant 8 : index
    %c0_169 = arith.constant 0 : index
    %261 = vector.load %arg37[%c8_168, %c0_169] : memref<96x16xf32, #tpu.memory_space<vmem>>, vector<64x16xf32>
    %262 = vector.broadcast %260 : vector<1x16xf32> to vector<64x16xf32>
    %263 = arith.mulf %261, %262 : vector<64x16xf32>
    %264 = arith.addf %259, %263 : vector<64x16xf32>
    %c2_170 = arith.constant 2 : index
    %c0_171 = arith.constant 0 : index
    %265 = vector.load %arg24[%c2_170, %c0_171] : memref<9x16xf32, #tpu.memory_space<vmem>>, vector<1x16xf32>
    %c9_172 = arith.constant 9 : index
    %c0_173 = arith.constant 0 : index
    %266 = vector.load %arg37[%c9_172, %c0_173] : memref<96x16xf32, #tpu.memory_space<vmem>>, vector<64x16xf32>
    %267 = arith.mulf %266, %4 : vector<64x16xf32>
    %268 = vector.broadcast %265 : vector<1x16xf32> to vector<64x16xf32>
    %269 = arith.mulf %267, %268 : vector<64x16xf32>
    %270 = arith.addf %264, %269 : vector<64x16xf32>
    %c3_174 = arith.constant 3 : index
    %c0_175 = arith.constant 0 : index
    %271 = vector.load %arg24[%c3_174, %c0_175] : memref<9x16xf32, #tpu.memory_space<vmem>>, vector<1x16xf32>
    %c15_176 = arith.constant 15 : index
    %c0_177 = arith.constant 0 : index
    %272 = vector.load %arg37[%c15_176, %c0_177] : memref<96x16xf32, #tpu.memory_space<vmem>>, vector<64x16xf32>
    %273 = arith.mulf %272, %3 : vector<64x16xf32>
    %274 = vector.broadcast %271 : vector<1x16xf32> to vector<64x16xf32>
    %275 = arith.mulf %273, %274 : vector<64x16xf32>
    %276 = arith.addf %270, %275 : vector<64x16xf32>
    %c4_178 = arith.constant 4 : index
    %c0_179 = arith.constant 0 : index
    %277 = vector.load %arg24[%c4_178, %c0_179] : memref<9x16xf32, #tpu.memory_space<vmem>>, vector<1x16xf32>
    %c16_180 = arith.constant 16 : index
    %c0_181 = arith.constant 0 : index
    %278 = vector.load %arg37[%c16_180, %c0_181] : memref<96x16xf32, #tpu.memory_space<vmem>>, vector<64x16xf32>
    %279 = vector.broadcast %277 : vector<1x16xf32> to vector<64x16xf32>
    %280 = arith.mulf %278, %279 : vector<64x16xf32>
    %281 = arith.addf %276, %280 : vector<64x16xf32>
    %c5_182 = arith.constant 5 : index
    %c0_183 = arith.constant 0 : index
    %282 = vector.load %arg24[%c5_182, %c0_183] : memref<9x16xf32, #tpu.memory_space<vmem>>, vector<1x16xf32>
    %c17_184 = arith.constant 17 : index
    %c0_185 = arith.constant 0 : index
    %283 = vector.load %arg37[%c17_184, %c0_185] : memref<96x16xf32, #tpu.memory_space<vmem>>, vector<64x16xf32>
    %284 = arith.mulf %283, %4 : vector<64x16xf32>
    %285 = vector.broadcast %282 : vector<1x16xf32> to vector<64x16xf32>
    %286 = arith.mulf %284, %285 : vector<64x16xf32>
    %287 = arith.addf %281, %286 : vector<64x16xf32>
    %c6_186 = arith.constant 6 : index
    %c0_187 = arith.constant 0 : index
    %288 = vector.load %arg24[%c6_186, %c0_187] : memref<9x16xf32, #tpu.memory_space<vmem>>, vector<1x16xf32>
    %c23_188 = arith.constant 23 : index
    %c0_189 = arith.constant 0 : index
    %289 = vector.load %arg37[%c23_188, %c0_189] : memref<96x16xf32, #tpu.memory_space<vmem>>, vector<64x16xf32>
    %290 = arith.mulf %289, %3 : vector<64x16xf32>
    %291 = vector.broadcast %288 : vector<1x16xf32> to vector<64x16xf32>
    %292 = arith.mulf %290, %291 : vector<64x16xf32>
    %293 = arith.addf %287, %292 : vector<64x16xf32>
    %c7_190 = arith.constant 7 : index
    %c0_191 = arith.constant 0 : index
    %294 = vector.load %arg24[%c7_190, %c0_191] : memref<9x16xf32, #tpu.memory_space<vmem>>, vector<1x16xf32>
    %c24_192 = arith.constant 24 : index
    %c0_193 = arith.constant 0 : index
    %295 = vector.load %arg37[%c24_192, %c0_193] : memref<96x16xf32, #tpu.memory_space<vmem>>, vector<64x16xf32>
    %296 = vector.broadcast %294 : vector<1x16xf32> to vector<64x16xf32>
    %297 = arith.mulf %295, %296 : vector<64x16xf32>
    %298 = arith.addf %293, %297 : vector<64x16xf32>
    %c8_194 = arith.constant 8 : index
    %c0_195 = arith.constant 0 : index
    %299 = vector.load %arg24[%c8_194, %c0_195] : memref<9x16xf32, #tpu.memory_space<vmem>>, vector<1x16xf32>
    %c25_196 = arith.constant 25 : index
    %c0_197 = arith.constant 0 : index
    %300 = vector.load %arg37[%c25_196, %c0_197] : memref<96x16xf32, #tpu.memory_space<vmem>>, vector<64x16xf32>
    %301 = arith.mulf %300, %4 : vector<64x16xf32>
    %302 = vector.broadcast %299 : vector<1x16xf32> to vector<64x16xf32>
    %303 = arith.mulf %301, %302 : vector<64x16xf32>
    %304 = arith.addf %298, %303 : vector<64x16xf32>
    %c0_198 = arith.constant 0 : index
    %c0_199 = arith.constant 0 : index
    %305 = vector.load %arg25[%c0_198, %c0_199] : memref<1x16xf32, #tpu.memory_space<vmem>>, vector<1x16xf32>
    %306 = vector.broadcast %305 : vector<1x16xf32> to vector<64x16xf32>
    %307 = arith.addf %304, %306 : vector<64x16xf32>
    %308 = arith.addf %251, %307 : vector<64x16xf32>
    %309 = arith.mulf %308, %103 : vector<64x16xf32>
    %c0_200 = arith.constant 0 : index
    %c0_201 = arith.constant 0 : index
    %310 = vector.load %arg26[%c0_200, %c0_201] : memref<16x16xf32, #tpu.memory_space<vmem>>, vector<16x16xf32>
    %cst_202 = arith.constant dense<0.000000e+00> : vector<64x16xf32>
    %311 = tpu.matmul %309, %310, %cst_202 {dimension_numbers = #tpu.dot_dimension_numbers<[1], [0], [0], [1], [0, 0, 1, 1], [], []>} : vector<64x16xf32>, vector<16x16xf32>, vector<64x16xf32> -> vector<64x16xf32>
    %c0_203 = arith.constant 0 : index
    %c0_204 = arith.constant 0 : index
    %312 = vector.load %arg27[%c0_203, %c0_204] : memref<1x16xf32, #tpu.memory_space<vmem>>, vector<1x16xf32>
    %313 = vector.broadcast %312 : vector<1x16xf32> to vector<64x16xf32>
    %314 = arith.addf %311, %313 : vector<64x16xf32>
    %315 = arith.addf %63, %314 : vector<64x16xf32>
    %c16_205 = arith.constant 16 : index
    %c0_206 = arith.constant 0 : index
    %316 = vector.load %arg37[%c16_205, %c0_206] : memref<96x16xf32, #tpu.memory_space<vmem>>, vector<64x16xf32>
    tpu.vector_store %arg37[%c16_205, %c0_206], %315 {strides = array<i32>} : memref<96x16xf32, #tpu.memory_space<vmem>>, vector<64x16xf32>,
    %cst_207 = arith.constant 0.000000e+00 : f32
    %317 = vector.broadcast %cst_207 : f32 to vector<64x16xf32>
    %c0_208 = arith.constant 0 : index
    %c0_209 = arith.constant 0 : index
    %318 = vector.load %arg28[%c0_208, %c0_209] : memref<9x16xf32, #tpu.memory_space<vmem>>, vector<1x16xf32>
    %c7_210 = arith.constant 7 : index
    %c0_211 = arith.constant 0 : index
    %319 = vector.load %arg37[%c7_210, %c0_211] : memref<96x16xf32, #tpu.memory_space<vmem>>, vector<64x16xf32>
    %320 = arith.mulf %319, %3 : vector<64x16xf32>
    %321 = vector.broadcast %318 : vector<1x16xf32> to vector<64x16xf32>
    %322 = arith.mulf %320, %321 : vector<64x16xf32>
    %323 = arith.addf %317, %322 : vector<64x16xf32>
    %c1_212 = arith.constant 1 : index
    %c0_213 = arith.constant 0 : index
    %324 = vector.load %arg28[%c1_212, %c0_213] : memref<9x16xf32, #tpu.memory_space<vmem>>, vector<1x16xf32>
    %c8_214 = arith.constant 8 : index
    %c0_215 = arith.constant 0 : index
    %325 = vector.load %arg37[%c8_214, %c0_215] : memref<96x16xf32, #tpu.memory_space<vmem>>, vector<64x16xf32>
    %326 = vector.broadcast %324 : vector<1x16xf32> to vector<64x16xf32>
    %327 = arith.mulf %325, %326 : vector<64x16xf32>
    %328 = arith.addf %323, %327 : vector<64x16xf32>
    %c2_216 = arith.constant 2 : index
    %c0_217 = arith.constant 0 : index
    %329 = vector.load %arg28[%c2_216, %c0_217] : memref<9x16xf32, #tpu.memory_space<vmem>>, vector<1x16xf32>
    %c9_218 = arith.constant 9 : index
    %c0_219 = arith.constant 0 : index
    %330 = vector.load %arg37[%c9_218, %c0_219] : memref<96x16xf32, #tpu.memory_space<vmem>>, vector<64x16xf32>
    %331 = arith.mulf %330, %4 : vector<64x16xf32>
    %332 = vector.broadcast %329 : vector<1x16xf32> to vector<64x16xf32>
    %333 = arith.mulf %331, %332 : vector<64x16xf32>
    %334 = arith.addf %328, %333 : vector<64x16xf32>
    %c3_220 = arith.constant 3 : index
    %c0_221 = arith.constant 0 : index
    %335 = vector.load %arg28[%c3_220, %c0_221] : memref<9x16xf32, #tpu.memory_space<vmem>>, vector<1x16xf32>
    %c15_222 = arith.constant 15 : index
    %c0_223 = arith.constant 0 : index
    %336 = vector.load %arg37[%c15_222, %c0_223] : memref<96x16xf32, #tpu.memory_space<vmem>>, vector<64x16xf32>
    %337 = arith.mulf %336, %3 : vector<64x16xf32>
    %338 = vector.broadcast %335 : vector<1x16xf32> to vector<64x16xf32>
    %339 = arith.mulf %337, %338 : vector<64x16xf32>
    %340 = arith.addf %334, %339 : vector<64x16xf32>
    %c4_224 = arith.constant 4 : index
    %c0_225 = arith.constant 0 : index
    %341 = vector.load %arg28[%c4_224, %c0_225] : memref<9x16xf32, #tpu.memory_space<vmem>>, vector<1x16xf32>
    %c16_226 = arith.constant 16 : index
    %c0_227 = arith.constant 0 : index
    %342 = vector.load %arg37[%c16_226, %c0_227] : memref<96x16xf32, #tpu.memory_space<vmem>>, vector<64x16xf32>
    %343 = vector.broadcast %341 : vector<1x16xf32> to vector<64x16xf32>
    %344 = arith.mulf %342, %343 : vector<64x16xf32>
    %345 = arith.addf %340, %344 : vector<64x16xf32>
    %c5_228 = arith.constant 5 : index
    %c0_229 = arith.constant 0 : index
    %346 = vector.load %arg28[%c5_228, %c0_229] : memref<9x16xf32, #tpu.memory_space<vmem>>, vector<1x16xf32>
    %c17_230 = arith.constant 17 : index
    %c0_231 = arith.constant 0 : index
    %347 = vector.load %arg37[%c17_230, %c0_231] : memref<96x16xf32, #tpu.memory_space<vmem>>, vector<64x16xf32>
    %348 = arith.mulf %347, %4 : vector<64x16xf32>
    %349 = vector.broadcast %346 : vector<1x16xf32> to vector<64x16xf32>
    %350 = arith.mulf %348, %349 : vector<64x16xf32>
    %351 = arith.addf %345, %350 : vector<64x16xf32>
    %c6_232 = arith.constant 6 : index
    %c0_233 = arith.constant 0 : index
    %352 = vector.load %arg28[%c6_232, %c0_233] : memref<9x16xf32, #tpu.memory_space<vmem>>, vector<1x16xf32>
    %c23_234 = arith.constant 23 : index
    %c0_235 = arith.constant 0 : index
    %353 = vector.load %arg37[%c23_234, %c0_235] : memref<96x16xf32, #tpu.memory_space<vmem>>, vector<64x16xf32>
    %354 = arith.mulf %353, %3 : vector<64x16xf32>
    %355 = vector.broadcast %352 : vector<1x16xf32> to vector<64x16xf32>
    %356 = arith.mulf %354, %355 : vector<64x16xf32>
    %357 = arith.addf %351, %356 : vector<64x16xf32>
    %c7_236 = arith.constant 7 : index
    %c0_237 = arith.constant 0 : index
    %358 = vector.load %arg28[%c7_236, %c0_237] : memref<9x16xf32, #tpu.memory_space<vmem>>, vector<1x16xf32>
    %c24_238 = arith.constant 24 : index
    %c0_239 = arith.constant 0 : index
    %359 = vector.load %arg37[%c24_238, %c0_239] : memref<96x16xf32, #tpu.memory_space<vmem>>, vector<64x16xf32>
    %360 = vector.broadcast %358 : vector<1x16xf32> to vector<64x16xf32>
    %361 = arith.mulf %359, %360 : vector<64x16xf32>
    %362 = arith.addf %357, %361 : vector<64x16xf32>
    %c8_240 = arith.constant 8 : index
    %c0_241 = arith.constant 0 : index
    %363 = vector.load %arg28[%c8_240, %c0_241] : memref<9x16xf32, #tpu.memory_space<vmem>>, vector<1x16xf32>
    %c25_242 = arith.constant 25 : index
    %c0_243 = arith.constant 0 : index
    %364 = vector.load %arg37[%c25_242, %c0_243] : memref<96x16xf32, #tpu.memory_space<vmem>>, vector<64x16xf32>
    %365 = arith.mulf %364, %4 : vector<64x16xf32>
    %366 = vector.broadcast %363 : vector<1x16xf32> to vector<64x16xf32>
    %367 = arith.mulf %365, %366 : vector<64x16xf32>
    %368 = arith.addf %362, %367 : vector<64x16xf32>
    %c0_244 = arith.constant 0 : index
    %c0_245 = arith.constant 0 : index
    %369 = vector.load %arg29[%c0_244, %c0_245] : memref<1x16xf32, #tpu.memory_space<vmem>>, vector<1x16xf32>
    %370 = vector.broadcast %369 : vector<1x16xf32> to vector<64x16xf32>
    %371 = arith.addf %368, %370 : vector<64x16xf32>
    %372 = arith.addf %315, %371 : vector<64x16xf32>
    %c0_246 = arith.constant 0 : index
    %c0_247 = arith.constant 0 : index
    %373 = vector.load %arg30[%c0_246, %c0_247] : memref<1x16xf32, #tpu.memory_space<vmem>>, vector<1x16xf32>
    %c0_248 = arith.constant 0 : index
    %c0_249 = arith.constant 0 : index
    %374 = vector.load %arg31[%c0_248, %c0_249] : memref<1x16xf32, #tpu.memory_space<vmem>>, vector<1x16xf32>
    %cst_250 = arith.constant dense<0.000000e+00> : vector<64xf32>
    %375 = vector.multi_reduction <add>, %372, %cst_250 [1] : vector<64x16xf32> to vector<64xf32>
    %376 = vector.shape_cast %375 : vector<64xf32> to vector<64x1xf32>
    %cst_251 = arith.constant 1.600000e+01 : f32
    %377 = vector.broadcast %cst_251 : f32 to vector<64x1xf32>
    %378 = arith.divf %376, %377 : vector<64x1xf32>
    %379 = vector.broadcast %378 : vector<64x1xf32> to vector<64x16xf32>
    %380 = arith.subf %372, %379 : vector<64x16xf32>
    %381 = arith.mulf %380, %380 : vector<64x16xf32>
    %cst_252 = arith.constant dense<0.000000e+00> : vector<64xf32>
    %382 = vector.multi_reduction <add>, %381, %cst_252 [1] : vector<64x16xf32> to vector<64xf32>
    %383 = vector.shape_cast %382 : vector<64xf32> to vector<64x1xf32>
    %cst_253 = arith.constant 1.600000e+01 : f32
    %384 = vector.broadcast %cst_253 : f32 to vector<64x1xf32>
    %385 = arith.divf %383, %384 : vector<64x1xf32>
    %cst_254 = arith.constant 9.99999974E-6 : f32
    %386 = vector.broadcast %cst_254 : f32 to vector<64x1xf32>
    %387 = arith.addf %385, %386 : vector<64x1xf32>
    %388 = math.rsqrt %387 : vector<64x1xf32>
    %389 = vector.broadcast %388 : vector<64x1xf32> to vector<64x16xf32>
    %390 = arith.mulf %380, %389 : vector<64x16xf32>
    %391 = vector.broadcast %373 : vector<1x16xf32> to vector<64x16xf32>
    %392 = arith.mulf %390, %391 : vector<64x16xf32>
    %393 = vector.broadcast %374 : vector<1x16xf32> to vector<64x16xf32>
    %394 = arith.addf %392, %393 : vector<64x16xf32>
    %c0_255 = arith.constant 0 : index
    %c0_256 = arith.constant 0 : index
    %395 = vector.load %arg32[%c0_255, %c0_256] : memref<16x64xf32, #tpu.memory_space<vmem>>, vector<16x64xf32>
    %cst_257 = arith.constant dense<0.000000e+00> : vector<64x64xf32>
    %396 = tpu.matmul %394, %395, %cst_257 {dimension_numbers = #tpu.dot_dimension_numbers<[1], [0], [0], [1], [0, 0, 1, 1], [], []>} : vector<64x16xf32>, vector<16x64xf32>, vector<64x64xf32> -> vector<64x64xf32>
    %c0_258 = arith.constant 0 : index
    %c0_259 = arith.constant 0 : index
    %397 = vector.load %arg33[%c0_258, %c0_259] : memref<1x64xf32, #tpu.memory_space<vmem>>, vector<1x64xf32>
    %398 = vector.broadcast %397 : vector<1x64xf32> to vector<64x64xf32>
    %399 = arith.addf %396, %398 : vector<64x64xf32>
    %cst_260 = arith.constant 5.000000e-01 : f32
    %400 = vector.broadcast %cst_260 : f32 to vector<64x64xf32>
    %401 = arith.mulf %400, %399 : vector<64x64xf32>
    %cst_261 = arith.constant 0.707106769 : f32
    %402 = vector.broadcast %cst_261 : f32 to vector<64x64xf32>
    %403 = arith.mulf %399, %402 : vector<64x64xf32>
    %404 = math.absf %403 : vector<64x64xf32>
    %cst_262 = arith.constant 0.327591091 : f32
    %405 = vector.broadcast %cst_262 : f32 to vector<64x64xf32>
    %406 = arith.mulf %405, %404 : vector<64x64xf32>
    %cst_263 = arith.constant 1.000000e+00 : f32
    %407 = vector.broadcast %cst_263 : f32 to vector<64x64xf32>
    %408 = arith.addf %407, %406 : vector<64x64xf32>
    %cst_264 = arith.constant 1.000000e+00 : f32
    %409 = vector.broadcast %cst_264 : f32 to vector<64x64xf32>
    %410 = arith.divf %409, %408 : vector<64x64xf32>
    %cst_265 = arith.constant 1.06140542 : f32
    %411 = vector.broadcast %cst_265 : f32 to vector<64x64xf32>
    %412 = arith.mulf %410, %411 : vector<64x64xf32>
    %cst_266 = arith.constant -1.45315206 : f32
    %413 = vector.broadcast %cst_266 : f32 to vector<64x64xf32>
    %414 = arith.addf %413, %412 : vector<64x64xf32>
    %415 = arith.mulf %410, %414 : vector<64x64xf32>
    %cst_267 = arith.constant 1.42141378 : f32
    %416 = vector.broadcast %cst_267 : f32 to vector<64x64xf32>
    %417 = arith.addf %416, %415 : vector<64x64xf32>
    %418 = arith.mulf %410, %417 : vector<64x64xf32>
    %cst_268 = arith.constant -0.284496725 : f32
    %419 = vector.broadcast %cst_268 : f32 to vector<64x64xf32>
    %420 = arith.addf %419, %418 : vector<64x64xf32>
    %421 = arith.mulf %410, %420 : vector<64x64xf32>
    %cst_269 = arith.constant 0.254829586 : f32
    %422 = vector.broadcast %cst_269 : f32 to vector<64x64xf32>
    %423 = arith.addf %422, %421 : vector<64x64xf32>
    %424 = arith.mulf %410, %423 : vector<64x64xf32>
    %cst_270 = arith.constant 0.000000e+00 : f32
    %425 = vector.broadcast %cst_270 : f32 to vector<64x64xf32>
    %426 = arith.subf %425, %403 : vector<64x64xf32>
    %427 = arith.mulf %426, %403 : vector<64x64xf32>
    %428 = math.exp %427 : vector<64x64xf32>
    %429 = arith.mulf %424, %428 : vector<64x64xf32>
    %cst_271 = arith.constant 1.000000e+00 : f32
    %430 = vector.broadcast %cst_271 : f32 to vector<64x64xf32>
    %431 = arith.subf %430, %429 : vector<64x64xf32>
    %cst_272 = arith.constant 0.000000e+00 : f32
    %432 = vector.broadcast %cst_272 : f32 to vector<64x64xf32>
    %433 = arith.cmpf oge, %403, %432 : vector<64x64xf32>
    %cst_273 = arith.constant 0.000000e+00 : f32
    %434 = vector.broadcast %cst_273 : f32 to vector<64x64xf32>
    %435 = arith.subf %434, %431 : vector<64x64xf32>
    %436 = arith.select %433, %431, %435 : vector<64x64xi1>, vector<64x64xf32>
    %cst_274 = arith.constant 1.000000e+00 : f32
    %437 = vector.broadcast %cst_274 : f32 to vector<64x64xf32>
    %438 = arith.addf %437, %436 : vector<64x64xf32>
    %439 = arith.mulf %401, %438 : vector<64x64xf32>
    %c0_275 = arith.constant 0 : index
    %c0_276 = arith.constant 0 : index
    %440 = vector.load %arg34[%c0_275, %c0_276] : memref<64x16xf32, #tpu.memory_space<vmem>>, vector<64x16xf32>
    %cst_277 = arith.constant dense<0.000000e+00> : vector<64x16xf32>
    %441 = tpu.matmul %439, %440, %cst_277 {dimension_numbers = #tpu.dot_dimension_numbers<[1], [0], [0], [1], [0, 0, 1, 1], [], []>} : vector<64x64xf32>, vector<64x16xf32>, vector<64x16xf32> -> vector<64x16xf32>
    %c0_278 = arith.constant 0 : index
    %c0_279 = arith.constant 0 : index
    %442 = vector.load %arg35[%c0_278, %c0_279] : memref<1x16xf32, #tpu.memory_space<vmem>>, vector<1x16xf32>
    %443 = vector.broadcast %442 : vector<1x16xf32> to vector<64x16xf32>
    %444 = arith.addf %441, %443 : vector<64x16xf32>
    %445 = arith.addf %372, %444 : vector<64x16xf32>
    %c0_280 = arith.constant 0 : index
    %c0_281 = arith.constant 0 : index
    %c0_282 = arith.constant 0 : index
    %446 = vector.load %arg36[%c0_280, %c0_281, %c0_282] : memref<1x64x16xf32, #tpu.memory_space<vmem>>, vector<1x64x16xf32>
    %447 = vector.shape_cast %446 : vector<1x64x16xf32> to vector<64x16xf32>
    %448 = vector.shape_cast %445 : vector<64x16xf32> to vector<1x64x16xf32>
    tpu.vector_store %arg36[%c0_280, %c0_281, %c0_282], %448 {strides = array<i32>} : memref<1x64x16xf32, #tpu.memory_space<vmem>>, vector<1x64x16xf32>,
    return
  }
  func.func @transform_0(%arg0: i32) -> (i32, i32, i32) {
    %c0_i32 = arith.constant 0 : i32
    %c0_i32_0 = arith.constant 0 : i32
    %c0_i32_1 = arith.constant 0 : i32
    return %arg0, %c0_i32, %c0_i32_0 : i32, i32, i32
  }
  func.func @transform_1(%arg0: i32) -> (i32, i32) {
    %c0_i32 = arith.constant 0 : i32
    %c0_i32_0 = arith.constant 0 : i32
    %c0_i32_1 = arith.constant 0 : i32
    return %c0_i32, %c0_i32_0 : i32, i32
  }
  func.func @transform_2(%arg0: i32) -> (i32, i32) {
    %c0_i32 = arith.constant 0 : i32
    %c0_i32_0 = arith.constant 0 : i32
    %c0_i32_1 = arith.constant 0 : i32
    return %c0_i32, %c0_i32_0 : i32, i32
  }
  func.func @transform_3(%arg0: i32) -> (i32, i32) {
    %c0_i32 = arith.constant 0 : i32
    %c0_i32_0 = arith.constant 0 : i32
    %c0_i32_1 = arith.constant 0 : i32
    return %c0_i32, %c0_i32_0 : i32, i32
  }
  func.func @transform_4(%arg0: i32) -> (i32, i32) {
    %c0_i32 = arith.constant 0 : i32
    %c0_i32_0 = arith.constant 0 : i32
    %c0_i32_1 = arith.constant 0 : i32
    return %c0_i32, %c0_i32_0 : i32, i32
  }
  func.func @transform_5(%arg0: i32) -> (i32, i32) {
    %c0_i32 = arith.constant 0 : i32
    %c0_i32_0 = arith.constant 0 : i32
    %c0_i32_1 = arith.constant 0 : i32
    return %c0_i32, %c0_i32_0 : i32, i32
  }
  func.func @transform_6(%arg0: i32) -> (i32, i32) {
    %c0_i32 = arith.constant 0 : i32
    %c0_i32_0 = arith.constant 0 : i32
    %c0_i32_1 = arith.constant 0 : i32
    return %c0_i32, %c0_i32_0 : i32, i32
  }
  func.func @transform_7(%arg0: i32) -> (i32, i32) {
    %c0_i32 = arith.constant 0 : i32
    %c0_i32_0 = arith.constant 0 : i32
    %c0_i32_1 = arith.constant 0 : i32
    return %c0_i32, %c0_i32_0 : i32, i32
  }
  func.func @transform_8(%arg0: i32) -> (i32, i32) {
    %c0_i32 = arith.constant 0 : i32
    %c0_i32_0 = arith.constant 0 : i32
    %c0_i32_1 = arith.constant 0 : i32
    return %c0_i32, %c0_i32_0 : i32, i32
  }
  func.func @transform_9(%arg0: i32) -> (i32, i32) {
    %c0_i32 = arith.constant 0 : i32
    %c0_i32_0 = arith.constant 0 : i32
    %c0_i32_1 = arith.constant 0 : i32
    return %c0_i32, %c0_i32_0 : i32, i32
  }
  func.func @transform_10(%arg0: i32) -> (i32, i32) {
    %c0_i32 = arith.constant 0 : i32
    %c0_i32_0 = arith.constant 0 : i32
    %c0_i32_1 = arith.constant 0 : i32
    return %c0_i32, %c0_i32_0 : i32, i32
  }
  func.func @transform_11(%arg0: i32) -> (i32, i32) {
    %c0_i32 = arith.constant 0 : i32
    %c0_i32_0 = arith.constant 0 : i32
    %c0_i32_1 = arith.constant 0 : i32
    return %c0_i32, %c0_i32_0 : i32, i32
  }
  func.func @transform_12(%arg0: i32) -> (i32, i32) {
    %c0_i32 = arith.constant 0 : i32
    %c0_i32_0 = arith.constant 0 : i32
    %c0_i32_1 = arith.constant 0 : i32
    return %c0_i32, %c0_i32_0 : i32, i32
  }
  func.func @transform_13(%arg0: i32) -> (i32, i32) {
    %c0_i32 = arith.constant 0 : i32
    %c0_i32_0 = arith.constant 0 : i32
    %c0_i32_1 = arith.constant 0 : i32
    return %c0_i32, %c0_i32_0 : i32, i32
  }
  func.func @transform_14(%arg0: i32) -> (i32, i32) {
    %c0_i32 = arith.constant 0 : i32
    %c0_i32_0 = arith.constant 0 : i32
    %c0_i32_1 = arith.constant 0 : i32
    return %c0_i32, %c0_i32_0 : i32, i32
  }
  func.func @transform_15(%arg0: i32) -> (i32, i32) {
    %c0_i32 = arith.constant 0 : i32
    %c0_i32_0 = arith.constant 0 : i32
    %c0_i32_1 = arith.constant 0 : i32
    return %c0_i32, %c0_i32_0 : i32, i32
  }
  func.func @transform_16(%arg0: i32) -> (i32, i32) {
    %c0_i32 = arith.constant 0 : i32
    %c0_i32_0 = arith.constant 0 : i32
    %c0_i32_1 = arith.constant 0 : i32
    return %c0_i32, %c0_i32_0 : i32, i32
  }
  func.func @transform_17(%arg0: i32) -> (i32, i32) {
    %c0_i32 = arith.constant 0 : i32
    %c0_i32_0 = arith.constant 0 : i32
    %c0_i32_1 = arith.constant 0 : i32
    return %c0_i32, %c0_i32_0 : i32, i32
  }
  func.func @transform_18(%arg0: i32) -> (i32, i32) {
    %c0_i32 = arith.constant 0 : i32
    %c0_i32_0 = arith.constant 0 : i32
    %c0_i32_1 = arith.constant 0 : i32
    return %c0_i32, %c0_i32_0 : i32, i32
  }
  func.func @transform_19(%arg0: i32) -> (i32, i32) {
    %c0_i32 = arith.constant 0 : i32
    %c0_i32_0 = arith.constant 0 : i32
    %c0_i32_1 = arith.constant 0 : i32
    return %c0_i32, %c0_i32_0 : i32, i32
  }
  func.func @transform_20(%arg0: i32) -> (i32, i32) {
    %c0_i32 = arith.constant 0 : i32
    %c0_i32_0 = arith.constant 0 : i32
    %c0_i32_1 = arith.constant 0 : i32
    return %c0_i32, %c0_i32_0 : i32, i32
  }
  func.func @transform_21(%arg0: i32) -> (i32, i32) {
    %c0_i32 = arith.constant 0 : i32
    %c0_i32_0 = arith.constant 0 : i32
    %c0_i32_1 = arith.constant 0 : i32
    return %c0_i32, %c0_i32_0 : i32, i32
  }
  func.func @transform_22(%arg0: i32) -> (i32, i32) {
    %c0_i32 = arith.constant 0 : i32
    %c0_i32_0 = arith.constant 0 : i32
    %c0_i32_1 = arith.constant 0 : i32
    return %c0_i32, %c0_i32_0 : i32, i32
  }
  func.func @transform_23(%arg0: i32) -> (i32, i32) {
    %c0_i32 = arith.constant 0 : i32
    %c0_i32_0 = arith.constant 0 : i32
    %c0_i32_1 = arith.constant 0 : i32
    return %c0_i32, %c0_i32_0 : i32, i32
  }
  func.func @transform_24(%arg0: i32) -> (i32, i32) {
    %c0_i32 = arith.constant 0 : i32
    %c0_i32_0 = arith.constant 0 : i32
    %c0_i32_1 = arith.constant 0 : i32
    return %c0_i32, %c0_i32_0 : i32, i32
  }
  func.func @transform_25(%arg0: i32) -> (i32, i32) {
    %c0_i32 = arith.constant 0 : i32
    %c0_i32_0 = arith.constant 0 : i32
    %c0_i32_1 = arith.constant 0 : i32
    return %c0_i32, %c0_i32_0 : i32, i32
  }
  func.func @transform_26(%arg0: i32) -> (i32, i32) {
    %c0_i32 = arith.constant 0 : i32
    %c0_i32_0 = arith.constant 0 : i32
    %c0_i32_1 = arith.constant 0 : i32
    return %c0_i32, %c0_i32_0 : i32, i32
  }
  func.func @transform_27(%arg0: i32) -> (i32, i32) {
    %c0_i32 = arith.constant 0 : i32
    %c0_i32_0 = arith.constant 0 : i32
    %c0_i32_1 = arith.constant 0 : i32
    return %c0_i32, %c0_i32_0 : i32, i32
  }
  func.func @transform_28(%arg0: i32) -> (i32, i32) {
    %c0_i32 = arith.constant 0 : i32
    %c0_i32_0 = arith.constant 0 : i32
    %c0_i32_1 = arith.constant 0 : i32
    return %c0_i32, %c0_i32_0 : i32, i32
  }
  func.func @transform_29(%arg0: i32) -> (i32, i32) {
    %c0_i32 = arith.constant 0 : i32
    %c0_i32_0 = arith.constant 0 : i32
    %c0_i32_1 = arith.constant 0 : i32
    return %c0_i32, %c0_i32_0 : i32, i32
  }
  func.func @transform_30(%arg0: i32) -> (i32, i32) {
    %c0_i32 = arith.constant 0 : i32
    %c0_i32_0 = arith.constant 0 : i32
    %c0_i32_1 = arith.constant 0 : i32
    return %c0_i32, %c0_i32_0 : i32, i32
  }
  func.func @transform_31(%arg0: i32) -> (i32, i32) {
    %c0_i32 = arith.constant 0 : i32
    %c0_i32_0 = arith.constant 0 : i32
    %c0_i32_1 = arith.constant 0 : i32
    return %c0_i32, %c0_i32_0 : i32, i32
  }
  func.func @transform_32(%arg0: i32) -> (i32, i32) {
    %c0_i32 = arith.constant 0 : i32
    %c0_i32_0 = arith.constant 0 : i32
    %c0_i32_1 = arith.constant 0 : i32
    return %c0_i32, %c0_i32_0 : i32, i32
  }
  func.func @transform_33(%arg0: i32) -> (i32, i32) {
    %c0_i32 = arith.constant 0 : i32
    %c0_i32_0 = arith.constant 0 : i32
    %c0_i32_1 = arith.constant 0 : i32
    return %c0_i32, %c0_i32_0 : i32, i32
  }
  func.func @transform_34(%arg0: i32) -> (i32, i32) {
    %c0_i32 = arith.constant 0 : i32
    %c0_i32_0 = arith.constant 0 : i32
    %c0_i32_1 = arith.constant 0 : i32
    return %c0_i32, %c0_i32_0 : i32, i32
  }
  func.func @transform_35(%arg0: i32) -> (i32, i32, i32) {
    %c0_i32 = arith.constant 0 : i32
    %c0_i32_0 = arith.constant 0 : i32
    %c0_i32_1 = arith.constant 0 : i32
    return %arg0, %c0_i32, %c0_i32_0 : i32, i32, i32
  }
}

</mosaic_0001>

<bundles_post_ra>
// kernel: mlla_block.1
= control target key start
LH: loop header
LB: loop body
LE: loop exit
PB: predicated region body
PF: predicated region fallthrough
CT: control target
= control target key end

     0   :  { %s5060_s6 = smov 1   ;;  %s5061_s10 = smov 2   ;;  %s7720_s0 = inlined_call_operand.smem [shape: u32[36], index: -1, kind: input, shape index: {}] }
   0x1   :  { %s5107_s5 = sld [smem:[%s7720_s0]]   ;;  %s5062_s14 = smov 3  }
   0x2   :  { %s5112_s9 = sld [smem:[%s7720_s0 + %s5060_s6]]   ;;  %s5063_s18 = smov 4  }
   0x3   :  { %s5117_s13 = sld [smem:[%s7720_s0 + %s5061_s10]]   ;;  %s5064_s22 = smov 5  }
   0x4   :  { %s5122_s17 = sld [smem:[%s7720_s0 + %s5062_s14]]   ;;  %s5065_s26 = smov 6  }
   0x5   :  { %s5127_s21 = sld [smem:[%s7720_s0 + %s5063_s18]]   ;;  %s5066_s30 = smov 7  }
   0x6   :  { %s5132_s25 = sld [smem:[%s7720_s0 + %s5064_s22]]   ;;  %s5067_s4 = smov 8  }
   0x7   :  { %s5137_s29 = sld [smem:[%s7720_s0 + %s5065_s26]]   ;;  %s5068_s10 = smov 9  }
   0x8   :  { %s5142_s3 = sld [smem:[%s7720_s0 + %s5066_s30]]   ;;  %s5069_s15 = smov 10  }
   0x9   :  { %s5147_s8 = sld [smem:[%s7720_s0 + %s5067_s4]]   ;;  %s5070_s20 = smov 11  }
   0xa   :  { %s5152_s14 = sld [smem:[%s7720_s0 + %s5068_s10]]   ;;  %s5071_s26 = smov 12  }
   0xb   :  { %s5157_s19 = sld [smem:[%s7720_s0 + %s5069_s15]]   ;;  %s5072_s1 = smov 13  }
   0xc   :  { %s5162_s24 = sld [smem:[%s7720_s0 + %s5070_s20]]   ;;  %s5073_s7 = smov 14  }
   0xd   :  { %s5167_s30 = sld [smem:[%s7720_s0 + %s5071_s26]]   ;;  %s5074_s15 = smov 15  }
   0xe   :  { %s5172_s6 = sld [smem:[%s7720_s0 + %s5072_s1]]   ;;  %s5075_s22 = smov 16  }
   0xf   :  { %s5177_s12 = sld [smem:[%s7720_s0 + %s5073_s7]]   ;;  %s5076_s28 = smov 17  }
  0x10   :  { %s5182_s20 = sld [smem:[%s7720_s0 + %s5074_s15]]   ;;  %s5077_s7 = smov 18  }
  0x11   :  { %s5187_s27 = sld [smem:[%s7720_s0 + %s5075_s22]]   ;;  %s5078_s15 = smov 19  }
  0x12   :  { %s5192_s4 = sld [smem:[%s7720_s0 + %s5076_s28]]   ;;  %s5079_s22 = smov 20  }
  0x13   :  { %s5080_s28 = smov 21  }
  0x15   :  { %7765 = sst [smem:[#allocation5_spill]] %s5177_s12 }
  0x16   :  { %7766 = sst [smem:[#allocation6_spill]] %s5182_s20 }
  0x17   :  { %7767 = sst [smem:[#allocation7_spill]] %s5187_s27 }
  0x18   :  { %7768 = sst [smem:[#allocation8_spill]] %s5192_s4 }
  0x19   :  { %s5197_s12 = sld [smem:[%s7720_s0 + %s5077_s7]]   ;;  %s5081_s7 = smov 22  }
  0x1a   :  { %s5202_s20 = sld [smem:[%s7720_s0 + %s5078_s15]]   ;;  %s5082_s15 = smov 23  }
  0x1b   :  { %s5207_s27 = sld [smem:[%s7720_s0 + %s5079_s22]]   ;;  %s5083_s22 = smov 24  }
  0x1c   :  { %s5212_s4 = sld [smem:[%s7720_s0 + %s5080_s28]]   ;;  %s5084_s28 = smov 25  }
  0x1f   :  { %7769 = sst [smem:[#allocation9_spill]] %s5197_s12 }
  0x20   :  { %7770 = sst [smem:[#allocation10_spill]] %s5202_s20 }
  0x21   :  { %7771 = sst [smem:[#allocation11_spill]] %s5207_s27 }
  0x22   :  { %7772 = sst [smem:[#allocation12_spill]] %s5212_s4 }
  0x23   :  { %s5217_s12 = sld [smem:[%s7720_s0 + %s5081_s7]]   ;;  %s5085_s7 = smov 26  }
  0x24   :  { %s5222_s20 = sld [smem:[%s7720_s0 + %s5082_s15]]   ;;  %s5086_s15 = smov 27  }
  0x25   :  { %s5227_s27 = sld [smem:[%s7720_s0 + %s5083_s22]]   ;;  %s5087_s22 = smov 28  }
  0x26   :  { %s5232_s4 = sld [smem:[%s7720_s0 + %s5084_s28]]   ;;  %s5088_s28 = smov 29  }
  0x29   :  { %7773 = sst [smem:[#allocation13_spill]] %s5217_s12 }
  0x2a   :  { %7774 = sst [smem:[#allocation14_spill]] %s5222_s20 }
  0x2b   :  { %7775 = sst [smem:[#allocation15_spill]] %s5227_s27 }
  0x2c   :  { %7776 = sst [smem:[#allocation16_spill]] %s5232_s4 }
  0x2d   :  { %s5237_s12 = sld [smem:[%s7720_s0 + %s5085_s7]]   ;;  %s5089_s7 = smov 30  }
  0x2e   :  { %s5242_s20 = sld [smem:[%s7720_s0 + %s5086_s15]]   ;;  %s5090_s15 = smov 31  }
  0x2f   :  { %s5247_s27 = sld [smem:[%s7720_s0 + %s5087_s22]]   ;;  %s5091_s22 = smov 32  }
  0x30   :  { %s5252_s4 = sld [smem:[%s7720_s0 + %s5088_s28]]   ;;  %s5092_s28 = smov 33  }
  0x33   :  { %7777 = sst [smem:[#allocation17_spill]] %s5237_s12 }
  0x34   :  { %7778 = sst [smem:[#allocation18_spill]] %s5242_s20 }
  0x35   :  { %7779 = sst [smem:[#allocation19_spill]] %s5247_s27 }
  0x36   :  { %7780 = sst [smem:[#allocation20_spill]] %s5252_s4 }
  0x37   :  { %s5257_s12 = sld [smem:[%s7720_s0 + %s5089_s7]]   ;;  %s5093_s7 = smov 34  }
  0x38   :  { %s5262_s20 = sld [smem:[%s7720_s0 + %s5090_s15]]   ;;  %s5094_s15 = smov 35  }
  0x39   :  { %s5267_s27 = sld [smem:[%s7720_s0 + %s5091_s22]]   ;;  %s5284_s22 = smov 0  }
  0x3a   :  { %s5272_s4 = sld [smem:[%s7720_s0 + %s5092_s28]]  }
  0x3d   :  { %7781 = sst [smem:[#allocation21_spill]] %s5257_s12 }
  0x3e   :  { %7782 = sst [smem:[#allocation22_spill]] %s5262_s20 }
  0x3f   :  { %s5277_s12 = sld [smem:[%s7720_s0 + %s5093_s7]]  }
  0x40   :  { %s5282_s20 = sld [smem:[%s7720_s0 + %s5094_s15]]  }
  0x41 LB: > { %s4649_s23 = sadd.s32 4294967295, %s5058_s22   ;;  %p4653_p0 = scmp.ge.s32.totalorder %s5058_s22, 1  ;;  %s5058_s22 = sphi %s5284_s22, %s81_s22  }
  0x42   : > { %p973_p1 = scmp.lt.s32.totalorder %s5058_s22, 3 }
  0x44   : > { %p974_p2 = pnand %p4653_p0, %p973_p1 }
  0x46   : > { %977 = sbr.rel (%p974_p2) target bundleno = 2353 (0x931), region = 160 }
  0x4b   : > { %p1061_p3 = scmp.lt.s32.totalorder %s4649_s23, 1  ;;  %p4658_p4 = scmp.ne.s32.totalorder %s4649_s23, 0 }
  0x4d   : > { %s1062_s0 = scalar_select %p1061_p3, %s4649_s23, 1 }
  0x4e   : > { %1074 = sbr.rel (%p4658_p4) target bundleno = 112 (0x70), region = 164 }
  0x4f   : > { %s4759_s26 = sshll.u32 %s1062_s0, 6 }
  0x50   : > { %s5293_s28 = scalar_lea.vmem %s5107_s5, %s4759_s26  ;;  %s5296_s1 = scalar_lea.vmem %s5282_s20, %s4759_s26 }
  0x53   : > { %vm1075_vm0 = vcmask 130048   ;;  %v5095_v0 = vmov 0.0  }
  0x54   : > { %1076 = vst.msk [vmem:[#allocation2] sm:$0xff] %vm1075_vm0, %v5095_v0 }
  0x55   : > { %1077 = vst.msk [vmem:[#allocation2 + $0x8] sm:$0xff] %vm1075_vm0, %v5095_v0 }
  0x56   : > { %1078 = vst.msk [vmem:[#allocation2 + $0x10] sm:$0xff] %vm1075_vm0, %v5095_v0 }
  0x57   : > { %1079 = vst.msk [vmem:[#allocation2 + $0x18] sm:$0xff] %vm1075_vm0, %v5095_v0 }
  0x58   : > { %1080 = vst.msk [vmem:[#allocation2 + $0x20] sm:$0xff] %vm1075_vm0, %v5095_v0 }
  0x59   : > { %1081 = vst.msk [vmem:[#allocation2 + $0x28] sm:$0xff] %vm1075_vm0, %v5095_v0 }
  0x5a   : > { %1082 = vst.msk [vmem:[#allocation2 + $0x30] sm:$0xff] %vm1075_vm0, %v5095_v0 }
  0x5b   : > { %1083 = vst.msk [vmem:[#allocation2 + $0x38] sm:$0xff] %vm1075_vm0, %v5095_v0 }
  0x5c   : > { %1084 = vst.msk [vmem:[#allocation2 + $0x40] sm:$0xff] %vm1075_vm0, %v5095_v0 }
  0x5d   : > { %1085 = vst.msk [vmem:[#allocation2 + $0x48] sm:$0xff] %vm1075_vm0, %v5095_v0 }
  0x5e   : > { %1086 = vst.msk [vmem:[#allocation2 + $0x50] sm:$0xff] %vm1075_vm0, %v5095_v0 }
  0x5f   : > { %1087 = vst.msk [vmem:[#allocation2 + $0x58] sm:$0xff] %vm1075_vm0, %v5095_v0 }
  0x60   : > { %1088 = vst.msk [vmem:[#allocation3] sm:$0xff] %vm1075_vm0, %v5095_v0 }
  0x61   : > { %1089 = vst.msk [vmem:[#allocation3 + $0x8] sm:$0xff] %vm1075_vm0, %v5095_v0 }
  0x62   : > { %1090 = vst.msk [vmem:[#allocation3 + $0x10] sm:$0xff] %vm1075_vm0, %v5095_v0 }
  0x63   : > { %1091 = vst.msk [vmem:[#allocation3 + $0x18] sm:$0xff] %vm1075_vm0, %v5095_v0 }
  0x64   : > { %1092 = vst.msk [vmem:[#allocation3 + $0x20] sm:$0xff] %vm1075_vm0, %v5095_v0 }
  0x65   : > { %1093 = vst.msk [vmem:[#allocation3 + $0x28] sm:$0xff] %vm1075_vm0, %v5095_v0 }
  0x66   : > { %1094 = vst.msk [vmem:[#allocation3 + $0x30] sm:$0xff] %vm1075_vm0, %v5095_v0 }
  0x67   : > { %1095 = vst.msk [vmem:[#allocation3 + $0x38] sm:$0xff] %vm1075_vm0, %v5095_v0 }
  0x68   : > { %1096 = vst.msk [vmem:[#allocation4] sm:$0xff] %vm1075_vm0, %v5095_v0 }
  0x69   : > { %1097 = vst.msk [vmem:[#allocation4 + $0x8] sm:$0xff] %vm1075_vm0, %v5095_v0 }
  0x6a   : > { %1098 = vst.msk [vmem:[#allocation4 + $0x10] sm:$0xff] %vm1075_vm0, %v5095_v0 }
  0x6b   : > { %1099 = vst.msk [vmem:[#allocation4 + $0x18] sm:$0xff] %vm1075_vm0, %v5095_v0 }
  0x6c   : > { %1100 = vst.msk [vmem:[#allocation4 + $0x20] sm:$0xff] %vm1075_vm0, %v5095_v0 }
  0x6d   : > { %1101 = vst.msk [vmem:[#allocation4 + $0x28] sm:$0xff] %vm1075_vm0, %v5095_v0 }
  0x6e   : > { %1102 = vst.msk [vmem:[#allocation4 + $0x30] sm:$0xff] %vm1075_vm0, %v5095_v0 }
  0x6f   : > { %1103 = vst.msk [vmem:[#allocation4 + $0x38] sm:$0xff] %vm1075_vm0, %v5095_v0 }
  0x70 PF: > { %v1104_v1 = vld [vmem:[%s5112_s9] sm:$0xff]  ;;  %vm1128_vm1 = vcmask 130048   ;;  %v5331_v3 = vld [vmem:[%s5293_s28 + $0x8] sm:$0xff]  ;;  %v5334_v4 = vld [vmem:[%s5293_s28 + $0x10] sm:$0xff]  ;;  %s7798_s2 = sld [smem:[#allocation6_spill]] }
  0x71   : > { %v5328_v2 = vld [vmem:[%s5293_s28] sm:$0xff]  ;;  %1130 = vst.msk [vmem:[#allocation2 + $0x18] sm:$0xff] %vm1128_vm1, %v5331_v3  ;;  %v1172_v8 = vld [vmem:[#allocation2 + $0x8] sm:$0xff]  ;;  %v5375_v33 = vld [vmem:[%s5293_s28 + $0x18] sm:$0xff]  ;;  %s7799_s7 = sld [smem:[#allocation12_spill]] }
  0x72   : > { %1129 = vst.msk [vmem:[#allocation2 + $0x10] sm:$0xff] %vm1128_vm1, %v5328_v2  ;;  %v1138_v5 = vld [vmem:[#allocation2 + $0x7] sm:$0xff]  ;;  %v5341_v6 = vld [vmem:[%s5122_s17] ss:$0 sm:$0xff]  ;;  %v5346_v9 = vld [vmem:[%s5122_s17 + $0x1] ss:$0 sm:$0xff] }
  0x73   : > { %1131 = vst.msk [vmem:[#allocation2 + $0x20] sm:$0xff] %vm1128_vm1, %v5334_v4  ;;  %v1146_v7 = vmul.f32 %v1138_v5, %v1104_v1  ;;  %v1181_v11 = vmul.f32 %v5346_v9, %v1172_v8  ;;  %v1112_v12 = vld [vmem:[%s5117_s13] sm:$0xff]  ;;  %v5383_v39 = vld [vmem:[%s5293_s28 + $0x28] sm:$0xff]  ;;  %v5386_v40 = vld [vmem:[%s5293_s28 + $0x30] sm:$0xff]  ;;  %s7800_s10 = sld [smem:[#allocation7_spill]] }
  0x74   : > { %v5352_v13 = vld [vmem:[%s5122_s17 + $0x2] ss:$0 sm:$0xff]  ;;  %v5355_v14 = vld [vmem:[%s5122_s17 + $0x3] ss:$0 sm:$0xff]  ;;  %v5358_v21 = vld [vmem:[%s5122_s17 + $0x4] ss:$0 sm:$0xff] }
  0x75   : > { %v1155_v10 = vmul.f32 %v5341_v6, %v1146_v7  ;;  %v5361_v22 = vld [vmem:[%s5122_s17 + $0x7] ss:$0 sm:$0xff]  ;;  %v5366_v29 = vld [vmem:[%s5122_s17 + $0x5] ss:$0 sm:$0xff]  ;;  %v5369_v30 = vld [vmem:[%s5122_s17 + $0x6] ss:$0 sm:$0xff] }
  0x76   : > { %7783 = vst [vmem:[#allocation23_spill] sm:$0xff] %v5375_v33  ;;  %v5378_v34 = vld [vmem:[%s5293_s28 + $0x20] sm:$0xff]  ;;  %v5391_v41 = vld [vmem:[%s5112_s9 + $0x10] sm:$0xff]  ;;  %v5395_v44 = vld [vmem:[%s5122_s17 + $0x8] ss:$0 sm:$0xff]  ;;  %s7801_s11 = sld [smem:[#allocation8_spill]] }
  0x77   : > { %v1189_v17 = vadd.f32 %v1181_v11, %v1155_v10  ;;  %7784 = vst [vmem:[#allocation24_spill] sm:$0xff] %v5386_v40  ;;  %v5400_v45 = vld [vmem:[%s5117_s13 + $0x10] sm:$0xff]  ;;  %v1105_v53 = vld [vmem:[%s5112_s9 + $0x8] sm:$0xff]  ;;  %v1108_v55 = vld [vmem:[%s5112_s9 + $0x20] sm:$0xff]  ;;  %s7802_s15 = sld [smem:[#allocation9_spill]] }
  0x78   : > { %v1174_v24 = vld [vmem:[#allocation2 + $0x18] sm:$0xff]  ;;  %1132 = vst.msk [vmem:[#allocation2 + $0x28] sm:$0xff] %vm1128_vm1, %v5375_v33  ;;  %v5413_v54 = vld [vmem:[%s5117_s13 + $0x8] sm:$0xff]  ;;  %v1116_v0 = vld [vmem:[%s5117_s13 + $0x20] sm:$0xff]  ;;  %s7803_s16 = sld [smem:[#allocation5_spill]] }
  0x79   : > { %v1139_v15 = vld [vmem:[#allocation2 + $0xf] sm:$0xff]  ;;  %v1140_v25 = vld [vmem:[#allocation2 + $0x17] sm:$0xff]  ;;  %v1183_v35 = vmul.f32 %v5346_v9, %v1174_v24  ;;  %v1334_v42 = vmul.f32 %v5361_v22, %v1174_v24  ;;  %1133 = vst.msk [vmem:[#allocation2 + $0x30] sm:$0xff] %vm1128_vm1, %v5378_v34  ;;  %v5404_v48 = vmul.f32 %v5358_v21, %v1174_v24  ;;  %s7804_s18 = sld [smem:[#allocation10_spill]] }
  0x7a   : > { %v1198_v16 = vld [vmem:[#allocation2 + $0x9] sm:$0xff]  ;;  %v1199_v18 = vld [vmem:[#allocation2 + $0x11] sm:$0xff]  ;;  %v1233_v20 = vmul.f32 %v1139_v15, %v1104_v1  ;;  %v1200_v32 = vld [vmem:[#allocation2 + $0x19] sm:$0xff]  ;;  %v1306_v38 = vmul.f32 %v1140_v25, %v1104_v1  ;;  %v1148_v47 = vmul.f32 %v1140_v25, %v5391_v41  ;;  %1134 = vst.msk [vmem:[#allocation2 + $0x38] sm:$0xff] %vm1128_vm1, %v5383_v39  ;;  %v1147_v58 = vmul.f32 %v1139_v15, %v1105_v53  ;;  %s7805_s23 = sld [smem:[#allocation11_spill]] }
  0x7b   : > { %v1206_v19 = vmul.f32 %v1198_v16, %v1112_v12  ;;  %v1173_v23 = vld [vmem:[#allocation2 + $0x10] sm:$0xff]  ;;  %v1279_v28 = vmul.f32 %v1199_v18, %v1112_v12  ;;  %v1352_v43 = vmul.f32 %v1200_v32, %v1112_v12  ;;  %v1141_v46 = vld [vmem:[#allocation2 + $0x1f] sm:$0xff]  ;;  %v1208_v51 = vmul.f32 %v1200_v32, %v5400_v45  ;;  %1135 = vst.msk [vmem:[#allocation2 + $0x40] sm:$0xff] %vm1128_vm1, %v5386_v40  ;;  %s7806_s0 = sld [smem:[#allocation13_spill]] }
  0x7c   : > { %v1242_v27 = vmul.f32 %v5355_v14, %v1233_v20  ;;  %v5372_v31 = vmul.f32 %v5346_v9, %v1173_v23  ;;  %v1261_v37 = vmul.f32 %v5358_v21, %v1173_v23  ;;  %v1235_v52 = vmul.f32 %v1141_v46, %v5391_v41  ;;  %v1175_v57 = vld [vmem:[#allocation2 + $0x20] sm:$0xff]  ;;  %v5421_v61 = vld [vmem:[%s5293_s28 + $0x38] sm:$0xff]  ;;  %v5434_v10 = vld [vmem:[%s5112_s9 + $0x30] sm:$0xff]  ;;  %s7813_s26 = sld [smem:[#allocation14_spill]] }
  0x7d   : > { %v1215_v26 = vmul.f32 %v5352_v13, %v1206_v19  ;;  %v1288_v50 = vmul.f32 %v5366_v29, %v1279_v28  ;;  %v1157_v56 = vmul.f32 %v5341_v6, %v1148_v47  ;;  %v1207_v59 = vmul.f32 %v1199_v18, %v5413_v54  ;;  %7785 = vst [vmem:[#allocation25_spill] sm:$0xff] %v5421_v61  ;;  %v5430_v7 = vld [vmem:[%s5112_s9 + $0x18] sm:$0xff]  ;;  %s7835_s28 = sld [smem:[#allocation16_spill]] }
  0x7e   : > { %v1234_v60 = vmul.f32 %v1140_v25, %v1105_v53  ;;  %v1315_v63 = vmul.f32 %v5369_v30, %v1306_v38  ;;  %v1217_v1 = vmul.f32 %v5352_v13, %v1208_v51  ;;  %v1280_v5 = vmul.f32 %v1200_v32, %v5413_v54  ;;  %1136 = vst.msk [vmem:[#allocation2 + $0x48] sm:$0xff] %vm1128_vm1, %v5421_v61  ;;  %v1109_v61 = vld [vmem:[%s5112_s9 + $0x28] sm:$0xff] }
  0x7f   : > { %v1223_v36 = vadd.f32 %v1215_v26, %v1189_v17  ;;  %v1361_v8 = vmul.f32 %v5395_v44, %v1352_v43  ;;  %v1191_v11 = vadd.f32 %v1183_v35, %v1157_v56  ;;  %v1244_v12 = vmul.f32 %v5355_v14, %v1235_v52  ;;  %v5441_v20 = vld [vmem:[#allocation2 + $0x27] sm:$0xff] }
  0x80   : > { %v1156_v15 = vmul.f32 %v5341_v6, %v1147_v58  ;;  %v1263_v17 = vmul.f32 %v5358_v21, %v1175_v57  ;;  %v1216_v18 = vmul.f32 %v5352_v13, %v1207_v59  ;;  %v1243_v19 = vmul.f32 %v5355_v14, %v1234_v60  ;;  %v5443_v23 = vld [vmem:[#allocation2 + $0x28] sm:$0xff]  ;;  %v5471_v59 = vld [vmem:[%s5127_s21] ss:$0 sm:$0xff] }
  0x81   : > { %v1250_v49 = vadd.f32 %v1242_v27, %v1223_v36  ;;  %v5445_v24 = vld [vmem:[#allocation2 + $0x21] sm:$0xff]  ;;  %v1225_v25 = vadd.f32 %v1217_v1, %v1191_v11  ;;  %v5448_v26 = vmul.f32 %v5366_v29, %v1280_v5  ;;  %v1307_v27 = vmul.f32 %v1141_v46, %v1105_v53  ;;  %v5453_v35 = vld [vmem:[#allocation2 + $0x2f] sm:$0xff]  ;;  %v1144_v47 = vld [vmem:[#allocation2 + $0x37] sm:$0xff] }
  0x82   : > { %v5451_v28 = vmul.f32 %v5361_v22, %v1175_v57  ;;  %v1150_v36 = vmul.f32 %v5441_v20, %v1108_v55  ;;  %v5458_v38 = vld [vmem:[#allocation2 + $0x29] sm:$0xff]  ;;  %v1190_v43 = vadd.f32 %v5372_v31, %v1156_v15  ;;  %v1237_v52 = vmul.f32 %v5453_v35, %v1108_v55  ;;  %v1178_v1 = vld [vmem:[#allocation2 + $0x38] sm:$0xff] }
  0x83   : > { %v1269_v62 = vadd.f32 %v1261_v37, %v1250_v49  ;;  %v1185_v37 = vmul.f32 %v5346_v9, %v5443_v23  ;;  %v5461_v49 = vld [vmem:[#allocation2 + $0x30] sm:$0xff]  ;;  %v1210_v51 = vmul.f32 %v5458_v38, %v1116_v0  ;;  %v1252_v53 = vadd.f32 %v1244_v12, %v1225_v25 }
  0x84   : > { %v5468_v56 = vmul.f32 %v1141_v46, %v5430_v7  ;;  %v1152_v60 = vmul.f32 %v1144_v47, %v5434_v10  ;;  %v1159_v31 = vmul.f32 %v5341_v6, %v1150_v36  ;;  %v1310_v46 = vmul.f32 %v1144_v47, %v1108_v55 }
  0x85   : > { %v1296_v16 = vadd.f32 %v1288_v50, %v1269_v62  ;;  %v5463_v50 = vld [vmem:[#allocation2 + $0x31] sm:$0xff]  ;;  %v5475_v62 = vld [vmem:[#allocation2 + $0x39] sm:$0xff]  ;;  %v1219_v5 = vmul.f32 %v5352_v13, %v1210_v51  ;;  %v1265_v25 = vmul.f32 %v5358_v21, %v5461_v49  ;;  %v5491_v36 = vmul.f32 %v5346_v9, %v1178_v1 }
  0x86   : > { %v1283_v11 = vmul.f32 %v5463_v50, %v1116_v0  ;;  %v1193_v15 = vadd.f32 %v1185_v37, %v1159_v31  ;;  %v1356_v51 = vmul.f32 %v5475_v62, %v1116_v0  ;;  %v1271_v55 = vadd.f32 %v1263_v17, %v1252_v53  ;;  %v1117_v0 = vld [vmem:[%s5117_s13 + $0x28] sm:$0xff] }
  0x87   : > { %v1323_v32 = vadd.f32 %v1315_v63, %v1296_v16  ;;  %v1281_v63 = vmul.f32 %v5445_v24, %v5400_v45  ;;  %v1246_v16 = vmul.f32 %v5355_v14, %v1237_v52  ;;  %v1338_v37 = vmul.f32 %v5361_v22, %v1178_v1 }
  0x88   : > { %v1319_v31 = vmul.f32 %v5369_v30, %v1310_v46  ;;  %v1354_v40 = vmul.f32 %v5458_v38, %v5400_v45 }
  0x89   : > { %v1342_v58 = vadd.f32 %v1334_v42, %v1323_v32  ;;  %v5482_v42 = vmul.f32 %v5346_v9, %v1175_v57  ;;  %v5488_v32 = vmul.f32 %v5341_v6, %v1152_v60  ;;  %v1290_v52 = vmul.f32 %v5366_v29, %v1281_v63 }
  0x8a   : > { %v1308_v60 = vmul.f32 %v5441_v20, %v5391_v41  ;;  %v1353_v41 = vmul.f32 %v5445_v24, %v5413_v54 }
  0x8b   : > { %v1369_v12 = vadd.f32 %v1361_v8, %v1342_v58  ;;  %v1227_v8 = vadd.f32 %v1219_v5, %v1193_v15  ;;  %v1292_v58 = vmul.f32 %v5366_v29, %v1283_v11  ;;  %v1298_v5 = vadd.f32 %v1290_v52, %v1271_v55 }
  0x8c   : > { %v1365_v15 = vmul.f32 %v5395_v44, %v1356_v51  ;;  %v1317_v63 = vmul.f32 %v5369_v30, %v1308_v60  ;;  %v1336_v11 = vmul.f32 %v5361_v22, %v5443_v23  ;;  %v1316_v51 = vmul.f32 %v5369_v30, %v1307_v27 }
  0x8d   : > { %v1381_v57 = vadd.f32 %v5471_v59, %v1369_v12  ;;  %v1254_v53 = vadd.f32 %v1246_v16, %v1227_v8  ;;  %v1224_v12 = vadd.f32 %v1216_v18, %v1190_v43  ;;  %v1151_v18 = vmul.f32 %v5453_v35, %v1109_v61 }
  0x8e   : > { %v1325_v43 = vadd.f32 %v1317_v63, %v1298_v5  ;;  %v1363_v16 = vmul.f32 %v5395_v44, %v1354_v40  ;;  %v1186_v55 = vmul.f32 %v5346_v9, %v5461_v49  ;;  %v1211_v8 = vmul.f32 %v5463_v50, %v1117_v0  ;;  %v1115_v5 = vld [vmem:[%s5117_s13 + $0x18] sm:$0xff] }
  0x8f   : > { %v5506_v17 = vadd.f32 %v1381_v57, %v5328_v2  ;;  %v1273_v46 = vadd.f32 %v1265_v25, %v1254_v53  ;;  %v1251_v33 = vadd.f32 %v1243_v19, %v1224_v12  ;;  %v5516_v2 = vld [vmem:[#allocation2 + $0x3f] sm:$0xff]  ;;  %v1160_v25 = vmul.f32 %v5341_v6, %v1151_v18 }
  0x90   : > { %v5525_v19 = vld [vmem:[#allocation2 + $0x40] sm:$0xff]  ;;  %v1344_v52 = vadd.f32 %v1336_v11, %v1325_v43  ;;  %v1362_v60 = vmul.f32 %v5395_v44, %v1353_v41  ;;  %v1238_v53 = vmul.f32 %v1144_v47, %v1109_v61  ;;  %v1284_v40 = vmul.f32 %v5475_v62, %v1117_v0 }
  0x91   : > { %7786 = vst [vmem:[#allocation26_spill] sm:$0xff] %v5506_v17  ;;  %v1399_v45 = vsel %vm1128_vm1, %v5506_v17, 0.0  ;;  %v1300_v54 = vadd.f32 %v1292_v58, %v1273_v46  ;;  %v1270_v57 = vadd.f32 %v5404_v48, %v1251_v33  ;;  %v1194_v63 = vadd.f32 %v1186_v55, %v1160_v25  ;;  %v5536_v41 = vld [vmem:[#allocation2 + $0x41] sm:$0xff] }
  0x92   : > { %1400 = vadd.xlane.f32.xlu0 %v1399_v45  ;;  %v1220_v58 = vmul.f32 %v5352_v13, %v1211_v8  ;;  %v1371_v33 = vadd.f32 %v1363_v16, %v1344_v52  ;;  %v1247_v48 = vmul.f32 %v5355_v14, %v1238_v53  ;;  %v1266_v45 = vmul.f32 %v5358_v21, %v1178_v1 }
  0x93   : > { %v1327_v27 = vadd.f32 %v1319_v31, %v1300_v54  ;;  %v1297_v12 = vadd.f32 %v5448_v26, %v1270_v57  ;;  %v1311_v46 = vmul.f32 %v5516_v2, %v1109_v61  ;;  %v1293_v43 = vmul.f32 %v5366_v29, %v1284_v40 }
  0x94   : > { %v1228_v47 = vadd.f32 %v1220_v58, %v1194_v63  ;;  %v1383_v31 = vadd.f32 %v5471_v59, %v1371_v33  ;;  %v1339_v16 = vmul.f32 %v5361_v22, %v5525_v19  ;;  %v1158_v55 = vmul.f32 %v5341_v6, %v5468_v56 }
  0x95   : > { %v1346_v11 = vadd.f32 %v1338_v37, %v1327_v27  ;;  %v1324_v18 = vadd.f32 %v1316_v51, %v1297_v12  ;;  %v1320_v26 = vmul.f32 %v5369_v30, %v1311_v46  ;;  %v1209_v51 = vmul.f32 %v5445_v24, %v1115_v5  ;;  %v1118_v27 = vld [vmem:[%s5117_s13 + $0x30] sm:$0xff] }
  0x96   : > { %v1255_v37 = vadd.f32 %v1247_v48, %v1228_v47  ;;  %v5548_v54 = vadd.f32 %v1383_v31, %v5334_v4  ;;  %v1357_v57 = vmul.f32 %v5536_v41, %v1117_v0  ;;  %v1192_v25 = vadd.f32 %v5482_v42, %v1158_v55  ;;  %v1232_v47 = vld [vmem:[#allocation2 + $0x47] sm:$0xff] }
  0x97   : > { %v1373_v1 = vadd.f32 %v1365_v15, %v1346_v11  ;;  %v1343_v61 = vadd.f32 %v5451_v28, %v1324_v18  ;;  %v1236_v8 = vmul.f32 %v5441_v20, %v5430_v7  ;;  %v1218_v28 = vmul.f32 %v5352_v13, %v1209_v51 }
  0x98   : > { %7787 = vst [vmem:[#allocation27_spill] sm:$0xff] %v5548_v54  ;;  %v1274_v15 = vadd.f32 %v1266_v45, %v1255_v37  ;;  %v1405_v24 = vsel %vm1128_vm1, %v5548_v54, 0.0  ;;  %v1264_v0 = vmul.f32 %v5358_v21, %v5443_v23  ;;  %v1282_v53 = vmul.f32 %v5458_v38, %v1115_v5  ;;  %v1278_v37 = vld [vmem:[#allocation2 + $0x49] sm:$0xff] }
  0x99   : > { %v1385_v52 = vadd.f32 %v5471_v59, %v1373_v1  ;;  %v1370_v56 = vadd.f32 %v1362_v60, %v1343_v61  ;;  %v1245_v4 = vmul.f32 %v5355_v14, %v1236_v8  ;;  %1406 = vadd.xlane.f32.xlu1 %v1405_v24  ;;  %v1226_v40 = vadd.f32 %v1218_v28, %v1192_v25 }
  0x9a   : > { %v1301_v60 = vadd.f32 %v1293_v43, %v1274_v15  ;;  %v1366_v12 = vmul.f32 %v5395_v44, %v1357_v57  ;;  %v1291_v63 = vmul.f32 %v5366_v29, %v1282_v53  ;;  %v1309_v58 = vmul.f32 %v5453_v35, %v5430_v7 }
  0x9b   : > { %v5563_v42 = vadd.f32 %v1385_v52, %v5378_v34  ;;  %v1382_v20 = vadd.f32 %v5471_v59, %v1370_v56  ;;  %v1253_v33 = vadd.f32 %v1245_v4, %v1226_v40  ;;  %v1195_v48 = vadd.f32 %v5491_v36, %v5488_v32 }
  0x9c   : > { %v1328_v34 = vadd.f32 %v1320_v26, %v1301_v60  ;;  %v1355_v45 = vmul.f32 %v5463_v50, %v1115_v5  ;;  %v1212_v46 = vmul.f32 %v5475_v62, %v1118_v27  ;;  %v1239_v11 = vmul.f32 %v5516_v2, %v5434_v10 }
  0x9d   : > { %7788 = vst [vmem:[#allocation28_spill] sm:$0xff] %v5563_v42  ;;  %v1411_v23 = vsel %vm1128_vm1, %v5563_v42, 0.0  ;;  %v5574_v38 = vadd.f32 %v1382_v20, %v5331_v3  ;;  %v1272_v18 = vadd.f32 %v1264_v0, %v1253_v33  ;;  %v1318_v3 = vmul.f32 %v5369_v30, %v1309_v58  ;;  %v7791_v20 = vld [vmem:[#allocation23_spill] sm:$0xff]  ;;  %v7793_v58 = vld [vmem:[#allocation24_spill] sm:$0xff]  ;;  %v1111_v33 = vld [vmem:[%s5112_s9 + $0x38] sm:$0xff] }
  0x9e   : > { %1412 = vadd.xlane.f32.xlu2 %v1411_v23  ;;  %v1347_v35 = vadd.f32 %v1339_v16, %v1328_v34  ;;  %v1221_v43 = vmul.f32 %v5352_v13, %v1212_v46  ;;  %v1248_v32 = vmul.f32 %v5355_v14, %v1239_v11  ;;  %v1285_v50 = vmul.f32 %v5536_v41, %v1118_v27  ;;  %v1119_v11 = vld [vmem:[%s5117_s13 + $0x38] sm:$0xff] }
  0x9f   : > { %7789 = vst [vmem:[#allocation29_spill] sm:$0xff] %v5574_v38  ;;  %v1402_v7 = vsel %vm1128_vm1, %v5574_v38, 0.0  ;;  %v1299_v62 = vadd.f32 %v1291_v63, %v1272_v18  ;;  %v1337_v5 = vmul.f32 %v5361_v22, %v5461_v49  ;;  %v1267_v26 = vmul.f32 %v5358_v21, %v5525_v19  ;;  %v1259_v49 = vld [vmem:[#allocation2 + $0x48] sm:$0xff] }
  0xa0   : > { %1403 = vadd.xlane.f32.xlu0 %v1402_v7  ;;  %v1374_v36 = vadd.f32 %v1366_v12, %v1347_v35  ;;  %v1229_v31 = vadd.f32 %v1221_v43, %v1195_v48  ;;  %v1312_v16 = vmul.f32 %v1232_v47, %v5434_v10  ;;  %v1364_v61 = vmul.f32 %v5395_v44, %v1355_v45 }
  0xa1   : > { %v1326_v1 = vadd.f32 %v1318_v3, %v1299_v62  ;;  %v1294_v57 = vmul.f32 %v5366_v29, %v1285_v50  ;;  %v1358_v15 = vmul.f32 %v1278_v37, %v1118_v27  ;;  %v1340_v4 = vmul.f32 %v5361_v22, %v1259_v49 }
  0xa2   : > { %v1386_v55 = vadd.f32 %v5471_v59, %v1374_v36  ;;  %v1256_v51 = vadd.f32 %v1248_v32, %v1229_v31  ;;  %v1321_v56 = vmul.f32 %v5369_v30, %v1312_v16  ;;  %v1188_v48 = vmul.f32 %v5346_v9, %v5525_v19  ;;  %v1305_v31 = vld [vmem:[#allocation2 + $0x4f] sm:$0xff] }
  0xa3   : > { %v1345_v8 = vadd.f32 %v1337_v5, %v1326_v1  ;;  %v5096_v45 = vmov 16.0   ;;  %v1153_v46 = vmul.f32 %v5516_v2, %v1111_v33  ;;  %v1213_v35 = vmul.f32 %v5536_v41, %v1119_v11  ;;  %v1351_v1 = vld [vmem:[#allocation2 + $0x51] sm:$0xff] }
  0xa4   : > { %v5597_v25 = vadd.f32 %v1386_v55, %v5383_v39  ;;  %v1275_v52 = vadd.f32 %v1267_v26, %v1256_v51  ;;  %v1367_v39 = vmul.f32 %v5395_v44, %v1358_v15  ;;  %4861 = vrcp.f32 %v5096_v45 }
  0xa5   : > { %v1372_v28 = vadd.f32 %v1364_v61, %v1345_v8  ;;  %v1162_v7 = vmul.f32 %v5341_v6, %v1153_v46  ;;  %v1222_v3 = vmul.f32 %v5352_v13, %v1213_v35  ;;  %v1240_v43 = vmul.f32 %v1232_v47, %v1111_v33  ;;  %v1332_v47 = vld [vmem:[#allocation2 + $0x50] sm:$0xff] }
  0xa6   : > { %7790 = vst [vmem:[#allocation30_spill] sm:$0xff] %v5597_v25  ;;  %v1414_v10 = vsel %vm1128_vm1, %v5597_v25, 0.0  ;;  %v1302_v24 = vadd.f32 %v1294_v57, %v1275_v52  ;;  %v1268_v50 = vmul.f32 %v5358_v21, %v1259_v49  ;;  %v1286_v19 = vmul.f32 %v1278_v37, %v1119_v11 }
  0xa7   : > { %1415 = vadd.xlane.f32.xlu2 %v1414_v10  ;;  %v1384_v0 = vadd.f32 %v5471_v59, %v1372_v28  ;;  %v1196_v18 = vadd.f32 %v1188_v48, %v1162_v7  ;;  %v1249_v62 = vmul.f32 %v5355_v14, %v1240_v43  ;;  %v1313_v6 = vmul.f32 %v1305_v31, %v1111_v33  ;;  %v7796_v10 = vld [vmem:[#allocation25_spill] sm:$0xff] }
  0xa8   : > { %v1329_v53 = vadd.f32 %v1321_v56, %v1302_v24  ;;  %v1295_v26 = vmul.f32 %v5366_v29, %v1286_v19  ;;  %v1341_v21 = vmul.f32 %v5361_v22, %v1332_v47  ;;  %v1359_v51 = vmul.f32 %v1351_v1, %v1119_v11 }
  0xa9   : > { %v5606_v60 = vadd.f32 %v1384_v0, %v7791_v20  ;;  %v1230_v36 = vadd.f32 %v1222_v3, %v1196_v18  ;;  %v1322_v55 = vmul.f32 %v5369_v30, %v1313_v6  ;;  %v1605_v6 = vld [vmem:[%s5142_s3 + $0x8] sm:$0xff] }
  0xaa   : > { %v1348_v40 = vadd.f32 %v1340_v4, %v1329_v53  ;;  %v4862_v32 = vpop.eup %4861  ;;  %v1368_v57 = vmul.f32 %v5395_v44, %v1359_v51  ;;  %1648 = vmatpush.msra.mxu0 %v1605_v6  ;;  %4761 = vmatpush.msra.mxu1 %v1605_v6 }
  0xab   : > { %7792 = vst [vmem:[#allocation23_spill] sm:$0xff] %v5606_v60  ;;  %v1408_v27 = vsel %vm1128_vm1, %v5606_v60, 0.0  ;;  %v1257_v9 = vadd.f32 %v1249_v62, %v1230_v36  ;;  %v1424_v5 = vmul.f32 16.0, %v4862_v32  ;;  %vm1428_vm2 = vweird.f32 %v4862_v32 }
  0xac   : > { %1409 = vadd.xlane.f32.xlu1 %v1408_v27  ;;  %v1375_v12 = vadd.f32 %v1367_v39, %v1348_v40 }
  0xad   : > { %v1276_v2 = vadd.f32 %v1268_v50, %v1257_v9  ;;  %v1425_v16 = vsub.f32 1.0, %v1424_v5 }
  0xae   : > { %v1387_v63 = vadd.f32 %v5471_v59, %v1375_v12 }
  0xaf   : > { %v1303_v41 = vadd.f32 %v1295_v26, %v1276_v2  ;;  %v1426_v13 = vmul.f32 %v4862_v32, %v1425_v16 }
  0xb0   : > { %v5612_v23 = vadd.f32 %v1387_v63, %v7793_v58 }
  0xb1   : > { %v1330_v61 = vadd.f32 %v1322_v55, %v1303_v41  ;;  %v1427_v14 = vadd.f32 %v4862_v32, %v1426_v13  ;;  %v1604_v55 = vld [vmem:[%s5142_s3] sm:$0xff] }
  0xb2   : > { %7794 = vst [vmem:[#allocation24_spill] sm:$0xff] %v5612_v23  ;;  %v1417_v34 = vsel %vm1128_vm1, %v5612_v23, 0.0  ;;  %1649 = vmatpush.msra.mxu0 %v1604_v55  ;;  %4762 = vmatpush.msra.mxu1 %v1604_v55 }
  0xb3   : > { %v1349_v37 = vadd.f32 %v1341_v21, %v1330_v61  ;;  %v5630_v8 = vsel %vm1428_vm2, %v4862_v32, %v1427_v14 }
  0xb4   : > { %1418 = vadd.xlane.f32.xlu1 %v1417_v34  ;;  %7795 = vst [vmem:[#allocation31_spill] sm:$0xff] %v5630_v8  ;;  %1713 = vmatpush.msrb.mxu1 %v1605_v6 }
  0xb5   : > { %v1376_v52 = vadd.f32 %v1368_v57, %v1349_v37 }
  0xb6   : > { %1714 = vmatpush.msrb.mxu1 %v1604_v55 }
  0xb7   : > { %v1388_v22 = vadd.f32 %v5471_v59, %v1376_v52 }
  0xb9   : > { %v5641_v28 = vadd.f32 %v1388_v22, %v7796_v10 }
  0xbb   : > { %7797 = vst [vmem:[#allocation25_spill] sm:$0xff] %v5641_v28  ;;  %v1420_v4 = vsel %vm1128_vm1, %v5641_v28, 0.0 }
 0x105   : > { %v1401_v29 = vpop.xlane.xlu0 %1400 }
 0x106   : > { %v1430_v49 = vmul.f32 %v5630_v8, %v1401_v29 }
 0x108   : > { %v5634_v30 = vsub.f32 %v5506_v17, %v1430_v49 }
 0x10a   : > { %v1446_v56 = vmul.f32 %v5634_v30, %v5634_v30 }
 0x10c   : > { %v1454_v15 = vsel %vm1128_vm1, %v1446_v56, 0.0  ;;  %v1407_v44 = vpop.xlane.xlu1 %1406 }
 0x10d   : > { %1455 = vadd.xlane.f32.xlu0 %v1454_v15  ;;  %v1432_v24 = vmul.f32 %v5630_v8, %v1407_v44 }
 0x10f   : > { %v5647_v53 = vsub.f32 %v5548_v54, %v1432_v24  ;;  %v5701_v24 = vld [vmem:[%s5132_s25] ss:$0 sm:$0xff] }
 0x111   : > { %v1413_v0 = vpop.xlane.xlu2 %1412  ;;  %v1448_v59 = vmul.f32 %v5647_v53, %v5647_v53 }
 0x112   : > { %v1434_v39 = vmul.f32 %v5630_v8, %v1413_v0 }
 0x113   : > { %v1404_v20 = vpop.xlane.xlu0 %1403  ;;  %v1460_v12 = vsel %vm1128_vm1, %v1448_v59, 0.0 }
 0x114   : > { %v5653_v40 = vsub.f32 %v5563_v42, %v1434_v39  ;;  %v1431_v27 = vmul.f32 %v5630_v8, %v1404_v20  ;;  %1461 = vadd.xlane.f32.xlu1 %v1460_v12 }
 0x115   : > { %1421 = vadd.xlane.f32.xlu0 %v1420_v4 }
 0x116   : > { %v5658_v63 = vsub.f32 %v5574_v38, %v1431_v27  ;;  %v1450_v58 = vmul.f32 %v5653_v40, %v5653_v40  ;;  %v5707_v27 = vld [vmem:[%s5137_s29] ss:$0 sm:$0xff] }
 0x118   : > { %v1447_v34 = vmul.f32 %v5658_v63, %v5658_v63  ;;  %v1466_v33 = vsel %vm1128_vm1, %v1450_v58, 0.0 }
 0x11a   : > { %v1457_v48 = vsel %vm1128_vm1, %v1447_v34, 0.0  ;;  %v1416_v45 = vpop.xlane.xlu2 %1415 }
 0x11b   : > { %1458 = vadd.xlane.f32.xlu2 %v1457_v48  ;;  %v1435_v46 = vmul.f32 %v5630_v8, %v1416_v45 }
 0x11d   : > { %1467 = vadd.xlane.f32.xlu0 %v1466_v33  ;;  %v5668_v11 = vsub.f32 %v5597_v25, %v1435_v46 }
 0x11f   : > { %v1451_v7 = vmul.f32 %v5668_v11, %v5668_v11  ;;  %v1410_v35 = vpop.xlane.xlu1 %1409 }
 0x120   : > { %v1433_v18 = vmul.f32 %v5630_v8, %v1410_v35 }
 0x121   : > { %v1469_v3 = vsel %vm1128_vm1, %v1451_v7, 0.0 }
 0x122   : > { %1470 = vadd.xlane.f32.xlu1 %v1469_v3  ;;  %v5675_v43 = vsub.f32 %v5606_v60, %v1433_v18 }
 0x124   : > { %v1449_v32 = vmul.f32 %v5675_v43, %v5675_v43 }
 0x126   : > { %v1463_v50 = vsel %vm1128_vm1, %v1449_v32, 0.0 }
 0x127   : > { %v1419_v36 = vpop.xlane.xlu1 %1418  ;;  %1464 = vadd.xlane.f32.xlu2 %v1463_v50 }
 0x128   : > { %v1436_v62 = vmul.f32 %v5630_v8, %v1419_v36 }
 0x12a   : > { %v5682_v9 = vsub.f32 %v5612_v23, %v1436_v62 }
 0x12c   : > { %v1452_v19 = vmul.f32 %v5682_v9, %v5682_v9 }
 0x12e   : > { %v1472_v5 = vsel %vm1128_vm1, %v1452_v19, 0.0 }
 0x12f   : > { %1473 = vadd.xlane.f32.xlu2 %v1472_v5 }
 0x180   : > { %v1456_v31 = vpop.xlane.xlu0 %1455 }
 0x181   : > { %v1478_v2 = vmul.f32 %v1456_v31, %v5630_v8 }
 0x183   : > { %v1486_v26 = vadd.f32 1e-05, %v1478_v2 }
 0x185   : > { %4863 = vrsqrt.f32 %v1486_v26  ;;  %vm1500_vm4 = vweird.f32 %v1486_v26 }
 0x187   : > { %v1462_v47 = vpop.xlane.xlu1 %1461 }
 0x188   : > { %v1422_v16 = vpop.xlane.xlu0 %1421  ;;  %v1480_v21 = vmul.f32 %v1462_v47, %v5630_v8 }
 0x189   : > { %v1437_v41 = vmul.f32 %v5630_v8, %v1422_v16 }
 0x18a   : > { %v1488_v37 = vadd.f32 1e-05, %v1480_v21 }
 0x18b   : > { %v4864_v13 = vpop.eup %4863  ;;  %v5692_v1 = vsub.f32 %v5641_v28, %v1437_v41  ;;  %v6625_v28 = vld [vmem:[%s5117_s13 + $0x18] sm:$0xff] }
 0x18c   : > { %v1495_v61 = vmul.f32 %v4864_v13, %v1486_v26  ;;  %4865 = vrsqrt.f32 %v1488_v37  ;;  %vm1501_vm3 = vweird.f32 %v4864_v13  ;;  %vm1520_vm8 = vweird.f32 %v1488_v37  ;;  %7837 = vst [vmem:[#allocation44_spill] sm:$0xff] %v6625_v28 }
 0x18d   : > { %v1453_v51 = vmul.f32 %v5692_v1, %v5692_v1  ;;  %vm1502_vm5 = vmor %vm1500_vm4, %vm1501_vm3 }
 0x18e   : > { %v1496_v14 = vmul.f32 %v4864_v13, %v1495_v61  ;;  %v1459_v49 = vpop.xlane.xlu2 %1458 }
 0x18f   : > { %v1475_v57 = vsel %vm1128_vm1, %v1453_v51, 0.0  ;;  %v1479_v56 = vmul.f32 %v1459_v49, %v5630_v8 }
 0x190   : > { %v1497_v29 = vmul.f32 0.5, %v1496_v14  ;;  %1476 = vadd.xlane.f32.xlu0 %v1475_v57  ;;  %v1468_v52 = vpop.xlane.xlu0 %1467 }
 0x191   : > { %v1487_v15 = vadd.f32 1e-05, %v1479_v56  ;;  %v1482_v10 = vmul.f32 %v1468_v52, %v5630_v8 }
 0x192   : > { %v1498_v22 = vsub.f32 1.5, %v1497_v29  ;;  %v4866_v4 = vpop.eup %4865 }
 0x193   : > { %4867 = vrsqrt.f32 %v1487_v15  ;;  %v1515_v39 = vmul.f32 %v4866_v4, %v1488_v37  ;;  %v5703_v20 = vadd.f32 1e-05, %v1482_v10  ;;  %vm1510_vm6 = vweird.f32 %v1487_v15 }
 0x194   : > { %v1499_v44 = vmul.f32 %v4864_v13, %v1498_v22  ;;  %vm1521_vm9 = vweird.f32 %v4866_v4 }
 0x195   : > { %v1471_v12 = vpop.xlane.xlu1 %1470  ;;  %v1516_v58 = vmul.f32 %v4866_v4, %v1515_v39  ;;  %4869 = vrsqrt.f32 %v5703_v20  ;;  %vm1522_vm11 = vmor %vm1520_vm8, %vm1521_vm9  ;;  %vm1540_vm15 = vweird.f32 %v5703_v20 }
 0x196   : > { %v1503_v0 = vsel %vm1502_vm5, %v4864_v13, %v1499_v44  ;;  %v1483_v33 = vmul.f32 %v1471_v12, %v5630_v8 }
 0x197   : > { %v1574_v59 = vmul.f32 %v1503_v0, %v5634_v30  ;;  %v1517_v46 = vmul.f32 0.5, %v1516_v58 }
 0x198   : > { %v5714_v18 = vadd.f32 1e-05, %v1483_v33 }
 0x199   : > { %v1585_v34 = vmul.f32 %v5701_v24, %v1574_v59  ;;  %v4868_v48 = vpop.eup %4867  ;;  %v1518_v32 = vsub.f32 1.5, %v1517_v46 }
 0x19a   : > { %v1505_v7 = vmul.f32 %v4868_v48, %v1487_v15  ;;  %v1465_v30 = vpop.xlane.xlu2 %1464  ;;  %vm1511_vm7 = vweird.f32 %v4868_v48  ;;  %4871 = vrsqrt.f32 %v5714_v18  ;;  %vm1550_vm3 = vweird.f32 %v5714_v18 }
 0x19b   : > { %v1596_v45 = vadd.f32 %v5707_v27, %v1585_v34  ;;  %v1481_v3 = vmul.f32 %v1465_v30, %v5630_v8  ;;  %v4870_v36 = vpop.eup %4869  ;;  %vm1512_vm10 = vmor %vm1510_vm6, %vm1511_vm7  ;;  %v1519_v5 = vmul.f32 %v4866_v4, %v1518_v32 }
 0x19c   : > { %v1506_v35 = vmul.f32 %v4868_v48, %v1505_v7  ;;  %v1535_v2 = vmul.f32 %v4870_v36, %v5703_v20  ;;  %vm1541_vm0 = vweird.f32 %v4870_v36 }
 0x19d   : > { %4659 = vmatmul.msk.f32.vlgmr.msra.gmra.mxu0 %vm1128_vm1, %v1596_v45  ;;  %v1489_v62 = vadd.f32 1e-05, %v1481_v3  ;;  %v1523_v13 = vsel %vm1522_vm11, %v4866_v4, %v1519_v5  ;;  %vm1542_vm2 = vmor %vm1540_vm15, %vm1541_vm0 }
 0x19e   : > { %v1507_v50 = vmul.f32 0.5, %v1506_v35  ;;  %v1536_v47 = vmul.f32 %v4870_v36, %v1535_v2  ;;  %v1576_v57 = vmul.f32 %v1523_v13, %v5647_v53  ;;  %v1900_v2 = vld [vmem:[%s5152_s14] sm:$0xff] }
 0x19f   : > { %4873 = vrsqrt.f32 %v1489_v62  ;;  %vm1530_vm12 = vweird.f32 %v1489_v62 }
 0x1a0   : > { %v1508_v19 = vsub.f32 1.5, %v1507_v50  ;;  %v4872_v55 = vpop.eup %4871  ;;  %v1537_v52 = vmul.f32 0.5, %v1536_v47  ;;  %v1587_v56 = vmul.f32 %v5701_v24, %v1576_v57 }
 0x1a1   : > { %v1545_v29 = vmul.f32 %v4872_v55, %v5714_v18  ;;  %vm1551_vm4 = vweird.f32 %v4872_v55 }
 0x1a2   : > { %v1509_v31 = vmul.f32 %v4868_v48, %v1508_v19  ;;  %v1474_v6 = vpop.xlane.xlu2 %1473  ;;  %v1538_v10 = vsub.f32 1.5, %v1537_v52  ;;  %v1598_v53 = vadd.f32 %v5707_v27, %v1587_v56  ;;  %vm1552_vm5 = vmor %vm1550_vm3, %vm1551_vm4 }
 0x1a3   : > { %v1484_v16 = vmul.f32 %v1474_v6, %v5630_v8  ;;  %v1546_v22 = vmul.f32 %v4872_v55, %v1545_v29 }
 0x1a4   : > { %v1513_v26 = vsel %vm1512_vm10, %v4868_v48, %v1509_v31  ;;  %v1539_v59 = vmul.f32 %v4870_v36, %v1538_v10 }
 0x1a5   : > { %v1575_v41 = vmul.f32 %v1513_v26, %v5658_v63  ;;  %v4874_v61 = vpop.eup %4873  ;;  %v1492_v21 = vadd.f32 1e-05, %v1484_v16  ;;  %v1547_v0 = vmul.f32 0.5, %v1546_v22 }
 0x1a6   : > { %v1525_v14 = vmul.f32 %v4874_v61, %v1489_v62  ;;  %vm1531_vm13 = vweird.f32 %v4874_v61  ;;  %v1543_v48 = vsel %vm1542_vm2, %v4870_v36, %v1539_v59 }
 0x1a7   : > { %v1586_v51 = vmul.f32 %v5701_v24, %v1575_v41  ;;  %4875 = vrsqrt.f32 %v1492_v21  ;;  %vm1532_vm14 = vmor %vm1530_vm12, %vm1531_vm13  ;;  %v1548_v33 = vsub.f32 1.5, %v1547_v0  ;;  %v1578_v46 = vmul.f32 %v1543_v48, %v5653_v40 }
 0x1a8   : > { %v1526_v49 = vmul.f32 %v4874_v61, %v1525_v14  ;;  %vm1560_vm6 = vweird.f32 %v1492_v21 }
 0x1a9   : > { %v1597_v37 = vadd.f32 %v5707_v27, %v1586_v51  ;;  %v1549_v7 = vmul.f32 %v4872_v55, %v1548_v33  ;;  %v1589_v30 = vmul.f32 %v5701_v24, %v1578_v46  ;;  %v5009_v33 = vld [vmem:[%s5112_s9] sm:$0xff]  ;;  %v1990_v46 = vld [vmem:[#allocation2 + $0x8] sm:$0xff] }
 0x1aa   : > { %v1527_v63 = vmul.f32 0.5, %v1526_v49 }
 0x1ab   : > { %4660 = vmatmul.msk.f32.gmra.mxu0 %vm1128_vm1, %v1597_v37  ;;  %v1600_v18 = vadd.f32 %v5707_v27, %v1589_v30 }
 0x1ac   : > { %v1528_v15 = vsub.f32 1.5, %v1527_v63 }
 0x1ad   : > { %v4876_v44 = vpop.eup %4875 }
 0x1ae   : > { %v1529_v4 = vmul.f32 %v4874_v61, %v1528_v15  ;;  %v1555_v12 = vmul.f32 %v4876_v44, %v1492_v21  ;;  %vm1561_vm7 = vweird.f32 %v4876_v44  ;;  %v4822_v21 = vld [vmem:[%s5147_s8] ss:$0 sm:$0xff] }
 0x1af   : > { %vm1562_vm8 = vmor %vm1560_vm6, %vm1561_vm7 }
 0x1b0   : > { %v1533_v39 = vsel %vm1532_vm14, %v4874_v61, %v1529_v4  ;;  %v1556_v45 = vmul.f32 %v4876_v44, %v1555_v12 }
 0x1b1   : > { %v1577_v58 = vmul.f32 %v1533_v39, %v5675_v43  ;;  %v1553_v43 = vsel %vm1552_vm5, %v4872_v55, %v1549_v7  ;;  %v5770_v39 = vld [vmem:[%s5157_s19] ss:$0 sm:$0xff] }
 0x1b2   : > { %v1557_v35 = vmul.f32 0.5, %v1556_v45  ;;  %v1579_v32 = vmul.f32 %v1553_v43, %v5668_v11  ;;  %v1901_v11 = vld [vmem:[%s5152_s14 + $0x8] sm:$0xff]  ;;  %v5778_v45 = vld [vmem:[%s5162_s24] ss:$0 sm:$0xff] }
 0x1b3   : > { %4661 = vmatmul.msk.f32.gmra.mxu0 %vm1128_vm1, %v1598_v53  ;;  %v1588_v34 = vmul.f32 %v5701_v24, %v1577_v58  ;;  %1920 = vmatpush.msra.mxu2 %v1901_v11  ;;  %v5010_v43 = vld [vmem:[%s5117_s13] sm:$0xff] }
 0x1b4   : > { %v1558_v3 = vsub.f32 1.5, %v1557_v35  ;;  %v1590_v40 = vmul.f32 %v5701_v24, %v1579_v32 }
 0x1b5   : > { %v1599_v20 = vadd.f32 %v5707_v27, %v1588_v34  ;;  %1921 = vmatpush.msra.mxu2 %v1900_v2  ;;  %v1956_v34 = vld [vmem:[#allocation2 + $0x7] sm:$0xff] }
 0x1b6   : > { %v1559_v50 = vmul.f32 %v4876_v44, %v1558_v3  ;;  %v1601_v62 = vadd.f32 %v5707_v27, %v1590_v40  ;;  %v1964_v48 = vmul.f32 %v5009_v33, %v1956_v34 }
 0x1b8   : > { %v1563_v36 = vsel %vm1562_vm8, %v4876_v44, %v1559_v50  ;;  %v1973_v35 = vmul.f32 %v5778_v45, %v1964_v48 }
 0x1b9   : > { %v1580_v19 = vmul.f32 %v1563_v36, %v5682_v9 }
 0x1bb   : > { %4662 = vmatmul.msk.f32.gmra.mxu0 %vm1128_vm1, %v1599_v20  ;;  %v1591_v5 = vmul.f32 %v5701_v24, %v1580_v19  ;;  %v5781_v20 = vld [vmem:[%s5162_s24 + $0x1] ss:$0 sm:$0xff] }
 0x1bc   : > { %v1999_v30 = vmul.f32 %v5781_v20, %v1990_v46 }
 0x1bd   : > { %v1602_v31 = vadd.f32 %v5707_v27, %v1591_v5  ;;  %v5793_v5 = vld [vmem:[%s5162_s24 + $0x3] ss:$0 sm:$0xff] }
 0x1be   : > { %v2007_v36 = vadd.f32 %v1999_v30, %v1973_v35 }
 0x1c3   : > { %4663 = vmatmul.msk.f32.gmra.mxu0 %vm1128_vm1, %v1600_v18  ;;  %v5787_v18 = vld [vmem:[%s5162_s24 + $0x2] ss:$0 sm:$0xff] }
 0x1cb   : > { %4664 = vmatmul.msk.f32.gmra.mxu0 %vm1128_vm1, %v1601_v62 }
 0x1d3   : > { %4665 = vmatmul.msk.f32.gmra.mxu0 %vm1128_vm1, %v1602_v31 }
 0x203   : > { %v1477_v26 = vpop.xlane.xlu0 %1476 }
 0x204   : > { %v1485_v6 = vmul.f32 %v1477_v26, %v5630_v8  ;;  %v5797_v26 = vld [vmem:[%s5162_s24 + $0x4] ss:$0 sm:$0xff] }
 0x206   : > { %v1493_v16 = vadd.f32 1e-05, %v1485_v6 }
 0x208   : > { %4877 = vrsqrt.f32 %v1493_v16  ;;  %vm1570_vm10 = vweird.f32 %v1493_v16 }
 0x20e   : > { %v4878_v41 = vpop.eup %4877 }
 0x20f   : > { %v1565_v9 = vmul.f32 %v4878_v41, %v1493_v16  ;;  %vm1571_vm9 = vweird.f32 %v4878_v41 }
 0x210   : > { %vm1572_vm11 = vmor %vm1570_vm10, %vm1571_vm9 }
 0x211   : > { %v1566_v55 = vmul.f32 %v4878_v41, %v1565_v9 }
 0x213   : > { %v1567_v13 = vmul.f32 0.5, %v1566_v55 }
 0x215   : > { %v1568_v47 = vsub.f32 1.5, %v1567_v13  ;;  %v5801_v13 = vld [vmem:[%s5162_s24 + $0x5] ss:$0 sm:$0xff] }
 0x217   : > { %v1569_v61 = vmul.f32 %v4878_v41, %v1568_v47 }
 0x219   : > { %v1573_v51 = vsel %vm1572_vm11, %v4878_v41, %v1569_v61  ;;  %v5011_v61 = vld [vmem:[%s5112_s9 + $0x8] sm:$0xff] }
 0x21a   : > { %v1651_v14 = vpop.f32.mrf.mxu0  ;;  %v1581_v37 = vmul.f32 %v1573_v51, %v5692_v1 }
 0x21b   : > { %v1652_v57 = vadd.f32 %v4822_v21, %v1651_v14 }
 0x21c   : > { %v1592_v29 = vmul.f32 %v5701_v24, %v1581_v37  ;;  %v5807_v37 = vld [vmem:[%s5162_s24 + $0x6] ss:$0 sm:$0xff] }
 0x21d   : > { %4675 = vmatmul.msk.f32.vlgmr.msra.gmra.mxu2 %vm1128_vm1, %v1652_v57 }
 0x21e   : > { %v1603_v49 = vadd.f32 %v5707_v27, %v1592_v29 }
 0x220   : > { %4666 = vmatmul.msk.f32.vlgmr.msra.gmra.mxu1 %vm1128_vm1, %v1603_v49 }
 0x228   : > { %4667 = vmatmul.msk.f32.vlgmr.msrb.gmra.mxu1 %vm1128_vm1, %v1652_v57  ;;  %v1654_v52 = vpop.f32.mrf.mxu0 }
 0x229   : > { %v1655_v63 = vadd.f32 %v4822_v21, %v1654_v52  ;;  %v5012_v52 = vld [vmem:[%s5117_s13 + $0x8] sm:$0xff] }
 0x22b   : > { %4676 = vmatmul.msk.f32.gmra.mxu2 %vm1128_vm1, %v1655_v63 }
 0x230   : > { %4668 = vmatmul.msk.f32.gmra.mxu1 %vm1128_vm1, %v1655_v63  ;;  %v1657_v56 = vpop.f32.mrf.mxu0 }
 0x231   : > { %v1658_v22 = vadd.f32 %v4822_v21, %v1657_v56 }
 0x233   : > { %4677 = vmatmul.msk.f32.gmra.mxu2 %vm1128_vm1, %v1658_v22 }
 0x238   : > { %4669 = vmatmul.msk.f32.gmra.mxu1 %vm1128_vm1, %v1658_v22  ;;  %v1660_v1 = vpop.f32.mrf.mxu0 }
 0x239   : > { %v1661_v24 = vadd.f32 %v4822_v21, %v1660_v1 }
 0x23b   : > { %4678 = vmatmul.msk.f32.gmra.mxu2 %vm1128_vm1, %v1661_v24 }
 0x240   : > { %4670 = vmatmul.msk.f32.gmra.mxu1 %vm1128_vm1, %v1661_v24  ;;  %v1663_v27 = vpop.f32.mrf.mxu0 }
 0x241   : > { %v1664_v15 = vadd.f32 %v4822_v21, %v1663_v27 }
 0x243   : > { %4679 = vmatmul.msk.f32.gmra.mxu2 %vm1128_vm1, %v1664_v15 }
 0x248   : > { %4671 = vmatmul.msk.f32.gmra.mxu1 %vm1128_vm1, %v1664_v15  ;;  %v1666_v10 = vpop.f32.mrf.mxu0  ;;  %v5816_v15 = vld [vmem:[%s5162_s24 + $0x7] ss:$0 sm:$0xff] }
 0x249   : > { %v1667_v44 = vadd.f32 %v4822_v21, %v1666_v10 }
 0x24b   : > { %4680 = vmatmul.msk.f32.gmra.mxu2 %vm1128_vm1, %v1667_v44 }
 0x250   : > { %4672 = vmatmul.msk.f32.gmra.mxu1 %vm1128_vm1, %v1667_v44  ;;  %v1669_v4 = vpop.f32.mrf.mxu0 }
 0x251   : > { %v1670_v53 = vadd.f32 %v4822_v21, %v1669_v4 }
 0x253   : > { %4681 = vmatmul.msk.f32.gmra.mxu2 %vm1128_vm1, %v1670_v53 }
 0x258   : > { %4673 = vmatmul.msk.f32.gmra.mxu1 %vm1128_vm1, %v1670_v53 }
 0x29d   : > { %v1672_v0 = vpop.f32.mrf.mxu1 }
 0x29e   : > { %v1673_v59 = vadd.f32 %v4822_v21, %v1672_v0 }
 0x2a0   : > { %4674 = vmatmul.msk.f32.gmra.mxu1 %vm1128_vm1, %v1673_v59  ;;  %v1923_v12 = vpop.f32.mrf.mxu2  ;;  %4682 = vmatmul.msk.f32.gmra.mxu2 %vm1128_vm1, %v1673_v59  ;;  %v5821_v59 = vld [vmem:[%s5162_s24 + $0x8] ss:$0 sm:$0xff] }
 0x2a1   : > { %v1924_v58 = vadd.f32 %v5770_v39, %v1923_v12 }
 0x2a3   : > { %1947 = vst.msk [vmem:[#allocation2 + $0x10] sm:$0xff] %vm1128_vm1, %v1924_v58 }
 0x2aa   : > { %v2016_v7 = vld [vmem:[#allocation2 + $0x9] sm:$0xff] }
 0x2ab   : > { %v2024_v3 = vmul.f32 %v5010_v43, %v2016_v7  ;;  %v1957_v40 = vld [vmem:[#allocation2 + $0xf] sm:$0xff]  ;;  %v5826_v7 = vld [vmem:[%s5167_s30] ss:$0 sm:$0xff] }
 0x2ac   : > { %v2051_v19 = vmul.f32 %v5009_v33, %v1957_v40  ;;  %v1991_v16 = vld [vmem:[#allocation2 + $0x10] sm:$0xff]  ;;  %v1965_v21 = vmul.f32 %v5011_v61, %v1957_v40 }
 0x2ad   : > { %v2033_v62 = vmul.f32 %v5787_v18, %v2024_v3  ;;  %v2079_v51 = vmul.f32 %v5797_v26, %v1991_v16  ;;  %v2000_v24 = vmul.f32 %v5781_v20, %v1991_v16 }
 0x2ae   : > { %v1926_v32 = vpop.f32.mrf.mxu2  ;;  %v2060_v2 = vmul.f32 %v5793_v5, %v2051_v19  ;;  %v1974_v49 = vmul.f32 %v5778_v45, %v1965_v21  ;;  %v2438_v21 = vld [vmem:[%s7798_s2] sm:$0xff] }
 0x2af   : > { %v1927_v50 = vadd.f32 %v5770_v39, %v1926_v32  ;;  %v2041_v31 = vadd.f32 %v2033_v62, %v2007_v36 }
 0x2b0   : > { %v2008_v12 = vadd.f32 %v2000_v24, %v1974_v49 }
 0x2b1   : > { %1948 = vst.msk [vmem:[#allocation2 + $0x18] sm:$0xff] %vm1128_vm1, %v1927_v50  ;;  %v2068_v55 = vadd.f32 %v2060_v2, %v2041_v31  ;;  %v2368_v2 = vld [vmem:[%s5172_s6 + $0x8] sm:$0xff] }
 0x2b2   : > { %2411 = vmatpush.msra.mxu3 %v2368_v2 }
 0x2b3   : > { %v2087_v57 = vadd.f32 %v2079_v51, %v2068_v55 }
 0x2b6   : > { %v1929_v11 = vpop.f32.mrf.mxu2 }
 0x2b7   : > { %v1930_v6 = vadd.f32 %v5770_v39, %v1929_v11 }
 0x2b8   : > { %v1958_v41 = vld [vmem:[#allocation2 + $0x17] sm:$0xff] }
 0x2b9   : > { %v2017_v9 = vld [vmem:[#allocation2 + $0x11] sm:$0xff]  ;;  %1949 = vst.msk [vmem:[#allocation2 + $0x20] sm:$0xff] %vm1128_vm1, %v1930_v6  ;;  %v2124_v14 = vmul.f32 %v5009_v33, %v1958_v41  ;;  %v2052_v58 = vmul.f32 %v5011_v61, %v1958_v41  ;;  %v2439_v6 = vld [vmem:[%s7798_s2 + $0x8] sm:$0xff]  ;;  %s7898_s2 = sld [smem:[#allocation21_spill]] }
 0x2ba   : > { %v2097_v47 = vmul.f32 %v5010_v43, %v2017_v9  ;;  %v2025_v63 = vmul.f32 %v5012_v52, %v2017_v9  ;;  %v1992_v44 = vld [vmem:[#allocation2 + $0x18] sm:$0xff]  ;;  %2458 = vmatpush.msrb.mxu0 %v2439_v6  ;;  %v5013_v9 = vld [vmem:[%s5112_s9 + $0x10] sm:$0xff] }
 0x2bb   : > { %v2133_v27 = vmul.f32 %v5807_v37, %v2124_v14  ;;  %v2152_v34 = vmul.f32 %v5816_v15, %v1992_v44  ;;  %v2061_v35 = vmul.f32 %v5793_v5, %v2052_v58  ;;  %v2080_v62 = vmul.f32 %v5797_v26, %v1992_v44 }
 0x2bc   : > { %v2106_v29 = vmul.f32 %v5801_v13, %v2097_v47  ;;  %v2034_v10 = vmul.f32 %v5787_v18, %v2025_v63  ;;  %v1966_v55 = vmul.f32 %v5013_v9, %v1958_v41  ;;  %v2367_v47 = vld [vmem:[%s5172_s6] sm:$0xff]  ;;  %2459 = vmatpush.msrb.mxu0 %v2438_v21 }
 0x2bd   : > { %2412 = vmatpush.msra.mxu3 %v2367_v47 }
 0x2be   : > { %v1932_v56 = vpop.f32.mrf.mxu2  ;;  %v2114_v22 = vadd.f32 %v2106_v29, %v2087_v57  ;;  %v2042_v33 = vadd.f32 %v2034_v10, %v2008_v12  ;;  %v1975_v24 = vmul.f32 %v5778_v45, %v1966_v55 }
 0x2bf   : > { %v1933_v1 = vadd.f32 %v5770_v39, %v1932_v56 }
 0x2c0   : > { %v2018_v4 = vld [vmem:[#allocation2 + $0x19] sm:$0xff]  ;;  %v2141_v53 = vadd.f32 %v2133_v27, %v2114_v22  ;;  %v2069_v40 = vadd.f32 %v2061_v35, %v2042_v33  ;;  %v5014_v27 = vld [vmem:[%s5117_s13 + $0x10] sm:$0xff] }
 0x2c1   : > { %1950 = vst.msk [vmem:[#allocation2 + $0x28] sm:$0xff] %vm1128_vm1, %v1933_v1  ;;  %v2170_v0 = vmul.f32 %v5010_v43, %v2018_v4  ;;  %v5829_v3 = vld [vmem:[#allocation2 + $0x1f] sm:$0xff]  ;;  %v2098_v43 = vmul.f32 %v5012_v52, %v2018_v4  ;;  %v2026_v10 = vmul.f32 %v5014_v27, %v2018_v4 }
 0x2c2   : > { %v2160_v48 = vadd.f32 %v2152_v34, %v2141_v53  ;;  %v2125_v31 = vmul.f32 %v5011_v61, %v5829_v3  ;;  %v2088_v16 = vadd.f32 %v2080_v62, %v2069_v40  ;;  %v1993_v14 = vld [vmem:[#allocation2 + $0x20] sm:$0xff] }
 0x2c3   : > { %v2179_v46 = vmul.f32 %v5821_v59, %v2170_v0  ;;  %v2107_v19 = vmul.f32 %v5801_v13, %v2098_v43  ;;  %v2153_v41 = vmul.f32 %v5816_v15, %v1993_v14  ;;  %v2053_v0 = vmul.f32 %v5013_v9, %v5829_v3 }
 0x2c4   : > { %v2134_v29 = vmul.f32 %v5807_v37, %v2125_v31  ;;  %v2035_v34 = vmul.f32 %v5787_v18, %v2026_v10  ;;  %v2081_v62 = vmul.f32 %v5797_v26, %v1993_v14 }
 0x2c5   : > { %v2187_v50 = vadd.f32 %v2179_v46, %v2160_v48  ;;  %v2115_v57 = vadd.f32 %v2107_v19, %v2088_v16  ;;  %v2062_v4 = vmul.f32 %v5793_v5, %v2053_v0 }
 0x2c6   : > { %v1935_v30 = vpop.f32.mrf.mxu2 }
 0x2c7   : > { %v1936_v32 = vadd.f32 %v5770_v39, %v1935_v30  ;;  %v5834_v36 = vadd.f32 %v5826_v7, %v2187_v50  ;;  %v2142_v22 = vadd.f32 %v2134_v29, %v2115_v57 }
 0x2c8   : > { %v5839_v11 = vld [vmem:[#allocation2 + $0x21] sm:$0xff] }
 0x2c9   : > { %1951 = vst.msk [vmem:[#allocation2 + $0x30] sm:$0xff] %vm1128_vm1, %v1936_v32  ;;  %v2207_v51 = vsub.f32 0.0, %v5834_v36  ;;  %v2171_v61 = vmul.f32 %v5012_v52, %v5839_v11  ;;  %v2001_v52 = vmul.f32 %v5781_v20, %v1992_v44  ;;  %v2161_v53 = vadd.f32 %v2153_v41, %v2142_v22  ;;  %v5865_v32 = vld [vmem:[#allocation2 + $0x27] sm:$0xff] }
 0x2ca   : > { %v2099_v44 = vmul.f32 %v5014_v27, %v5839_v11  ;;  %v2126_v31 = vmul.f32 %v5013_v9, %v5865_v32  ;;  %v1994_v55 = vld [vmem:[#allocation2 + $0x28] sm:$0xff]  ;;  %v5016_v9 = vld [vmem:[%s5117_s13 + $0x18] sm:$0xff] }
 0x2cb   : > { %v2215_v56 = vmul.f32 1.442695, %v2207_v51  ;;  %v2180_v1 = vmul.f32 %v5821_v59, %v2171_v61  ;;  %v2009_v58 = vadd.f32 %v2001_v52, %v1975_v24  ;;  %v5015_v61 = vld [vmem:[%s5112_s9 + $0x18] sm:$0xff]  ;;  %v2027_v22 = vmul.f32 %v5016_v9, %v5839_v11 }
 0x2cc   : > { %v2108_v19 = vmul.f32 %v5801_v13, %v2099_v44  ;;  %v2135_v21 = vmul.f32 %v5807_v37, %v2126_v31  ;;  %v2054_v11 = vmul.f32 %v5015_v61, %v5865_v32 }
 0x2cd   : > { %4879 = vpow2.f32 %v2215_v56  ;;  %v2188_v12 = vadd.f32 %v2180_v1, %v2161_v53  ;;  %v2043_v30 = vadd.f32 %v2035_v34, %v2009_v58  ;;  %v2036_v34 = vmul.f32 %v5787_v18, %v2027_v22 }
 0x2ce   : > { %v1938_v49 = vpop.f32.mrf.mxu2  ;;  %v2003_v22 = vmul.f32 %v5781_v20, %v1994_v55 }
 0x2cf   : > { %v1939_v63 = vadd.f32 %v5770_v39, %v1938_v49  ;;  %v5860_v35 = vadd.f32 %v5826_v7, %v2188_v12  ;;  %v2070_v40 = vadd.f32 %v2062_v4, %v2043_v30  ;;  %v1967_v49 = vmul.f32 %v5015_v61, %v5829_v3 }
 0x2d0   : > { %v5871_v6 = vld [vmem:[#allocation2 + $0x29] sm:$0xff] }
 0x2d1   : > { %1952 = vst.msk [vmem:[#allocation2 + $0x38] sm:$0xff] %vm1128_vm1, %v1939_v63  ;;  %v2208_v50 = vsub.f32 0.0, %v5860_v35  ;;  %v2089_v16 = vadd.f32 %v2081_v62, %v2070_v40  ;;  %v2172_v51 = vmul.f32 %v5014_v27, %v5871_v6  ;;  %v2154_v63 = vmul.f32 %v5816_v15, %v1994_v55  ;;  %v5891_v4 = vld [vmem:[#allocation2 + $0x2f] sm:$0xff] }
 0x2d2   : > { %v1976_v52 = vmul.f32 %v5778_v45, %v1967_v49  ;;  %v2002_v27 = vmul.f32 %v5781_v20, %v1993_v14  ;;  %v2063_v62 = vmul.f32 %v5793_v5, %v2054_v11 }
 0x2d3   : > { %v4880_v48 = vpop.eup %4879  ;;  %v2217_v2 = vmul.f32 1.442695, %v2208_v50  ;;  %v2116_v47 = vadd.f32 %v2108_v19, %v2089_v16  ;;  %v2181_v1 = vmul.f32 %v5821_v59, %v2172_v51  ;;  %v2100_v19 = vmul.f32 %v5016_v9, %v5871_v6 }
 0x2d4   : > { %v2231_v43 = vadd.f32 1.0, %v4880_v48  ;;  %v2010_v48 = vadd.f32 %v2002_v27, %v1976_v52 }
 0x2d5   : > { %v2143_v29 = vadd.f32 %v2135_v21, %v2116_v47  ;;  %v2109_v51 = vmul.f32 %v5801_v13, %v2100_v19 }
 0x2d6   : > { %v1941_v33 = vpop.f32.mrf.mxu2  ;;  %4881 = vrcp.f32 %v2231_v43  ;;  %v2250_v53 = vand.u32 2147483648, %v2231_v43  ;;  %v2248_v58 = vand.u32 2147483647, %v2231_v43  ;;  %vm2244_vm13 = vweird.f32 %v2231_v43 }
 0x2d7   : > { %v1942_v46 = vadd.f32 %v5770_v39, %v1941_v33  ;;  %4883 = vpow2.f32 %v2217_v2  ;;  %v2162_v41 = vadd.f32 %v2154_v63, %v2143_v29  ;;  %v2044_v44 = vadd.f32 %v2036_v34, %v2010_v48  ;;  %v5911_v29 = vld [vmem:[#allocation2 + $0x30] sm:$0xff] }
 0x2d8   : > { %vm2249_vm15 = vcmp.eq.f32.partialorder %v2248_v58, 8.507059e+37  ;;  %v5899_v31 = vld [vmem:[#allocation2 + $0x31] sm:$0xff]  ;;  %v2082_v2 = vmul.f32 %v5797_v26, %v1994_v55 }
 0x2d9   : > { %1953 = vst.msk [vmem:[#allocation2 + $0x40] sm:$0xff] %vm1128_vm1, %v1942_v46  ;;  %v2189_v12 = vadd.f32 %v2181_v1, %v2162_v41  ;;  %v2251_v46 = vor.u32 1.1754944e-38, %v2250_v53  ;;  %v2071_v21 = vadd.f32 %v2063_v62, %v2044_v44  ;;  %v2173_v63 = vmul.f32 %v5016_v9, %v5899_v31  ;;  %v5017_v41 = vld [vmem:[%s5112_s9 + $0x20] sm:$0xff] }
 0x2da   : > { %v1968_v1 = vmul.f32 %v5017_v41, %v5865_v32  ;;  %v5018_v53 = vld [vmem:[%s5117_s13 + $0x20] sm:$0xff]  ;;  %v2155_v9 = vmul.f32 %v5816_v15, %v5911_v29  ;;  %v2055_v34 = vmul.f32 %v5017_v41, %v5891_v4 }
 0x2db   : > { %v5889_v30 = vadd.f32 %v5826_v7, %v2189_v12  ;;  %v2090_v49 = vadd.f32 %v2082_v2, %v2071_v21  ;;  %v2028_v27 = vmul.f32 %v5018_v53, %v5871_v6  ;;  %v2182_v55 = vmul.f32 %v5821_v59, %v2173_v63  ;;  %v5952_v63 = vld [vmem:[#allocation2 + $0x38] sm:$0xff] }
 0x2dc   : > { %v4882_v57 = vpop.eup %4881 }
 0x2dd   : > { %v2240_v56 = vmul.f32 %v4882_v57, %v2231_v43  ;;  %v4884_v24 = vpop.eup %4883  ;;  %vm2245_vm12 = vweird.f32 %v4882_v57  ;;  %v2209_v40 = vsub.f32 0.0, %v5889_v30  ;;  %v2037_v32 = vmul.f32 %v5787_v18, %v2028_v27 }
 0x2de   : > { %v5883_v0 = vadd.f32 1.0, %v4884_v24  ;;  %vm2246_vm14 = vmor %vm2244_vm13, %vm2245_vm12 }
 0x2df   : > { %v2241_v10 = vsub.f32 1.0, %v2240_v56  ;;  %v2219_v47 = vmul.f32 1.442695, %v2209_v40  ;;  %v5930_v40 = vld [vmem:[#allocation2 + $0x37] sm:$0xff] }
 0x2e0   : > { %4885 = vrcp.f32 %v5883_v0  ;;  %v2265_v24 = vand.u32 2147483648, %v5883_v0  ;;  %vm2259_vm2 = vweird.f32 %v5883_v0 }
 0x2e1   : > { %v2242_v3 = vmul.f32 %v4882_v57, %v2241_v10  ;;  %4887 = vpow2.f32 %v2219_v47  ;;  %v2117_v10 = vadd.f32 %v2109_v51, %v2090_v49  ;;  %v2064_v47 = vmul.f32 %v5793_v5, %v2055_v34 }
 0x2e2   : > { %v2266_v6 = vor.u32 1.1754944e-38, %v2265_v24  ;;  %v2083_v51 = vmul.f32 %v5797_v26, %v5911_v29  ;;  %v2128_v49 = vmul.f32 %v5017_v41, %v5930_v40 }
 0x2e3   : > { %v2243_v33 = vadd.f32 %v4882_v57, %v2242_v3  ;;  %v1977_v3 = vmul.f32 %v5778_v45, %v1968_v1 }
 0x2e4   : > { %v2137_v41 = vmul.f32 %v5807_v37, %v2128_v49 }
 0x2e5   : > { %v2247_v14 = vsel %vm2246_vm14, %v4882_v57, %v2243_v33  ;;  %v2127_v57 = vmul.f32 %v5015_v61, %v5891_v4  ;;  %v2263_v61 = vand.u32 2147483647, %v5883_v0  ;;  %v2011_v33 = vadd.f32 %v2003_v22, %v1977_v3 }
 0x2e6   : > { %v2252_v50 = vsel %vm2249_vm15, %v2251_v46, %v2247_v14  ;;  %v4886_v16 = vpop.eup %4885  ;;  %v2101_v14 = vmul.f32 %v5018_v53, %v5899_v31 }
 0x2e7   : > { %v5897_v43 = vmul.f32 %v2252_v50, %v5834_v36  ;;  %v2255_v36 = vmul.f32 %v4886_v16, %v5883_v0  ;;  %v2136_v52 = vmul.f32 %v5807_v37, %v2127_v57  ;;  %vm2260_vm0 = vweird.f32 %v4886_v16  ;;  %v4888_v48 = vpop.eup %4887  ;;  %v5936_v0 = vld [vmem:[#allocation2 + $0x39] sm:$0xff] }
 0x2e8   : > { %vm2261_vm3 = vmor %vm2259_vm2, %vm2260_vm0  ;;  %vm2264_vm4 = vcmp.eq.f32.partialorder %v2263_v61, 8.507059e+37  ;;  %v2233_v50 = vadd.f32 1.0, %v4888_v48  ;;  %v2045_v62 = vadd.f32 %v2037_v32, %v2011_v33  ;;  %v2174_v61 = vmul.f32 %v5018_v53, %v5936_v0 }
 0x2e9   : > { %4683 = vmatmul.msk.f32.vlgmr.msra.gmra.mxu3 %vm1128_vm1, %v5897_v43  ;;  %3252 = vst.msk [vmem:[#allocation2 + $0x10] sm:$0xff] %vm1128_vm1, %v5897_v43  ;;  %4691 = vmatmul.msk.f32.vlgmr.msrb.gmra.mxu0 %vm1128_vm1, %v5897_v43  ;;  %v2256_v56 = vsub.f32 1.0, %v2255_v36  ;;  %v2144_v58 = vadd.f32 %v2136_v52, %v2117_v10  ;;  %v2110_v36 = vmul.f32 %v5801_v13, %v2101_v14 }
 0x2ea   : > { %4889 = vrcp.f32 %v2233_v50  ;;  %v2072_v57 = vadd.f32 %v2064_v47, %v2045_v62  ;;  %v2156_v10 = vmul.f32 %v5816_v15, %v5952_v63  ;;  %v2278_v32 = vand.u32 2147483647, %v2233_v50  ;;  %v5019_v47 = vld [vmem:[%s5112_s9 + $0x28] sm:$0xff] }
 0x2eb   : > { %v2257_v12 = vmul.f32 %v4886_v16, %v2256_v56  ;;  %v2163_v46 = vadd.f32 %v2155_v9, %v2144_v58  ;;  %v2280_v58 = vand.u32 2147483648, %v2233_v50  ;;  %vm2274_vm6 = vweird.f32 %v2233_v50 }
 0x2ec   : > { %v2091_v56 = vadd.f32 %v2083_v51, %v2072_v57  ;;  %vm2279_vm8 = vcmp.eq.f32.partialorder %v2278_v32, 8.507059e+37  ;;  %v1969_v51 = vmul.f32 %v5019_v47, %v5891_v4  ;;  %v2004_v4 = vmul.f32 %v5781_v20, %v5911_v29 }
 0x2ed   : > { %v2258_v11 = vadd.f32 %v4886_v16, %v2257_v12  ;;  %v2190_v2 = vadd.f32 %v2182_v55, %v2163_v46  ;;  %v2183_v12 = vmul.f32 %v5821_v59, %v2174_v61  ;;  %v2281_v48 = vor.u32 1.1754944e-38, %v2280_v58 }
 0x2ee   : > { %v2118_v1 = vadd.f32 %v2110_v36, %v2091_v56 }
 0x2ef   : > { %v2262_v44 = vsel %vm2261_vm3, %v4886_v16, %v2258_v11  ;;  %v5941_v16 = vadd.f32 %v5826_v7, %v2190_v2 }
 0x2f0   : > { %v2267_v19 = vsel %vm2264_vm4, %v2266_v6, %v2262_v44  ;;  %v4890_v24 = vpop.eup %4889  ;;  %v2145_v27 = vadd.f32 %v2137_v41, %v2118_v1  ;;  %v1978_v1 = vmul.f32 %v5778_v45, %v1969_v51 }
 0x2f1   : > { %v5934_v21 = vmul.f32 %v2267_v19, %v5860_v35  ;;  %v2210_v35 = vsub.f32 0.0, %v5941_v16  ;;  %v2270_v52 = vmul.f32 %v4890_v24, %v2233_v50  ;;  %vm2275_vm5 = vweird.f32 %v4890_v24 }
 0x2f2   : > { %v2164_v3 = vadd.f32 %v2156_v10, %v2145_v27  ;;  %vm2276_vm7 = vmor %vm2274_vm6, %vm2275_vm5 }
 0x2f3   : > { %4684 = vmatmul.msk.f32.gmra.mxu3 %vm1128_vm1, %v5934_v21  ;;  %3253 = vst.msk [vmem:[#allocation2 + $0x18] sm:$0xff] %vm1128_vm1, %v5934_v21  ;;  %4692 = vmatmul.msk.f32.gmra.mxu0 %vm1128_vm1, %v5934_v21  ;;  %v2221_v22 = vmul.f32 1.442695, %v2210_v35  ;;  %v2271_v9 = vsub.f32 1.0, %v2270_v52  ;;  %v5975_v35 = vld [vmem:[%s5117_s13 + $0x28] sm:$0xff] }
 0x2f4   : > { %v2191_v53 = vadd.f32 %v2183_v12, %v2164_v3  ;;  %v2029_v56 = vmul.f32 %v5975_v35, %v5899_v31  ;;  %v2012_v12 = vadd.f32 %v2004_v4, %v1978_v1  ;;  %v2056_v31 = vmul.f32 %v5019_v47, %v5930_v40 }
 0x2f5   : > { %4891 = vpow2.f32 %v2221_v22  ;;  %v2272_v55 = vmul.f32 %v4890_v24, %v2271_v9  ;;  %v2102_v32 = vmul.f32 %v5975_v35, %v5936_v0 }
 0x2f6   : > { %v5960_v33 = vadd.f32 %v5826_v7, %v2191_v53  ;;  %v2038_v10 = vmul.f32 %v5787_v18, %v2029_v56 }
 0x2f7   : > { %v2273_v11 = vadd.f32 %v4890_v24, %v2272_v55  ;;  %v2065_v55 = vmul.f32 %v5793_v5, %v2056_v31 }
 0x2f8   : > { %v2211_v14 = vsub.f32 0.0, %v5960_v33  ;;  %v2046_v58 = vadd.f32 %v2038_v10, %v2012_v12 }
 0x2f9   : > { %v2277_v46 = vsel %vm2276_vm7, %v4890_v24, %v2273_v11 }
 0x2fa   : > { %v2282_v44 = vsel %vm2279_vm8, %v2281_v48, %v2277_v46  ;;  %v2223_v19 = vmul.f32 1.442695, %v2211_v14  ;;  %v1963_v46 = vld [vmem:[#allocation2 + $0x3f] sm:$0xff] }
 0x2fb   : > { %v4892_v34 = vpop.eup %4891  ;;  %v5964_v62 = vmul.f32 %v2282_v44, %v5889_v30  ;;  %v2084_v44 = vmul.f32 %v5797_v26, %v5952_v63 }
 0x2fc   : > { %v2234_v6 = vadd.f32 1.0, %v4892_v34  ;;  %v2073_v34 = vadd.f32 %v2065_v55, %v2046_v58 }
 0x2fd   : > { %4685 = vmatmul.msk.f32.gmra.mxu3 %vm1128_vm1, %v5964_v62  ;;  %3254 = vst.msk [vmem:[#allocation2 + $0x20] sm:$0xff] %vm1128_vm1, %v5964_v62  ;;  %4693 = vmatmul.msk.f32.gmra.mxu0 %vm1128_vm1, %v5964_v62 }
 0x2fe   : > { %4893 = vrcp.f32 %v2234_v6  ;;  %v2295_v30 = vand.u32 2147483648, %v2234_v6  ;;  %v2293_v22 = vand.u32 2147483647, %v2234_v6  ;;  %vm2289_vm10 = vweird.f32 %v2234_v6 }
 0x2ff   : > { %4895 = vpow2.f32 %v2223_v19  ;;  %v2111_v19 = vmul.f32 %v5801_v13, %v2102_v32  ;;  %v2092_v51 = vadd.f32 %v2084_v44, %v2073_v34 }
 0x300   : > { %v2296_v24 = vor.u32 1.1754944e-38, %v2295_v30  ;;  %vm2294_vm12 = vcmp.eq.f32.partialorder %v2293_v22, 8.507059e+37  ;;  %v5022_v22 = vld [vmem:[%s5117_s13 + $0x30] sm:$0xff] }
 0x301   : > { %v2030_v1 = vmul.f32 %v5022_v22, %v5936_v0  ;;  %v2005_v0 = vmul.f32 %v5781_v20, %v5952_v63 }
 0x304   : > { %v4894_v50 = vpop.eup %4893 }
 0x305   : > { %v2285_v2 = vmul.f32 %v4894_v50, %v2234_v6  ;;  %v4896_v57 = vpop.eup %4895  ;;  %vm2290_vm9 = vweird.f32 %v4894_v50 }
 0x306   : > { %v2235_v49 = vadd.f32 1.0, %v4896_v57  ;;  %vm2291_vm11 = vmor %vm2289_vm10, %vm2290_vm9  ;;  %v2129_v57 = vmul.f32 %v5019_v47, %v1963_v46 }
 0x307   : > { %v2286_v36 = vsub.f32 1.0, %v2285_v2 }
 0x308   : > { %4897 = vrcp.f32 %v2235_v49  ;;  %v2308_v48 = vand.u32 2147483647, %v2235_v49  ;;  %vm2304_vm14 = vweird.f32 %v2235_v49 }
 0x309   : > { %v2287_v61 = vmul.f32 %v4894_v50, %v2286_v36  ;;  %v5021_v36 = vld [vmem:[%s5112_s9 + $0x30] sm:$0xff] }
 0x30a   : > { %v1970_v30 = vmul.f32 %v5021_v36, %v5930_v40  ;;  %vm2309_vm0 = vcmp.eq.f32.partialorder %v2308_v48, 8.507059e+37  ;;  %v1997_v40 = vld [vmem:[#allocation2 + $0x40] sm:$0xff]  ;;  %v2057_v12 = vmul.f32 %v5021_v36, %v1963_v46 }
 0x30b   : > { %v2288_v41 = vadd.f32 %v4894_v50, %v2287_v61  ;;  %v2119_v61 = vadd.f32 %v2111_v19, %v2092_v51  ;;  %v2157_v10 = vmul.f32 %v5816_v15, %v1997_v40  ;;  %v2085_v34 = vmul.f32 %v5797_v26, %v1997_v40 }
 0x30c   : > { %v1979_v4 = vmul.f32 %v5778_v45, %v1970_v30  ;;  %v2066_v55 = vmul.f32 %v5793_v5, %v2057_v12 }
 0x30d   : > { %v2292_v52 = vsel %vm2291_vm11, %v4894_v50, %v2288_v41 }
 0x30e   : > { %v2297_v27 = vsel %vm2294_vm12, %v2296_v24, %v2292_v52  ;;  %v4898_v3 = vpop.eup %4897 }
 0x30f   : > { %v5985_v9 = vmul.f32 %v2297_v27, %v5941_v16  ;;  %v2300_v29 = vmul.f32 %v4898_v3, %v2235_v49  ;;  %v2310_v16 = vand.u32 2147483648, %v2235_v49  ;;  %vm2305_vm13 = vweird.f32 %v4898_v3 }
 0x310   : > { %vm2306_vm15 = vmor %vm2304_vm14, %vm2305_vm13  ;;  %v2138_v49 = vmul.f32 %v5807_v37, %v2129_v57  ;;  %v2013_v27 = vadd.f32 %v2005_v0, %v1979_v4 }
 0x311   : > { %4686 = vmatmul.msk.f32.gmra.mxu3 %vm1128_vm1, %v5985_v9  ;;  %3255 = vst.msk [vmem:[#allocation2 + $0x28] sm:$0xff] %vm1128_vm1, %v5985_v9  ;;  %4694 = vmatmul.msk.f32.gmra.mxu0 %vm1128_vm1, %v5985_v9  ;;  %v2301_v53 = vsub.f32 1.0, %v2300_v29  ;;  %v2311_v2 = vor.u32 1.1754944e-38, %v2310_v16 }
 0x312   : > { %v2146_v47 = vadd.f32 %v2138_v49, %v2119_v61  ;;  %v5024_v49 = vld [vmem:[%s5117_s13 + $0x38] sm:$0xff] }
 0x313   : > { %v2302_v11 = vmul.f32 %v4898_v3, %v2301_v53 }
 0x314   : > { %v2165_v31 = vadd.f32 %v2157_v10, %v2146_v47  ;;  %v2006_v47 = vmul.f32 %v5781_v20, %v1997_v40 }
 0x315   : > { %v2303_v50 = vadd.f32 %v4898_v3, %v2302_v11 }
 0x317   : > { %v2307_v56 = vsel %vm2306_vm15, %v4898_v3, %v2303_v50  ;;  %v5023_v50 = vld [vmem:[%s5112_s9 + $0x38] sm:$0xff] }
 0x323   : > { %v1944_v6 = vpop.f32.mrf.mxu2 }
 0x324   : > { %v1945_v14 = vadd.f32 %v5770_v39, %v1944_v6  ;;  %v2312_v39 = vsel %vm2309_vm0, %v2311_v2, %v2307_v56  ;;  %v1971_v2 = vmul.f32 %v5023_v50, %v1963_v46 }
 0x325   : > { %v6006_v41 = vmul.f32 %v2312_v39, %v5960_v33  ;;  %v2039_v33 = vmul.f32 %v5787_v18, %v2030_v1 }
 0x326   : > { %1954 = vst.msk [vmem:[#allocation2 + $0x48] sm:$0xff] %vm1128_vm1, %v1945_v14 }
 0x327   : > { %4687 = vmatmul.msk.f32.gmra.mxu3 %vm1128_vm1, %v6006_v41  ;;  %3256 = vst.msk [vmem:[#allocation2 + $0x30] sm:$0xff] %vm1128_vm1, %v6006_v41  ;;  %4695 = vmatmul.msk.f32.gmra.mxu0 %vm1128_vm1, %v6006_v41  ;;  %v2047_v58 = vadd.f32 %v2039_v33, %v2013_v27 }
 0x329   : > { %v2074_v32 = vadd.f32 %v2066_v55, %v2047_v58 }
 0x32b   : > { %v2093_v14 = vadd.f32 %v2085_v34, %v2074_v32 }
 0x32d   : > { %v2023_v24 = vld [vmem:[#allocation2 + $0x41] sm:$0xff]  ;;  %v2096_v11 = vld [vmem:[#allocation2 + $0x49] sm:$0xff] }
 0x32e   : > { %v2175_v52 = vmul.f32 %v5975_v35, %v2023_v24  ;;  %v2050_v16 = vld [vmem:[#allocation2 + $0x47] sm:$0xff]  ;;  %v2103_v35 = vmul.f32 %v5022_v22, %v2023_v24  ;;  %v2176_v30 = vmul.f32 %v5022_v22, %v2096_v11  ;;  %v2031_v4 = vmul.f32 %v5024_v49, %v2023_v24  ;;  %v2123_v12 = vld [vmem:[#allocation2 + $0x4f] sm:$0xff] }
 0x32f   : > { %v2130_v48 = vmul.f32 %v5021_v36, %v2050_v16  ;;  %v2077_v19 = vld [vmem:[#allocation2 + $0x48] sm:$0xff]  ;;  %v1980_v36 = vmul.f32 %v5778_v45, %v1971_v2  ;;  %v2058_v46 = vmul.f32 %v5023_v50, %v2050_v16  ;;  %v2104_v24 = vmul.f32 %v5024_v49, %v2096_v11 }
 0x330   : > { %v2184_v3 = vmul.f32 %v5821_v59, %v2175_v52  ;;  %v2112_v44 = vmul.f32 %v5801_v13, %v2103_v35  ;;  %v2158_v39 = vmul.f32 %v5816_v15, %v2077_v19  ;;  %v2185_v1 = vmul.f32 %v5821_v59, %v2176_v30  ;;  %v2150_v35 = vld [vmem:[#allocation2 + $0x50] sm:$0xff] }
 0x331   : > { %v2139_v57 = vmul.f32 %v5807_v37, %v2130_v48  ;;  %v2040_v52 = vmul.f32 %v5787_v18, %v2031_v4  ;;  %v2014_v27 = vadd.f32 %v2006_v47, %v1980_v36  ;;  %v2067_v45 = vmul.f32 %v5793_v5, %v2058_v46  ;;  %v2169_v48 = vld [vmem:[#allocation2 + $0x51] sm:$0xff] }
 0x332   : > { %v2192_v29 = vadd.f32 %v2184_v3, %v2165_v31  ;;  %v2120_v51 = vadd.f32 %v2112_v44, %v2093_v14  ;;  %v2086_v58 = vmul.f32 %v5797_v26, %v2077_v19  ;;  %v2113_v18 = vmul.f32 %v5801_v13, %v2104_v24  ;;  %v2710_v24 = vld [vmem:[%s7799_s7 + $0x8] sm:$0xff] }
 0x333   : > { %v2048_v3 = vadd.f32 %v2040_v52, %v2014_v27  ;;  %v2177_v5 = vmul.f32 %v5024_v49, %v2169_v48  ;;  %2848 = vmatpush.msrb.mxu2 %v2710_v24  ;;  %2759 = vmatpush.msra.mxu1 %v2710_v24 }
 0x334   : > { %v6024_v63 = vadd.f32 %v5826_v7, %v2192_v29  ;;  %v2147_v56 = vadd.f32 %v2139_v57, %v2120_v51  ;;  %v2131_v29 = vmul.f32 %v5023_v50, %v2123_v12 }
 0x335   : > { %v2075_v40 = vadd.f32 %v2067_v45, %v2048_v3  ;;  %v2186_v44 = vmul.f32 %v5821_v59, %v2177_v5  ;;  %v6069_v5 = vld [vmem:[%s7803_s16] ss:$0 sm:$0xff]  ;;  %s7872_s16 = sld [smem:[#allocation17_spill]] }
 0x336   : > { %v2212_v53 = vsub.f32 0.0, %v6024_v63  ;;  %v2166_v61 = vadd.f32 %v2158_v39, %v2147_v56  ;;  %v2140_v34 = vmul.f32 %v5807_v37, %v2131_v29 }
 0x337   : > { %v2094_v55 = vadd.f32 %v2086_v58, %v2075_v40 }
 0x338   : > { %v2225_v6 = vmul.f32 1.442695, %v2212_v53  ;;  %v2193_v33 = vadd.f32 %v2185_v1, %v2166_v61 }
 0x339   : > { %v2121_v16 = vadd.f32 %v2113_v18, %v2094_v55  ;;  %v2485_v18 = vld [vmem:[%s7801_s11] sm:$0xff] }
 0x33a   : > { %4899 = vpow2.f32 %v2225_v6  ;;  %v6038_v22 = vadd.f32 %v5826_v7, %v2193_v33  ;;  %v2159_v6 = vmul.f32 %v5816_v15, %v2150_v35 }
 0x33b   : > { %v2148_v14 = vadd.f32 %v2140_v34, %v2121_v16  ;;  %v2493_v34 = vld [vmem:[%s7802_s15] sm:$0xff] }
 0x33c   : > { %v2213_v31 = vsub.f32 0.0, %v6038_v22 }
 0x33d   : > { %v2167_v13 = vadd.f32 %v2159_v6, %v2148_v14 }
 0x33e   : > { %v2227_v20 = vmul.f32 1.442695, %v2213_v31 }
 0x33f   : > { %v2194_v30 = vadd.f32 %v2186_v44, %v2167_v13  ;;  %v2709_v44 = vld [vmem:[%s7799_s7] sm:$0xff] }
 0x340   : > { %v4900_v0 = vpop.eup %4899  ;;  %2849 = vmatpush.msrb.mxu2 %v2709_v44  ;;  %2760 = vmatpush.msra.mxu1 %v2709_v44 }
 0x341   : > { %v2236_v10 = vadd.f32 1.0, %v4900_v0  ;;  %v2206_v15 = vadd.f32 %v5826_v7, %v2194_v30 }
 0x343   : > { %4901 = vrcp.f32 %v2236_v10  ;;  %v2325_v26 = vand.u32 2147483648, %v2236_v10  ;;  %v2323_v2 = vand.u32 2147483647, %v2236_v10  ;;  %vm2319_vm3 = vweird.f32 %v2236_v10 }
 0x344   : > { %4903 = vpow2.f32 %v2227_v20  ;;  %v2214_v59 = vsub.f32 0.0, %v2206_v15  ;;  %v6063_v20 = vld [vmem:[%s7800_s10] ss:$0 sm:$0xff]  ;;  %s7841_s10 = sld [smem:[#allocation15_spill]] }
 0x345   : > { %v2326_v37 = vor.u32 1.1754944e-38, %v2325_v26  ;;  %vm2324_vm5 = vcmp.eq.f32.partialorder %v2323_v2, 8.507059e+37 }
 0x346   : > { %v2229_v1 = vmul.f32 1.442695, %v2214_v59  ;;  %v2494_v59 = vld [vmem:[%s7802_s15 + $0x8] sm:$0xff] }
 0x349   : > { %v4902_v32 = vpop.eup %4901 }
 0x34a   : > { %v2315_v53 = vmul.f32 %v4902_v32, %v2236_v10  ;;  %v4904_v19 = vpop.eup %4903  ;;  %vm2320_vm2 = vweird.f32 %v4902_v32 }
 0x34b   : > { %v2237_v51 = vadd.f32 1.0, %v4904_v19  ;;  %vm2321_vm4 = vmor %vm2319_vm3, %vm2320_vm2 }
 0x34c   : > { %v2316_v11 = vsub.f32 1.0, %v2315_v53 }
 0x34d   : > { %4905 = vrcp.f32 %v2237_v51  ;;  %v2340_v7 = vand.u32 2147483648, %v2237_v51  ;;  %vm2334_vm7 = vweird.f32 %v2237_v51 }
 0x34e   : > { %v2317_v50 = vmul.f32 %v4902_v32, %v2316_v11  ;;  %4907 = vpow2.f32 %v2229_v1  ;;  %v2565_v11 = vld [vmem:[#allocation4] sm:$0xff]  ;;  %v5097_v1 = vmov 0.0  }
 0x34f   : > { %v2341_v46 = vor.u32 1.1754944e-38, %v2340_v7 }
 0x350   : > { %v2318_v57 = vadd.f32 %v4902_v32, %v2317_v50 }
 0x352   : > { %v2322_v56 = vsel %vm2321_vm4, %v4902_v32, %v2318_v57 }
 0x353   : > { %v2327_v39 = vsel %vm2324_vm5, %v2326_v37, %v2322_v56  ;;  %v4906_v36 = vpop.eup %4905  ;;  %v2486_v56 = vld [vmem:[%s7801_s11 + $0x8] sm:$0xff] }
 0x354   : > { %v6049_v61 = vmul.f32 %v2327_v39, %v6024_v63  ;;  %v2330_v49 = vmul.f32 %v4906_v36, %v2237_v51  ;;  %vm2335_vm6 = vweird.f32 %v4906_v36  ;;  %v2338_v63 = vand.u32 2147483647, %v2237_v51  ;;  %v4908_v47 = vpop.eup %4907  ;;  %v2533_v51 = vld [vmem:[#allocation3] sm:$0xff] }
 0x355   : > { %vm2336_vm8 = vmor %vm2334_vm7, %vm2335_vm6  ;;  %v2238_v10 = vadd.f32 1.0, %v4908_v47 }
 0x356   : > { %4688 = vmatmul.msk.f32.gmra.mxu3 %vm1128_vm1, %v6049_v61  ;;  %3257 = vst.msk [vmem:[#allocation2 + $0x38] sm:$0xff] %vm1128_vm1, %v6049_v61  ;;  %4696 = vmatmul.msk.f32.gmra.mxu0 %vm1128_vm1, %v6049_v61  ;;  %v2331_v4 = vsub.f32 1.0, %v2330_v49  ;;  %vm2339_vm9 = vcmp.eq.f32.partialorder %v2338_v63, 8.507059e+37 }
 0x357   : > { %4909 = vrcp.f32 %v2238_v10  ;;  %v2355_v58 = vand.u32 2147483648, %v2238_v10  ;;  %vm2349_vm11 = vweird.f32 %v2238_v10 }
 0x358   : > { %v2332_v0 = vmul.f32 %v4906_v36, %v2331_v4 }
 0x359   : > { %v2356_v32 = vor.u32 1.1754944e-38, %v2355_v58 }
 0x35a   : > { %v2333_v33 = vadd.f32 %v4906_v36, %v2332_v0 }
 0x35c   : > { %v2337_v52 = vsel %vm2336_vm8, %v4906_v36, %v2333_v33 }
 0x35d   : > { %v2342_v27 = vsel %vm2339_vm9, %v2341_v46, %v2337_v52  ;;  %v4910_v31 = vpop.eup %4909 }
 0x35e   : > { %v2365_v12 = vmul.f32 %v2342_v27, %v6038_v22  ;;  %v2345_v3 = vmul.f32 %v4910_v31, %v2238_v10  ;;  %vm2350_vm10 = vweird.f32 %v4910_v31  ;;  %v2353_v22 = vand.u32 2147483647, %v2238_v10 }
 0x35f   : > { %vm2351_vm12 = vmor %vm2349_vm11, %vm2350_vm10 }
 0x360   : > { %4689 = vmatmul.msk.f32.gmra.mxu3 %vm1128_vm1, %v2365_v12  ;;  %3258 = vst.msk [vmem:[#allocation2 + $0x40] sm:$0xff] %vm1128_vm1, %v2365_v12  ;;  %4697 = vmatmul.msk.f32.gmra.mxu0 %vm1128_vm1, %v2365_v12  ;;  %v2346_v45 = vsub.f32 1.0, %v2345_v3  ;;  %vm2354_vm13 = vcmp.eq.f32.partialorder %v2353_v22, 8.507059e+37 }
 0x362   : > { %v2347_v40 = vmul.f32 %v4910_v31, %v2346_v45 }
 0x364   : > { %v2348_v29 = vadd.f32 %v4910_v31, %v2347_v40 }
 0x366   : > { %v2461_v55 = vpop.f32.mrf.mxu0  ;;  %v2352_v16 = vsel %vm2351_vm12, %v4910_v31, %v2348_v29 }
 0x367   : > { %v2462_v53 = vadd.f32 %v6063_v20, %v2461_v55  ;;  %v2357_v35 = vsel %vm2354_vm13, %v2356_v32, %v2352_v16  ;;  %v2487_v55 = vld [vmem:[%s7801_s11 + $0x10] sm:$0xff] }
 0x368   : > { %v2366_v6 = vmul.f32 %v2357_v35, %v2206_v15 }
 0x369   : > { %v2517_v48 = vmul.f32 %v2485_v18, %v2462_v53 }
 0x36a   : > { %3160 = vmatpush.msra.mxu0 %v2366_v6  ;;  %3259 = vst.msk [vmem:[#allocation2 + $0x48] sm:$0xff] %vm1128_vm1, %v2366_v6  ;;  %4690 = vmatmul.msk.f32.gmra.mxu3 %vm1128_vm1, %v2366_v6 }
 0x36b   : > { %v2525_v14 = vadd.f32 %v2517_v48, %v2493_v34  ;;  %4698 = vmatmul.msk.f32.gmra.mxu0 %vm1128_vm1, %v2366_v6  ;;  %v2495_v48 = vld [vmem:[%s7802_s15 + $0x10] sm:$0xff] }
 0x36c   : > { %v2414_v26 = vpop.f32.mrf.mxu3  ;;  %3161 = vmatpush.msra.mxu0 %v2365_v12  ;;  %v2534_v12 = vld [vmem:[#allocation3 + $0x8] sm:$0xff] }
 0x36d   : > { %v2573_v19 = vsub.f32 %v2525_v14, %v2565_v11  ;;  %v2415_v50 = vadd.f32 %v6069_v5, %v2414_v26  ;;  %v2567_v14 = vld [vmem:[#allocation4 + $0x10] sm:$0xff] }
 0x36e   : > { %3162 = vmatpush.msra.mxu0 %v6049_v61 }
 0x36f   : > { %v2581_v2 = vmul.f32 0.5, %v2573_v19  ;;  %v2501_v13 = vmul.f32 %v2485_v18, %v2415_v50 }
 0x370   : > { %3163 = vmatpush.msra.mxu0 %v6006_v41  ;;  %v2464_v37 = vpop.f32.mrf.mxu0  ;;  %v2566_v41 = vld [vmem:[#allocation4 + $0x8] sm:$0xff] }
 0x371   : > { %v2589_v57 = vadd.f32 %v2581_v2, %v2565_v11  ;;  %v2509_v30 = vadd.f32 %v2501_v13, %v2493_v34  ;;  %v2465_v39 = vadd.f32 %v6063_v20, %v2464_v37  ;;  %v2535_v37 = vld [vmem:[#allocation3 + $0x10] sm:$0xff] }
 0x372   : > { %3164 = vmatpush.msra.mxu0 %v5985_v9 }
 0x373   : > { %v2541_v15 = vsub.f32 %v2509_v30, %v2533_v51  ;;  %vm2613_vm14 = vcmp.ge.f32.partialorder %v2589_v57, 1.0  ;;  %v2518_v4 = vmul.f32 %v2486_v56, %v2465_v39 }
 0x374   : > { %v2621_v36 = vsel %vm2613_vm14, 1.0, %v5097_v1  ;;  %3165 = vmatpush.msra.mxu0 %v5964_v62 }
 0x375   : > { %v2549_v49 = vmul.f32 0.5, %v2541_v15  ;;  %v2653_v61 = vsub.f32 1.0, %v2621_v36  ;;  %v6084_v7 = vadd.f32 1.0, %v2621_v36  ;;  %v2526_v63 = vadd.f32 %v2518_v4, %v2494_v59 }
 0x376   : > { %3166 = vmatpush.msra.mxu0 %v5934_v21  ;;  %v2417_v9 = vpop.f32.mrf.mxu3 }
 0x377   : > { %v2557_v0 = vadd.f32 %v2549_v49, %v2533_v51  ;;  %v2661_v47 = vmul.f32 %v2653_v61, %v2589_v57  ;;  %4707 = vmatmul.msk.f32.vlgmr.msrb.gmra.mxu2 %vm1128_vm1, %v6084_v7  ;;  %v2574_v33 = vsub.f32 %v2526_v63, %v2566_v41  ;;  %v2418_v46 = vadd.f32 %v6069_v5, %v2417_v9 }
 0x378   : > { %3167 = vmatpush.msra.mxu0 %v5897_v43  ;;  %v2891_v32 = vsel %vm1128_vm1, %v6084_v7, 0.0 }
 0x379   : > { %vm2597_vm15 = vcmp.ge.f32.partialorder %v2557_v0, 1.0  ;;  %2669 = vst.msk [vmem:[#allocation4] sm:$0xff] %vm1128_vm1, %v2661_v47  ;;  %v2582_v52 = vmul.f32 0.5, %v2574_v33  ;;  %v2502_v27 = vmul.f32 %v2486_v56, %v2418_v46  ;;  %v2496_v33 = vld [vmem:[%s7802_s15 + $0x18] sm:$0xff] }
 0x37a   : > { %v2605_v62 = vsel %vm2597_vm15, 1.0, %v5097_v1  ;;  %v2467_v29 = vpop.f32.mrf.mxu0 }
 0x37b   : > { %v2629_v10 = vsub.f32 1.0, %v2605_v62  ;;  %v6093_v21 = vadd.f32 1.0, %v2605_v62  ;;  %v2510_v3 = vadd.f32 %v2502_v27, %v2494_v59  ;;  %v2590_v45 = vadd.f32 %v2582_v52, %v2566_v41  ;;  %v2488_v41 = vld [vmem:[%s7801_s11 + $0x18] sm:$0xff] }
 0x37c   : > { %v2468_v34 = vadd.f32 %v6063_v20, %v2467_v29  ;;  %v2536_v29 = vld [vmem:[#allocation3 + $0x18] sm:$0xff] }
 0x37d   : > { %v2637_v31 = vmul.f32 %v2629_v10, %v2557_v0  ;;  %4699 = vmatmul.msk.f32.vlgmr.msra.gmra.mxu1 %vm1128_vm1, %v6093_v21  ;;  %v2542_v43 = vsub.f32 %v2510_v3, %v2534_v12  ;;  %vm2614_vm0 = vcmp.ge.f32.partialorder %v2590_v45, 1.0  ;;  %v2568_v10 = vld [vmem:[#allocation4 + $0x18] sm:$0xff] }
 0x37e   : > { %v2622_v24 = vsel %vm2614_vm0, 1.0, %v5097_v1  ;;  %v2519_v6 = vmul.f32 %v2487_v55, %v2468_v34  ;;  %vm3145_vm0 = vcmask 523264  }
 0x37f   : > { %2645 = vst.msk [vmem:[#allocation3] sm:$0xff] %vm1128_vm1, %v2637_v31  ;;  %v2550_v58 = vmul.f32 0.5, %v2542_v43  ;;  %v2654_v40 = vsub.f32 1.0, %v2622_v24  ;;  %v6099_v22 = vadd.f32 1.0, %v2622_v24 }
 0x380   : > { %v2527_v19 = vadd.f32 %v2519_v6, %v2495_v48  ;;  %v2420_v50 = vpop.f32.mrf.mxu3 }
 0x381   : > { %v2662_v18 = vmul.f32 %v2654_v40, %v2590_v45  ;;  %4708 = vmatmul.msk.f32.gmra.mxu2 %vm1128_vm1, %v6099_v22  ;;  %v2892_v53 = vsel %vm1128_vm1, %v6099_v22, 0.0  ;;  %v2558_v16 = vadd.f32 %v2550_v58, %v2534_v12  ;;  %v2421_v51 = vadd.f32 %v6069_v5, %v2420_v50 }
 0x382   : > { %v2893_v35 = vadd.f32 %v2892_v53, %v2891_v32  ;;  %v2575_v13 = vsub.f32 %v2527_v19, %v2567_v14  ;;  %v2489_v53 = vld [vmem:[%s7801_s11 + $0x20] sm:$0xff] }
 0x383   : > { %2670 = vst.msk [vmem:[#allocation4 + $0x8] sm:$0xff] %vm1128_vm1, %v2662_v18  ;;  %vm2598_vm2 = vcmp.ge.f32.partialorder %v2558_v16, 1.0  ;;  %v2503_v30 = vmul.f32 %v2487_v55, %v2421_v51  ;;  %v2569_v19 = vld [vmem:[#allocation4 + $0x20] sm:$0xff] }
 0x384   : > { %v2606_v11 = vsel %vm2598_vm2, 1.0, %v5097_v1  ;;  %v2583_v57 = vmul.f32 0.5, %v2575_v13 }
 0x385   : > { %v2630_v26 = vsub.f32 1.0, %v2606_v11  ;;  %v6112_v44 = vadd.f32 1.0, %v2606_v11  ;;  %v2511_v56 = vadd.f32 %v2503_v30, %v2495_v48 }
 0x386   : > { %v2591_v15 = vadd.f32 %v2583_v57, %v2567_v14 }
 0x387   : > { %v2638_v2 = vmul.f32 %v2630_v26, %v2558_v16  ;;  %4700 = vmatmul.msk.f32.gmra.mxu1 %vm1128_vm1, %v6112_v44  ;;  %v2543_v39 = vsub.f32 %v2511_v56, %v2535_v37 }
 0x388   : > { %vm2615_vm3 = vcmp.ge.f32.partialorder %v2591_v15, 1.0 }
 0x389   : > { %2646 = vst.msk [vmem:[#allocation3 + $0x8] sm:$0xff] %vm1128_vm1, %v2638_v2  ;;  %v2623_v59 = vsel %vm2615_vm3, 1.0, %v5097_v1  ;;  %v2551_v36 = vmul.f32 0.5, %v2543_v39 }
 0x38a   : > { %v2655_v49 = vsub.f32 1.0, %v2623_v59  ;;  %v6119_v4 = vadd.f32 1.0, %v2623_v59 }
 0x38b   : > { %v2559_v9 = vadd.f32 %v2551_v36, %v2535_v37 }
 0x38c   : > { %v2663_v63 = vmul.f32 %v2655_v49, %v2591_v15  ;;  %4709 = vmatmul.msk.f32.gmra.mxu2 %vm1128_vm1, %v6119_v4  ;;  %v2894_v47 = vsel %vm1128_vm1, %v6119_v4, 0.0 }
 0x38d   : > { %v2895_v46 = vadd.f32 %v2894_v47, %v2893_v35  ;;  %vm2599_vm4 = vcmp.ge.f32.partialorder %v2559_v9, 1.0  ;;  %v2497_v35 = vld [vmem:[%s7802_s15 + $0x20] sm:$0xff] }
 0x38e   : > { %v2470_v61 = vpop.f32.mrf.mxu0  ;;  %2671 = vst.msk [vmem:[#allocation4 + $0x10] sm:$0xff] %vm1128_vm1, %v2663_v63  ;;  %v2607_v52 = vsel %vm2599_vm4, 1.0, %v5097_v1 }
 0x38f   : > { %v2471_v0 = vadd.f32 %v6063_v20, %v2470_v61  ;;  %v2631_v12 = vsub.f32 1.0, %v2607_v52  ;;  %v6130_v31 = vadd.f32 1.0, %v2607_v52  ;;  %v2537_v61 = vld [vmem:[#allocation3 + $0x20] sm:$0xff] }
 0x391   : > { %v2520_v62 = vmul.f32 %v2488_v41, %v2471_v0  ;;  %v2639_v24 = vmul.f32 %v2631_v12, %v2559_v9  ;;  %4701 = vmatmul.msk.f32.gmra.mxu1 %vm1128_vm1, %v6130_v31 }
 0x393   : > { %v2528_v27 = vadd.f32 %v2520_v62, %v2496_v33  ;;  %2647 = vst.msk [vmem:[#allocation3 + $0x10] sm:$0xff] %vm1128_vm1, %v2639_v24 }
 0x394   : > { %v2423_v3 = vpop.f32.mrf.mxu3 }
 0x395   : > { %v2576_v45 = vsub.f32 %v2528_v27, %v2568_v10  ;;  %v2424_v43 = vadd.f32 %v6069_v5, %v2423_v3 }
 0x397   : > { %v2584_v58 = vmul.f32 0.5, %v2576_v45  ;;  %v2504_v40 = vmul.f32 %v2488_v41, %v2424_v43 }
 0x399   : > { %v2512_v55 = vadd.f32 %v2504_v40, %v2496_v33  ;;  %v2592_v18 = vadd.f32 %v2584_v58, %v2568_v10  ;;  %v6155_v33 = vpop.f32.mrf.mxu1 }
 0x39b   : > { %v2544_v16 = vsub.f32 %v2512_v55, %v2536_v29  ;;  %vm2616_vm5 = vcmp.ge.f32.partialorder %v2592_v18, 1.0 }
 0x39c   : > { %v2624_v48 = vsel %vm2616_vm5, 1.0, %v5097_v1 }
 0x39d   : > { %v2552_v6 = vmul.f32 0.5, %v2544_v16  ;;  %v2656_v14 = vsub.f32 1.0, %v2624_v48  ;;  %v6140_v26 = vadd.f32 1.0, %v2624_v48  ;;  %v2498_v16 = vld [vmem:[%s7802_s15 + $0x28] sm:$0xff] }
 0x39f   : > { %v2664_v2 = vmul.f32 %v2656_v14, %v2592_v18  ;;  %4710 = vmatmul.msk.f32.gmra.mxu2 %vm1128_vm1, %v6140_v26  ;;  %v2896_v13 = vsel %vm1128_vm1, %v6140_v26, 0.0  ;;  %v2560_v51 = vadd.f32 %v2552_v6, %v2536_v29  ;;  %v2490_v18 = vld [vmem:[%s7801_s11 + $0x28] sm:$0xff] }
 0x3a0   : > { %v2897_v30 = vadd.f32 %v2896_v13, %v2895_v46 }
 0x3a1   : > { %2672 = vst.msk [vmem:[#allocation4 + $0x18] sm:$0xff] %vm1128_vm1, %v2664_v2  ;;  %vm2600_vm6 = vcmp.ge.f32.partialorder %v2560_v51, 1.0  ;;  %v6171_v40 = vpop.f32.mrf.mxu1  ;;  %v2538_v2 = vld [vmem:[#allocation3 + $0x28] sm:$0xff] }
 0x3a2   : > { %v2608_v15 = vsel %vm2600_vm6, 1.0, %v5097_v1 }
 0x3a3   : > { %v2632_v36 = vsub.f32 1.0, %v2608_v15  ;;  %v6149_v49 = vadd.f32 1.0, %v2608_v15 }
 0x3a4   : > { %v2473_v32 = vpop.f32.mrf.mxu0 }
 0x3a5   : > { %v2474_v34 = vadd.f32 %v6063_v20, %v2473_v32  ;;  %v2640_v0 = vmul.f32 %v2632_v36, %v2560_v51  ;;  %4702 = vmatmul.msk.f32.gmra.mxu1 %vm1128_vm1, %v6149_v49 }
 0x3a7   : > { %v2521_v11 = vmul.f32 %v2489_v53, %v2474_v34  ;;  %2648 = vst.msk [vmem:[#allocation3 + $0x18] sm:$0xff] %vm1128_vm1, %v2640_v0 }
 0x3a9   : > { %v2529_v50 = vadd.f32 %v2521_v11, %v2497_v35  ;;  %v6174_v29 = vpop.f32.mrf.mxu1 }
 0x3aa   : > { %v2426_v57 = vpop.f32.mrf.mxu3 }
 0x3ab   : > { %v2577_v37 = vsub.f32 %v2529_v50, %v2569_v19  ;;  %v2427_v56 = vadd.f32 %v6069_v5, %v2426_v57 }
 0x3ad   : > { %v2585_v39 = vmul.f32 0.5, %v2577_v37  ;;  %v2505_v59 = vmul.f32 %v2489_v53, %v2427_v56  ;;  %v2491_v56 = vld [vmem:[%s7801_s11 + $0x30] sm:$0xff] }
 0x3af   : > { %v2513_v41 = vadd.f32 %v2505_v59, %v2497_v35  ;;  %v2593_v63 = vadd.f32 %v2585_v39, %v2569_v19  ;;  %v2570_v35 = vld [vmem:[#allocation4 + $0x28] sm:$0xff] }
 0x3b1   : > { %v2545_v47 = vsub.f32 %v2513_v41, %v2537_v61  ;;  %vm2617_vm7 = vcmp.ge.f32.partialorder %v2593_v63, 1.0  ;;  %v6178_v53 = vpop.f32.mrf.mxu1  ;;  %v2499_v41 = vld [vmem:[%s7802_s15 + $0x30] sm:$0xff] }
 0x3b2   : > { %v2625_v9 = vsel %vm2617_vm7, 1.0, %v5097_v1 }
 0x3b3   : > { %v2553_v46 = vmul.f32 0.5, %v2545_v47  ;;  %v2657_v62 = vsub.f32 1.0, %v2625_v9  ;;  %v6157_v10 = vadd.f32 1.0, %v2625_v9  ;;  %v2571_v9 = vld [vmem:[#allocation4 + $0x30] sm:$0xff] }
 0x3b5   : > { %v2665_v52 = vmul.f32 %v2657_v62, %v2593_v63  ;;  %4711 = vmatmul.msk.f32.gmra.mxu2 %vm1128_vm1, %v6157_v10  ;;  %v2898_v27 = vsel %vm1128_vm1, %v6157_v10, 0.0  ;;  %v2561_v12 = vadd.f32 %v2553_v46, %v2537_v61 }
 0x3b6   : > { %v6163_v3 = vadd.f32 %v2898_v27, %v2897_v30 }
 0x3b7   : > { %2673 = vst.msk [vmem:[#allocation4 + $0x20] sm:$0xff] %vm1128_vm1, %v2665_v52  ;;  %vm2601_vm8 = vcmp.ge.f32.partialorder %v2561_v12, 1.0 }
 0x3b8   : > { %v2609_v45 = vsel %vm2601_vm8, 1.0, %v5097_v1 }
 0x3b9   : > { %v2633_v43 = vsub.f32 1.0, %v2609_v45  ;;  %v6167_v24 = vadd.f32 1.0, %v2609_v45  ;;  %v6182_v57 = vpop.f32.mrf.mxu1 }
 0x3bb   : > { %v2641_v58 = vmul.f32 %v2633_v43, %v2561_v12  ;;  %4703 = vmatmul.msk.f32.gmra.mxu1 %vm1128_vm1, %v6167_v24 }
 0x3bd   : > { %2649 = vst.msk [vmem:[#allocation3 + $0x20] sm:$0xff] %vm1128_vm1, %v2641_v58 }
 0x3c1   : > { %v6197_v58 = vpop.f32.mrf.mxu1 }
 0x3d3   : > { %v2476_v55 = vpop.f32.mrf.mxu0 }
 0x3d4   : > { %v2477_v32 = vadd.f32 %v6063_v20, %v2476_v55 }
 0x3d6   : > { %v2522_v34 = vmul.f32 %v2490_v18, %v2477_v32 }
 0x3d8   : > { %v2530_v48 = vadd.f32 %v2522_v34, %v2498_v16 }
 0x3d9   : > { %v2429_v6 = vpop.f32.mrf.mxu3 }
 0x3da   : > { %v2578_v11 = vsub.f32 %v2530_v48, %v2570_v35  ;;  %v2430_v14 = vadd.f32 %v6069_v5, %v2429_v6 }
 0x3dc   : > { %v2586_v19 = vmul.f32 0.5, %v2578_v11  ;;  %v2506_v50 = vmul.f32 %v2490_v18, %v2430_v14 }
 0x3dd   : > { %v2479_v37 = vpop.f32.mrf.mxu0 }
 0x3de   : > { %v2514_v13 = vadd.f32 %v2506_v50, %v2498_v16  ;;  %v2594_v51 = vadd.f32 %v2586_v19, %v2570_v35  ;;  %v2480_v59 = vadd.f32 %v6063_v20, %v2479_v37  ;;  %v2539_v16 = vld [vmem:[#allocation3 + $0x30] sm:$0xff] }
 0x3e0   : > { %v2546_v30 = vsub.f32 %v2514_v13, %v2538_v2  ;;  %vm2618_vm9 = vcmp.ge.f32.partialorder %v2594_v51, 1.0  ;;  %v2523_v0 = vmul.f32 %v2491_v56, %v2480_v59  ;;  %v2572_v59 = vld [vmem:[#allocation4 + $0x38] sm:$0xff] }
 0x3e1   : > { %v2626_v15 = vsel %vm2618_vm9, 1.0, %v5097_v1 }
 0x3e2   : > { %v2554_v39 = vmul.f32 0.5, %v2546_v30  ;;  %v2658_v36 = vsub.f32 1.0, %v2626_v15  ;;  %v6187_v61 = vadd.f32 1.0, %v2626_v15  ;;  %v2531_v46 = vadd.f32 %v2523_v0, %v2499_v41  ;;  %v6208_v30 = vpop.f32.mrf.mxu1 }
 0x3e3   : > { %v2432_v62 = vpop.f32.mrf.mxu3  ;;  %v5098_v0 = vmov 64.0  }
 0x3e4   : > { %v2666_v63 = vmul.f32 %v2658_v36, %v2594_v51  ;;  %4712 = vmatmul.msk.f32.gmra.mxu2 %vm1128_vm1, %v6187_v61  ;;  %v2562_v47 = vadd.f32 %v2554_v39, %v2538_v2  ;;  %v2579_v27 = vsub.f32 %v2531_v46, %v2571_v9  ;;  %v2433_v12 = vadd.f32 %v6069_v5, %v2432_v62  ;;  %v2492_v2 = vld [vmem:[%s7801_s11 + $0x38] sm:$0xff] }
 0x3e5   : > { %4911 = vrcp.f32 %v5098_v0 }
 0x3e6   : > { %2674 = vst.msk [vmem:[#allocation4 + $0x28] sm:$0xff] %vm1128_vm1, %v2666_v63  ;;  %vm2602_vm10 = vcmp.ge.f32.partialorder %v2562_v47, 1.0  ;;  %v2587_v55 = vmul.f32 0.5, %v2579_v27  ;;  %v2507_v18 = vmul.f32 %v2491_v56, %v2433_v12  ;;  %v2500_v56 = vld [vmem:[%s7802_s15 + $0x38] sm:$0xff] }
 0x3e7   : > { %v2610_v52 = vsel %vm2602_vm10, 1.0, %v5097_v1 }
 0x3e8   : > { %v2634_v45 = vsub.f32 1.0, %v2610_v52  ;;  %v6195_v43 = vadd.f32 1.0, %v2610_v52  ;;  %v2515_v34 = vadd.f32 %v2507_v18, %v2499_v41  ;;  %v2595_v35 = vadd.f32 %v2587_v55, %v2571_v9  ;;  %v2482_v50 = vpop.f32.mrf.mxu0  ;;  %v6221_v52 = vld [vmem:[%s7804_s18 + $0x28] sm:$0xff] }
 0x3e9   : > { %v2483_v37 = vadd.f32 %v6063_v20, %v2482_v50 }
 0x3ea   : > { %v2642_v32 = vmul.f32 %v2634_v45, %v2562_v47  ;;  %4704 = vmatmul.msk.f32.gmra.mxu1 %vm1128_vm1, %v6195_v43  ;;  %v2547_v48 = vsub.f32 %v2515_v34, %v2539_v16  ;;  %vm2619_vm11 = vcmp.ge.f32.partialorder %v2595_v35, 1.0  ;;  %v6223_v27 = vpop.f32.mrf.mxu1  ;;  %v2540_v45 = vld [vmem:[#allocation3 + $0x38] sm:$0xff]  ;;  %v6227_v55 = vmul.f32 %v6221_v52, %v6195_v43 }
 0x3eb   : > { %v2627_v6 = vsel %vm2619_vm11, 1.0, %v5097_v1  ;;  %v2524_v15 = vmul.f32 %v2492_v2, %v2483_v37 }
 0x3ec   : > { %2650 = vst.msk [vmem:[#allocation3 + $0x28] sm:$0xff] %vm1128_vm1, %v2642_v32  ;;  %v2555_v11 = vmul.f32 0.5, %v2547_v48  ;;  %v2659_v14 = vsub.f32 1.0, %v2627_v6  ;;  %v6203_v19 = vadd.f32 1.0, %v2627_v6  ;;  %v2900_v32 = vsel %vm1128_vm1, %v6187_v61, 0.0  ;;  %v2693_v48 = vld [vmem:[%s7804_s18] sm:$0xff] }
 0x3ed   : > { %v2532_v63 = vadd.f32 %v2524_v15, %v2500_v56  ;;  %v2435_v47 = vpop.f32.mrf.mxu3  ;;  %v2802_v15 = vmul.f32 %v2693_v48, %v6084_v7 }
 0x3ee   : > { %v2667_v13 = vmul.f32 %v2659_v14, %v2595_v35  ;;  %4713 = vmatmul.msk.f32.gmra.mxu2 %vm1128_vm1, %v6203_v19  ;;  %v2563_v51 = vadd.f32 %v2555_v11, %v2539_v16  ;;  %v2436_v9 = vadd.f32 %v6069_v5, %v2435_v47  ;;  %v4912_v5 = vpop.eup %4911  ;;  %v2902_v35 = vsel %vm1128_vm1, %v6203_v19, 0.0 }
 0x3ef   : > { %v2580_v20 = vsub.f32 %v2532_v63, %v2572_v59  ;;  %v2913_v6 = vmul.f32 64.0, %v4912_v5  ;;  %v2901_v11 = vadd.f32 %v2900_v32, %v6163_v3  ;;  %vm2917_vm15 = vweird.f32 %v4912_v5 }
 0x3f0   : > { %2675 = vst.msk [vmem:[#allocation4 + $0x30] sm:$0xff] %vm1128_vm1, %v2667_v13  ;;  %vm2603_vm12 = vcmp.ge.f32.partialorder %v2563_v51, 1.0  ;;  %v2508_v62 = vmul.f32 %v2492_v2, %v2436_v9  ;;  %v2701_v2 = vld [vmem:[%s7805_s23] sm:$0xff]  ;;  %v6249_v9 = vld [vmem:[%s7806_s0 + $0x8] sm:$0xff] }
 0x3f1   : > { %v2611_v39 = vsel %vm2603_vm12, 1.0, %v5097_v1  ;;  %v2588_v12 = vmul.f32 0.5, %v2580_v20  ;;  %v2903_v37 = vadd.f32 %v2902_v35, %v2901_v11  ;;  %v2914_v47 = vsub.f32 1.0, %v2913_v6  ;;  %2966 = vmatpush.msrb.mxu3 %v6249_v9 }
 0x3f2   : > { %v2635_v36 = vsub.f32 1.0, %v2611_v39  ;;  %v6214_v41 = vadd.f32 1.0, %v2611_v39  ;;  %v2516_v18 = vadd.f32 %v2508_v62, %v2500_v56  ;;  %v2713_v56 = vmul.f32 %v2693_v48, %v6093_v21 }
 0x3f3   : > { %v2596_v16 = vadd.f32 %v2588_v12, %v2572_v59  ;;  %v6242_v59 = vld [vmem:[%s7804_s18 + $0x30] sm:$0xff]  ;;  %v2915_v35 = vmul.f32 %v4912_v5, %v2914_v47 }
 0x3f4   : > { %v2643_v46 = vmul.f32 %v2635_v36, %v2563_v51  ;;  %4705 = vmatmul.msk.f32.gmra.mxu1 %vm1128_vm1, %v6214_v41  ;;  %v2548_v34 = vsub.f32 %v2516_v18, %v2540_v45  ;;  %v6256_v7 = vmul.f32 %v6242_v59, %v6214_v41 }
 0x3f5   : > { %vm2620_vm13 = vcmp.ge.f32.partialorder %v2596_v16, 1.0 }
 0x3f6   : > { %2651 = vst.msk [vmem:[#allocation3 + $0x30] sm:$0xff] %vm1128_vm1, %v2643_v46  ;;  %v2556_v14 = vmul.f32 0.5, %v2548_v34  ;;  %v2628_v50 = vsel %vm2620_vm13, 1.0, %v5097_v1  ;;  %v6252_v46 = vld [vmem:[%s7806_s0] sm:$0xff]  ;;  %s7897_s0 = sld [smem:[#allocation20_spill]] }
 0x3f7   : > { %v2660_v13 = vsub.f32 1.0, %v2628_v50  ;;  %v6237_v51 = vadd.f32 1.0, %v2628_v50  ;;  %2967 = vmatpush.msrb.mxu3 %v6252_v46  ;;  %v2916_v50 = vadd.f32 %v4912_v5, %v2915_v35 }
 0x3f8   : > { %v2564_v39 = vadd.f32 %v2556_v14, %v2540_v45 }
 0x3f9   : > { %v2668_v3 = vmul.f32 %v2660_v13, %v2596_v16  ;;  %4714 = vmatmul.msk.f32.gmra.mxu2 %vm1128_vm1, %v6237_v51  ;;  %v2904_v63 = vsel %vm1128_vm1, %v6237_v51, 0.0 }
 0x3fa   : > { %v2762_v36 = vpop.f32.mrf.mxu1  ;;  %v2851_v0 = vpop.f32.mrf.mxu2  ;;  %v2905_v12 = vadd.f32 %v2904_v63, %v2903_v37  ;;  %vm2604_vm14 = vcmp.ge.f32.partialorder %v2564_v39, 1.0  ;;  %v2694_v37 = vld [vmem:[%s7804_s18 + $0x8] sm:$0xff] }
 0x3fb   : > { %v2786_v20 = vmul.f32 %v2762_v36, %v2701_v2  ;;  %v2875_v62 = vmul.f32 %v2851_v0, %v2701_v2  ;;  %2676 = vst.msk [vmem:[#allocation4 + $0x38] sm:$0xff] %vm1128_vm1, %v2668_v3  ;;  %v2612_v45 = vsel %vm2604_vm14, 1.0, %v5097_v1  ;;  %v6267_v1 = vld [vmem:[%s7804_s18 + $0x38] sm:$0xff]  ;;  %v2918_v36 = vsel %vm2917_vm15, %v4912_v5, %v2916_v50 }
 0x3fc   : > { %v2906_v32 = vrot.slane %v2905_v12, 4  ;;  %v2636_v34 = vsub.f32 1.0, %v2612_v45  ;;  %v2684_v48 = vadd.f32 1.0, %v2612_v45  ;;  %v2714_v47 = vmul.f32 %v2694_v37, %v6112_v44 }
 0x3fd   : > { %v6261_v18 = vadd.f32 %v2786_v20, %v2713_v56  ;;  %v2883_v16 = vadd.f32 %v2875_v62, %v2802_v15  ;;  %v2702_v56 = vld [vmem:[%s7805_s23 + $0x8] sm:$0xff] }
 0x3fe   : > { %v2907_v6 = vadd.f32 %v2906_v32, %v2905_v12  ;;  %v2644_v11 = vmul.f32 %v2636_v34, %v2564_v39  ;;  %4706 = vmatmul.msk.f32.gmra.mxu1 %vm1128_vm1, %v2684_v48  ;;  %v6270_v2 = vmul.f32 %v6267_v1, %v2684_v48  ;;  %v2803_v39 = vmul.f32 %v2694_v37, %v6099_v22 }
 0x3ff   : > { %3113 = vxpose.xlu1.b32.start [1/8] (short) (narrow) %v2883_v16, 16 }
 0x400   : > { %v2908_v14 = vrot.slane %v2907_v6, 2  ;;  %2652 = vst.msk [vmem:[#allocation3 + $0x38] sm:$0xff] %vm1128_vm1, %v2644_v11  ;;  %v2703_v11 = vld [vmem:[%s7805_s23 + $0x10] sm:$0xff] }
 0x402   : > { %v2909_v13 = vadd.f32 %v2908_v14, %v2907_v6  ;;  %v2695_v6 = vld [vmem:[%s7804_s18 + $0x10] sm:$0xff] }
 0x403   : > { %v2804_v37 = vmul.f32 %v2695_v6, %v6119_v4 }
 0x404   : > { %v2910_v15 = vrot.slane %v2909_v13, 1  ;;  %v2765_v0 = vpop.f32.mrf.mxu1  ;;  %v2854_v3 = vpop.f32.mrf.mxu2 }
 0x405   : > { %v2787_v20 = vmul.f32 %v2765_v0, %v2702_v56  ;;  %v2876_v62 = vmul.f32 %v2854_v3, %v2702_v56 }
 0x406   : > { %v2911_v63 = vadd.f32 %v2910_v15, %v2909_v13  ;;  %v2715_v13 = vmul.f32 %v2695_v6, %v6130_v31  ;;  %v2696_v15 = vld [vmem:[%s7804_s18 + $0x18] sm:$0xff] }
 0x407   : > { %v6276_v45 = vadd.f32 %v2787_v20, %v2714_v47  ;;  %v2884_v32 = vadd.f32 %v2876_v62, %v2803_v39  ;;  %v2716_v4 = vmul.f32 %v2696_v15, %v6149_v49 }
 0x408   : > { %v2919_v12 = vmul.f32 %v2918_v36, %v2911_v63  ;;  %v2704_v36 = vld [vmem:[%s7805_s23 + $0x18] sm:$0xff]  ;;  %v2805_v63 = vmul.f32 %v2696_v15, %v6140_v26 }
 0x409   : > { %3114 = vxpose.xlu1.b32.cont [2/8] (short) (narrow) %v2884_v32, 16  ;;  %v2697_v32 = vld [vmem:[%s7804_s18 + $0x20] sm:$0xff] }
 0x40a   : > { %v2920_v16 = vmul.f32 %v2919_v12, %v6093_v21  ;;  %v2925_v5 = vmul.f32 %v2919_v12, %v6195_v43  ;;  %v2926_v22 = vmul.f32 %v2919_v12, %v6214_v41  ;;  %v2927_v34 = vmul.f32 %v2919_v12, %v2684_v48 }
 0x40b   : > { %v2921_v35 = vmul.f32 %v2919_v12, %v6112_v44  ;;  %v2922_v48 = vmul.f32 %v2919_v12, %v6130_v31  ;;  %v2923_v44 = vmul.f32 %v2919_v12, %v6149_v49  ;;  %v2924_v62 = vmul.f32 %v2919_v12, %v6167_v24  ;;  %v2706_v12 = vld [vmem:[%s7805_s23 + $0x28] sm:$0xff] }
 0x40c   : > { %4715 = vmatmul.msk.f32.vlgmr.msrb.gmra.mxu3 %vm1128_vm1, %v2920_v16  ;;  %v2705_v16 = vld [vmem:[%s7805_s23 + $0x20] sm:$0xff]  ;;  %v2806_v49 = vmul.f32 %v2697_v32, %v6157_v10 }
 0x40e   : > { %v2768_v14 = vpop.f32.mrf.mxu1 }
 0x40f   : > { %v2857_v50 = vpop.f32.mrf.mxu2  ;;  %v2788_v21 = vmul.f32 %v2768_v14, %v2703_v11 }
 0x410   : > { %v2877_v56 = vmul.f32 %v2857_v50, %v2703_v11  ;;  %v2717_v11 = vmul.f32 %v2697_v32, %v6167_v24  ;;  %v2807_v24 = vmul.f32 %v6221_v52, %v6187_v61 }
 0x411   : > { %v6288_v43 = vadd.f32 %v2788_v21, %v2715_v13 }
 0x412   : > { %v2885_v41 = vadd.f32 %v2877_v56, %v2804_v37 }
 0x414   : > { %4716 = vmatmul.msk.f32.gmra.mxu3 %vm1128_vm1, %v2921_v35  ;;  %3115 = vxpose.xlu1.b32.cont [3/8] (short) (narrow) %v2885_v41, 16 }
 0x41c   : > { %4717 = vmatmul.msk.f32.gmra.mxu3 %vm1128_vm1, %v2922_v48 }
 0x422   : > { %v2771_v0 = vpop.f32.mrf.mxu1  ;;  %v2860_v39 = vpop.f32.mrf.mxu2 }
 0x423   : > { %v2789_v3 = vmul.f32 %v2771_v0, %v2704_v36  ;;  %v2878_v47 = vmul.f32 %v2860_v39, %v2704_v36 }
 0x424   : > { %4718 = vmatmul.msk.f32.gmra.mxu3 %vm1128_vm1, %v2923_v44 }
 0x425   : > { %v2797_v31 = vadd.f32 %v2789_v3, %v2716_v4  ;;  %v2886_v20 = vadd.f32 %v2878_v47, %v2805_v63  ;;  %v2708_v4 = vld [vmem:[%s7805_s23 + $0x38] sm:$0xff] }
 0x427   : > { %3116 = vxpose.xlu1.b32.cont [4/8] (short) (narrow) %v2886_v20, 16 }
 0x42c   : > { %4719 = vmatmul.msk.f32.gmra.mxu3 %vm1128_vm1, %v2924_v62 }
 0x434   : > { %4720 = vmatmul.msk.f32.gmra.mxu3 %vm1128_vm1, %v2925_v5  ;;  %v2707_v5 = vld [vmem:[%s7805_s23 + $0x30] sm:$0xff] }
 0x438   : > { %v2774_v35 = vpop.f32.mrf.mxu1  ;;  %v2863_v6 = vpop.f32.mrf.mxu2 }
 0x439   : > { %v2790_v14 = vmul.f32 %v2774_v35, %v2705_v16  ;;  %v2879_v50 = vmul.f32 %v2863_v6, %v2705_v16 }
 0x43b   : > { %v2798_v26 = vadd.f32 %v2790_v14, %v2717_v11  ;;  %v2887_v13 = vadd.f32 %v2879_v50, %v2806_v49 }
 0x43c   : > { %4721 = vmatmul.msk.f32.gmra.mxu3 %vm1128_vm1, %v2926_v22  ;;  %v2808_v22 = vmul.f32 %v6242_v59, %v6203_v19 }
 0x43d   : > { %3117 = vxpose.xlu1.b32.cont [5/8] (short) (narrow) %v2887_v13, 16 }
 0x444   : > { %4722 = vmatmul.msk.f32.gmra.mxu3 %vm1128_vm1, %v2927_v34 }
 0x467   : > { %v2777_v21 = vpop.f32.mrf.mxu1  ;;  %v2866_v37 = vpop.f32.mrf.mxu2 }
 0x468   : > { %v2791_v56 = vmul.f32 %v2777_v21, %v2706_v12  ;;  %v2880_v10 = vmul.f32 %v2866_v37, %v2706_v12 }
 0x46a   : > { %v2799_v41 = vadd.f32 %v2791_v56, %v6227_v55  ;;  %v2888_v48 = vadd.f32 %v2880_v10, %v2807_v24  ;;  %v2809_v55 = vmul.f32 %v6267_v1, %v6237_v51  ;;  %v6331_v1 = vld [vmem:[%s5147_s8] ss:$0 sm:$0xff] }
 0x46b   : > { %v6356_v14 = vadd.f32 %v6331_v1, %v6182_v57  ;;  %v6368_v37 = vadd.f32 %v6331_v1, %v6197_v58 }
 0x46c   : > { %3118 = vxpose.xlu1.b32.cont [6/8] (short) (narrow) %v2888_v48, 16 }
 0x46d   : > { %7807 = vst [vmem:[#allocation32_spill] sm:$0xff] %v6368_v37 }
 0x471   : > { %v2780_v44 = vpop.f32.mrf.mxu1  ;;  %v2869_v15 = vpop.f32.mrf.mxu2 }
 0x472   : > { %v2792_v36 = vmul.f32 %v2780_v44, %v2707_v5  ;;  %v2881_v34 = vmul.f32 %v2869_v15, %v2707_v5 }
 0x474   : > { %v2800_v0 = vadd.f32 %v2792_v36, %v6256_v7  ;;  %v2889_v39 = vadd.f32 %v2881_v34, %v2808_v22 }
 0x476   : > { %3119 = vxpose.xlu1.b32.cont [7/8] (short) (narrow) %v2889_v39, 16 }
 0x47b   : > { %v2783_v3 = vpop.f32.mrf.mxu1 }
 0x47c   : > { %v2872_v61 = vpop.f32.mrf.mxu2  ;;  %v2793_v52 = vmul.f32 %v2783_v3, %v2708_v4 }
 0x47d   : > { %v2882_v63 = vmul.f32 %v2872_v61, %v2708_v4  ;;  %v6395_v61 = vadd.f32 %v6331_v1, %v6208_v30 }
 0x47e   : > { %v2801_v47 = vadd.f32 %v2793_v52, %v6270_v2 }
 0x47f   : > { %v2890_v20 = vadd.f32 %v2882_v63, %v2809_v55  ;;  %7808 = vst [vmem:[#allocation33_spill] sm:$0xff] %v6395_v61 }
 0x481   : > { %3120 = vxpose.xlu1.b32.end [8/8] (short) (narrow) %v2890_v20, 16 }
 0x4ed   : > { %v3129_v62 = vpop.trf.xlu1 }
 0x4ee   : > { %4723 = vmatmul.msk.f32.vlgmr.msra.gmra.mxu0 %vm3145_vm0, %v3129_v62 }
 0x4f5   : > { %v3130_v19 = vpop.trf.xlu1 }
 0x4f6   : > { %4724 = vmatmul.msk.f32.gmra.mxu0 %vm3145_vm0, %v3130_v19 }
 0x56b   : > { %v3169_v59 = vpop.f32.mrf.mxu0 }
 0x56c   : > { %v3175_v32 = vmul.f32 0.015625, %v3169_v59 }
 0x56e   : > { %v3177_v51 = vmul.f32 %v3175_v32, %v6252_v46  ;;  %v6339_v46 = vadd.f32 %v6331_v1, %v6171_v40 }
 0x570   : > { %v1741_v2 = vsub.f32 0.0, %v6339_v46 }
 0x573   : > { %v3172_v7 = vpop.f32.mrf.mxu0 }
 0x574   : > { %v3176_v16 = vmul.f32 0.015625, %v3172_v7  ;;  %v1746_v7 = vsub.f32 0.0, %v6395_v61 }
 0x576   : > { %v3178_v35 = vmul.f32 %v3176_v16, %v6249_v9  ;;  %v6335_v9 = vadd.f32 %v6331_v1, %v6155_v33  ;;  %v6351_v33 = vadd.f32 %v6331_v1, %v6178_v53 }
 0x578   : > { %3217 = vmatpush.msrb.mxu1 %v3178_v35  ;;  %v1743_v11 = vsub.f32 0.0, %v6351_v33 }
 0x57a   : > { %3218 = vmatpush.msrb.mxu1 %v3177_v51  ;;  %v1754_v49 = vmul.f32 1.442695, %v1743_v11 }
 0x57b   : > { %4725 = vmatmul.msk.f32.vlgmr.msrb.gmra.mxu1 %vm1128_vm1, %v6261_v18  ;;  %v1740_v18 = vsub.f32 0.0, %v6335_v9 }
 0x583   : > { %4726 = vmatmul.msk.f32.gmra.mxu1 %vm1128_vm1, %v6276_v45  ;;  %v6345_v45 = vadd.f32 %v6331_v1, %v6174_v29 }
 0x585   : > { %v1742_v6 = vsub.f32 0.0, %v6345_v45 }
 0x587   : > { %v1752_v40 = vmul.f32 1.442695, %v1742_v6  ;;  %v3261_v6 = vld [vmem:[#allocation2 + $0x7] sm:$0xff] }
 0x58b   : > { %4727 = vmatmul.msk.f32.gmra.mxu1 %vm1128_vm1, %v6288_v43  ;;  %v1748_v43 = vmul.f32 1.442695, %v1740_v18 }
 0x58d   : > { %4913 = vpow2.f32 %v1748_v43 }
 0x593   : > { %4728 = vmatmul.msk.f32.gmra.mxu1 %vm1128_vm1, %v2797_v31  ;;  %v1750_v31 = vmul.f32 1.442695, %v1741_v2  ;;  %v4914_v29 = vpop.eup %4913 }
 0x594   : > { %v1764_v13 = vadd.f32 1.0, %v4914_v29 }
 0x595   : > { %4915 = vpow2.f32 %v1750_v31 }
 0x596   : > { %4917 = vpow2.f32 %v1752_v40  ;;  %v1781_v62 = vand.u32 2147483647, %v1764_v13  ;;  %v1783_v59 = vand.u32 2147483648, %v1764_v13  ;;  %vm1777_vm4 = vweird.f32 %v1764_v13 }
 0x597   : > { %4919 = vpow2.f32 %v1754_v49 }
 0x598   : > { %4921 = vrcp.f32 %v1764_v13  ;;  %vm6417_vm6 = vcmp.eq.f32.partialorder %v1781_v62, 8.507059e+37  ;;  %v1784_v11 = vor.u32 1.1754944e-38, %v1783_v59 }
 0x59b   : > { %4729 = vmatmul.msk.f32.gmra.mxu1 %vm1128_vm1, %v2798_v26  ;;  %v4916_v50 = vpop.eup %4915  ;;  %v1744_v26 = vsub.f32 0.0, %v6356_v14 }
 0x59c   : > { %v6360_v53 = vadd.f32 1.0, %v4916_v50  ;;  %v4918_v21 = vpop.eup %4917  ;;  %v1760_v50 = vmul.f32 1.442695, %v1746_v7  ;;  %v6477_v7 = vld [vmem:[%s5117_s13] sm:$0xff] }
 0x59d   : > { %v1756_v12 = vmul.f32 1.442695, %v1744_v26  ;;  %v6364_v57 = vadd.f32 1.0, %v4918_v21  ;;  %v4920_v56 = vpop.eup %4919  ;;  %v6431_v26 = vpop.f32.mrf.mxu3  ;;  %7820 = vst [vmem:[#allocation36_spill] sm:$0xff] %v6477_v7 }
 0x59e   : > { %4923 = vrcp.f32 %v6360_v53  ;;  %v6370_v24 = vpop.eup %4921  ;;  %v6373_v10 = vadd.f32 1.0, %v4920_v56  ;;  %v1798_v35 = vand.u32 2147483648, %v6360_v53  ;;  %vm1792_vm7 = vweird.f32 %v6360_v53 }
 0x59f   : > { %4925 = vpow2.f32 %v1756_v12  ;;  %v1773_v44 = vmul.f32 %v6370_v24, %v1764_v13  ;;  %vm1778_vm2 = vweird.f32 %v6370_v24  ;;  %v1796_v31 = vand.u32 2147483647, %v6360_v53 }
 0x5a0   : > { %4927 = vrcp.f32 %v6364_v57  ;;  %vm6413_vm5 = vmor %vm1777_vm4, %vm1778_vm2  ;;  %v1813_v49 = vand.u32 2147483648, %v6364_v57  ;;  %v1799_v21 = vor.u32 1.1754944e-38, %v1798_v35  ;;  %vm1807_vm11 = vweird.f32 %v6364_v57  ;;  %v3322_v35 = vld [vmem:[#allocation2 + $0x11] sm:$0xff] }
 0x5a1   : > { %4929 = vrcp.f32 %v6373_v10  ;;  %v1774_v34 = vsub.f32 1.0, %v1773_v44  ;;  %v6450_v44 = vld [vmem:[%s7813_s26 + $0x1] ss:$0 sm:$0xff]  ;;  %vm1797_vm10 = vcmp.eq.f32.partialorder %v1796_v31, 8.507059e+37  ;;  %vm1822_vm15 = vweird.f32 %v6373_v10  ;;  %v6504_v31 = vld [vmem:[%s5112_s9 + $0x8] sm:$0xff] }
 0x5a2   : > { %7825 = vst [vmem:[#allocation37_spill] sm:$0xff] %v6504_v31 }
 0x5a3   : > { %4730 = vmatmul.msk.f32.gmra.mxu1 %vm1128_vm1, %v2799_v41  ;;  %v1745_v41 = vsub.f32 0.0, %v6368_v37  ;;  %v1775_v3 = vmul.f32 %v6370_v24, %v1774_v34  ;;  %v3321_v34 = vld [vmem:[#allocation2 + $0x9] sm:$0xff] }
 0x5a4   : > { %v6377_v48 = vpop.eup %4923 }
 0x5a5   : > { %v4926_v5 = vpop.eup %4925  ;;  %v1758_v58 = vmul.f32 1.442695, %v1745_v41  ;;  %v1788_v15 = vmul.f32 %v6377_v48, %v6360_v53  ;;  %v1776_v19 = vadd.f32 %v6370_v24, %v1775_v3  ;;  %vm1793_vm3 = vweird.f32 %v6377_v48 }
 0x5a6   : > { %v6383_v36 = vadd.f32 1.0, %v4926_v5  ;;  %v6385_v22 = vpop.eup %4927  ;;  %vm6426_vm8 = vmor %vm1792_vm7, %vm1793_vm3  ;;  %v6447_v5 = vld [vmem:[%s7813_s26] ss:$0 sm:$0xff]  ;;  %v1814_v3 = vor.u32 1.1754944e-38, %v1813_v49 }
 0x5a7   : > { %4931 = vpow2.f32 %v1758_v58  ;;  %v1803_v39 = vmul.f32 %v6385_v22, %v6364_v57  ;;  %v6390_v4 = vpop.eup %4929  ;;  %v1780_v40 = vsel %vm6413_vm5, %v6370_v24, %v1776_v19  ;;  %vm1808_vm9 = vweird.f32 %v6385_v22  ;;  %v6441_v24 = vld [vmem:[%s5112_s9] sm:$0xff] }
 0x5a8   : > { %4933 = vrcp.f32 %v6383_v36  ;;  %v1818_v63 = vmul.f32 %v6390_v4, %v6373_v10  ;;  %v6444_v41 = vmul.f32 %v6441_v24, %v3261_v6  ;;  %v1811_v58 = vand.u32 2147483647, %v6364_v57  ;;  %vm6460_vm12 = vmor %vm1807_vm11, %vm1808_vm9 }
 0x5a9   : > { %v1804_v55 = vsub.f32 1.0, %v1803_v39  ;;  %vm1823_vm13 = vweird.f32 %v6390_v4  ;;  %vm1837_vm5 = vweird.f32 %v6383_v36 }
 0x5aa   : > { %v1819_v16 = vsub.f32 1.0, %v1818_v63  ;;  %7816 = vst [vmem:[#allocation34_spill] sm:$0xff] %v6444_v41  ;;  %v1828_v63 = vand.u32 2147483648, %v6373_v10  ;;  %v3278_v19 = vmul.f32 %v6447_v5, %v6444_v41  ;;  %vm1812_vm14 = vcmp.eq.f32.partialorder %v1811_v58, 8.507059e+37  ;;  %vm6494_vm2 = vmor %vm1822_vm15, %vm1823_vm13 }
 0x5ab   : > { %4731 = vmatmul.msk.f32.gmra.mxu1 %vm1128_vm1, %v2800_v0  ;;  %v1789_v0 = vsub.f32 1.0, %v1788_v15  ;;  %v1805_v32 = vmul.f32 %v6385_v22, %v1804_v55  ;;  %v6456_v15 = vld [vmem:[#allocation2 + $0x8] sm:$0xff] }
 0x5ac   : > { %v1820_v12 = vmul.f32 %v6390_v4, %v1819_v16  ;;  %7817 = vst [vmem:[#allocation35_spill] sm:$0xff] %v6456_v15  ;;  %v3304_v59 = vmul.f32 %v6450_v44, %v6456_v15 }
 0x5ad   : > { %v1790_v52 = vmul.f32 %v6377_v48, %v1789_v0  ;;  %v1806_v53 = vadd.f32 %v6385_v22, %v1805_v32 }
 0x5ae   : > { %v1821_v55 = vadd.f32 %v6390_v4, %v1820_v12 }
 0x5af   : > { %v1791_v30 = vadd.f32 %v6377_v48, %v1790_v52  ;;  %v1826_v52 = vand.u32 2147483647, %v6373_v10  ;;  %v1810_v57 = vsel %vm6460_vm12, %v6385_v22, %v1806_v53  ;;  %v3329_v22 = vmul.f32 %v6477_v7, %v3321_v34  ;;  %v3296_v34 = vld [vmem:[#allocation2 + $0x10] sm:$0xff] }
 0x5b0   : > { %v1815_v2 = vsel %vm1812_vm14, %v1814_v3, %v1810_v57  ;;  %v1825_v6 = vsel %vm6494_vm2, %v6390_v4, %v1821_v55  ;;  %v3312_v53 = vadd.f32 %v3304_v59, %v3278_v19  ;;  %v6535_v3 = vld [vmem:[#allocation2 + $0x19] sm:$0xff]  ;;  %v6552_v19 = vld [vmem:[%s5112_s9 + $0x10] sm:$0xff] }
 0x5b1   : > { %v1795_v13 = vsel %vm6426_vm8, %v6377_v48, %v1791_v30  ;;  %v1785_v48 = vsel %vm6417_vm6, %v1784_v11, %v1780_v40  ;;  %v6481_v30 = vld [vmem:[%s7813_s26 + $0x2] ss:$0 sm:$0xff]  ;;  %vm6498_vm3 = vcmp.eq.f32.partialorder %v1826_v52, 8.507059e+37  ;;  %v1829_v40 = vor.u32 1.1754944e-38, %v1828_v63  ;;  %v6539_v52 = vld [vmem:[%s7813_s26 + $0x3] ss:$0 sm:$0xff] }
 0x5b2   : > { %v1800_v0 = vsel %vm1797_vm10, %v1799_v21, %v1795_v13  ;;  %v6484_v32 = vmul.f32 %v1785_v48, %v6335_v9  ;;  %v1843_v11 = vand.u32 2147483648, %v6383_v36  ;;  %v6515_v13 = vld [vmem:[#allocation2 + $0x17] sm:$0xff]  ;;  %v3338_v12 = vmul.f32 %v6481_v30, %v3329_v22  ;;  %v6519_v21 = vld [vmem:[%s5117_s13 + $0x8] sm:$0xff]  ;;  %7831 = vst [vmem:[#allocation39_spill] sm:$0xff] %v6552_v19  ;;  %v6622_v63 = vld [vmem:[#allocation2 + $0x20] sm:$0xff] }
 0x5b3   : > { %4732 = vmatmul.msk.f32.gmra.mxu1 %vm1128_vm1, %v2801_v47  ;;  %v4932_v47 = vpop.eup %4931  ;;  %v6487_v16 = vmul.f32 %v1800_v0, %v6339_v46  ;;  %v1841_v46 = vand.u32 2147483647, %v6383_v36  ;;  %7826 = vst [vmem:[#allocation38_spill] sm:$0xff] %v6519_v21  ;;  %v3330_v4 = vmul.f32 %v6519_v21, %v3322_v35  ;;  %v1830_v0 = vsel %vm6498_vm3, %v1829_v40, %v1825_v6  ;;  %v6567_v6 = vld [vmem:[%s7813_s26 + $0x4] ss:$0 sm:$0xff]  ;;  %v6570_v40 = vld [vmem:[%s5117_s13 + $0x10] sm:$0xff] }
 0x5b4   : > { %v6400_v20 = vpop.eup %4933  ;;  %v6411_v18 = vadd.f32 1.0, %v4932_v47  ;;  %v3262_v47 = vld [vmem:[#allocation2 + $0xf] sm:$0xff]  ;;  %v1844_v55 = vor.u32 1.1754944e-38, %v1843_v11  ;;  %v3305_v22 = vmul.f32 %v6450_v44, %v3296_v34  ;;  %v6562_v9 = vmul.f32 %v1830_v0, %v6351_v33  ;;  %7833 = vst [vmem:[#allocation41_spill] sm:$0xff] %v6570_v40  ;;  %v6580_v33 = vld [vmem:[%s7813_s26 + $0x5] ss:$0 sm:$0xff] }
 0x5b5   : > { %v1833_v51 = vmul.f32 %v6400_v20, %v6383_v36  ;;  %v3270_v10 = vmul.f32 %v6504_v31, %v3262_v47  ;;  %vm1838_vm4 = vweird.f32 %v6400_v20  ;;  %vm6531_vm6 = vcmp.eq.f32.partialorder %v1841_v46, 8.507059e+37 }
 0x5b6   : > { %4935 = vrcp.f32 %v6411_v18  ;;  %v1858_v58 = vand.u32 2147483648, %v6411_v18  ;;  %vm6544_vm7 = vmor %vm1837_vm5, %vm1838_vm4  ;;  %v3339_v43 = vmul.f32 %v6481_v30, %v3330_v4  ;;  %v3331_v11 = vmul.f32 %v6570_v40, %v6535_v3 }
 0x5b7   : > { %v1834_v56 = vsub.f32 1.0, %v1833_v51  ;;  %4937 = vpow2.f32 %v1760_v50  ;;  %v6513_v50 = vpop.f32.mrf.mxu3  ;;  %v3279_v36 = vmul.f32 %v6447_v5, %v3270_v10  ;;  %vm1852_vm9 = vweird.f32 %v6411_v18 }
 0x5b8   : > { %v6564_v10 = vor.u32 1.1754944e-38, %v1858_v58  ;;  %v3264_v58 = vld [vmem:[#allocation2 + $0x1f] sm:$0xff]  ;;  %v3386_v38 = vmul.f32 %v6567_v6, %v6622_v63 }
 0x5b9   : > { %v1835_v62 = vmul.f32 %v6400_v20, %v1834_v56  ;;  %v6523_v56 = vmul.f32 %v1815_v2, %v6345_v45  ;;  %v3356_v45 = vmul.f32 %v6441_v24, %v3262_v47  ;;  %v3271_v47 = vmul.f32 %v6552_v19, %v6515_v13 }
 0x5ba   : > { %v3346_v2 = vadd.f32 %v3338_v12, %v3312_v53  ;;  %7832 = vst [vmem:[#allocation40_spill] sm:$0xff] %v6564_v10  ;;  %v3313_v53 = vadd.f32 %v3305_v22, %v3279_v36  ;;  %v3357_v12 = vmul.f32 %v6504_v31, %v6515_v13 }
 0x5bb   : > { %v1836_v49 = vadd.f32 %v6400_v20, %v1835_v62  ;;  %v3280_v0 = vmul.f32 %v6447_v5, %v3271_v47  ;;  %v6601_v47 = vld [vmem:[#allocation2 + $0x21] sm:$0xff] }
 0x5bc   : > { %v6490_v51 = vpop.eup %4935  ;;  %v3347_v39 = vadd.f32 %v3339_v43, %v3313_v53  ;;  %v6611_v43 = vld [vmem:[%s5112_s9 + $0x18] sm:$0xff] }
 0x5bd   : > { %v4938_v29 = vpop.eup %4937  ;;  %v1848_v48 = vmul.f32 %v6490_v51, %v6411_v18  ;;  %v1840_v59 = vsel %vm6544_vm7, %v6400_v20, %v1836_v49  ;;  %vm1853_vm8 = vweird.f32 %v6490_v51  ;;  %v6575_v20 = vld [vmem:[#allocation2 + $0x18] sm:$0xff]  ;;  %v3402_v49 = vmul.f32 %v6477_v7, %v3322_v35  ;;  %7836 = vst [vmem:[#allocation43_spill] sm:$0xff] %v6611_v43  ;;  %v3528_v35 = vld [vmem:[%s7835_s28] sm:$0xff] }
 0x5be   : > { %v6549_v62 = vadd.f32 1.0, %v4938_v29  ;;  %v3365_v29 = vmul.f32 %v6539_v52, %v3356_v45  ;;  %v1845_v4 = vsel %vm6531_vm6, %v1844_v55, %v1840_v59  ;;  %v6595_v45 = vadd.f32 %v6331_v1, %v6223_v27  ;;  %vm6660_vm10 = vmor %vm1852_vm9, %vm1853_vm8 }
 0x5bf   : > { %v1849_v46 = vsub.f32 1.0, %v1848_v48  ;;  %v6588_v48 = vadd.f32 1e-06, %v6431_v26  ;;  %v3306_v26 = vmul.f32 %v6450_v44, %v6575_v20  ;;  %v3384_v55 = vmul.f32 %v6567_v6, %v3296_v34  ;;  %v6604_v22 = vpop.f32.mrf.mxu3 }
 0x5c0   : > { %4939 = vrcp.f32 %v6549_v62  ;;  %7834 = vst [vmem:[#allocation42_spill] sm:$0xff] %v6595_v45  ;;  %v3373_v36 = vadd.f32 %v3365_v29, %v3346_v2  ;;  %v3340_v59 = vmul.f32 %v6481_v30, %v3331_v11  ;;  %v3411_v27 = vmul.f32 %v6580_v33, %v3402_v49 }
 0x5c1   : > { %v1850_v57 = vmul.f32 %v6490_v51, %v1849_v46  ;;  %v3366_v1 = vmul.f32 %v6539_v52, %v3357_v12  ;;  %v3403_v2 = vmul.f32 %v6519_v21, %v6535_v3  ;;  %v3272_v46 = vmul.f32 %v6611_v43, %v3264_v58  ;;  %v3529_v12 = vld [vmem:[%s7835_s28 + $0x8] sm:$0xff] }
 0x5c2   : > { %v6615_v34 = vmul.f32 %v1845_v4, %v6356_v14  ;;  %4941 = vrcp.f32 %v6588_v48  ;;  %v3314_v11 = vadd.f32 %v3306_v26, %v3280_v0  ;;  %v3358_v29 = vmul.f32 %v6552_v19, %v3264_v58  ;;  %v6638_v26 = vld [vmem:[%s7813_s26 + $0x6] ss:$0 sm:$0xff]  ;;  %3572 = vmatpush.msra.mxu2 %v3529_v12 }
 0x5c3   : > { %v1747_v49 = vsub.f32 0.0, %v6595_v45  ;;  %v3392_v53 = vadd.f32 %v3384_v55, %v3373_v36  ;;  %v3374_v8 = vadd.f32 %v3366_v1, %v3347_v39  ;;  %v3332_v14 = vmul.f32 %v6625_v28, %v6601_v47 }
 0x5c4   : > { %v6632_v23 = vadd.f32 %v6490_v51, %v1850_v57  ;;  %v1873_v0 = vand.u32 2147483648, %v6549_v62  ;;  %v3429_v36 = vmul.f32 %v6441_v24, %v6515_v13  ;;  %v3348_v55 = vadd.f32 %v3340_v59, %v3314_v11  ;;  %3573 = vmatpush.msra.mxu2 %v3528_v35  ;;  %v3265_v13 = vld [vmem:[#allocation2 + $0x27] sm:$0xff] }
 0x5c5   : > { %v3419_v39 = vadd.f32 %v3411_v27, %v3392_v53  ;;  %v3385_v1 = vmul.f32 %v6567_v6, %v6575_v20  ;;  %v3412_v25 = vmul.f32 %v6580_v33, %v3403_v2  ;;  %v3281_v42 = vmul.f32 %v6447_v5, %v3272_v46 }
 0x5c6   : > { %v6629_v4 = vpop.eup %4939  ;;  %v6645_v57 = vadd.f32 1e-06, %v6513_v50  ;;  %v3307_v24 = vmul.f32 %v6450_v44, %v6622_v63  ;;  %v3367_v59 = vmul.f32 %v6539_v52, %v3358_v29  ;;  %v3404_v27 = vmul.f32 %v6570_v40, %v6601_v47 }
 0x5c7   : > { %v1762_v11 = vmul.f32 1.442695, %v1747_v49  ;;  %v3393_v53 = vadd.f32 %v3385_v1, %v3374_v8  ;;  %v3430_v2 = vmul.f32 %v6504_v31, %v3264_v58  ;;  %v3341_v46 = vmul.f32 %v6481_v30, %v3332_v14  ;;  %v6668_v49 = vld [vmem:[%s7813_s26 + $0x7] ss:$0 sm:$0xff]  ;;  %v6673_v58 = vld [vmem:[%s7813_s26 + $0x8] ss:$0 sm:$0xff] }
 0x5c8   : > { %v6654_v12 = vpop.eup %4941  ;;  %v6664_v35 = vor.u32 1.1754944e-38, %v1873_v0  ;;  %v3438_v29 = vmul.f32 %v6638_v26, %v3429_v36  ;;  %v3475_v8 = vmul.f32 %v6477_v7, %v6535_v3  ;;  %v3375_v14 = vadd.f32 %v3367_v59, %v3348_v55  ;;  %v3325_v31 = vld [vmem:[#allocation2 + $0x29] sm:$0xff]  ;;  %v2978_v55 = vpop.f32.mrf.mxu3 }
 0x5c9   : > { %v3420_v60 = vadd.f32 %v3412_v25, %v3393_v53  ;;  %v3315_v54 = vadd.f32 %v3307_v24, %v3281_v42  ;;  %v3359_v0 = vmul.f32 %v6611_v43, %v3265_v13  ;;  %4943 = vrcp.f32 %v6645_v57 }
 0x5ca   : > { %7840 = vst [vmem:[#allocation45_spill] sm:$0xff] %v6664_v35  ;;  %v3446_v36 = vadd.f32 %v3438_v29, %v3419_v39  ;;  %v3413_v3 = vmul.f32 %v6580_v33, %v3404_v27  ;;  %4945 = vpow2.f32 %v1762_v11  ;;  %v2994_v59 = vmul.f32 %v6654_v12, %v6588_v48 }
 0x5cb   : > { %v3439_v25 = vmul.f32 %v6638_v26, %v3430_v2  ;;  %v3349_v42 = vadd.f32 %v3341_v46, %v3315_v54  ;;  %v3457_v24 = vmul.f32 %v6668_v49, %v6575_v20  ;;  %v3484_v39 = vmul.f32 %v6673_v58, %v3475_v8  ;;  %v3299_v46 = vld [vmem:[#allocation2 + $0x28] sm:$0xff]  ;;  %v6699_v8 = vld [vmem:[%s5112_s9 + $0x20] sm:$0xff] }
 0x5cc   : > { %v3394_v53 = vadd.f32 %v3386_v38, %v3375_v14  ;;  %v3431_v29 = vmul.f32 %v6552_v19, %v3265_v13  ;;  %v3476_v27 = vmul.f32 %v6519_v21, %v6601_v47  ;;  %v3368_v11 = vmul.f32 %v6539_v52, %v3359_v0  ;;  %7842 = vst [vmem:[#allocation46_spill] sm:$0xff] %v6699_v8  ;;  %v6717_v21 = vld [vmem:[%s7841_s10] ss:$0 sm:$0xff]  ;;  %s7873_s10 = sld [smem:[#allocation18_spill]] }
 0x5cd   : > { %v3447_v1 = vadd.f32 %v3439_v25, %v3420_v60  ;;  %v3405_v7 = vmul.f32 %v6625_v28, %v3325_v31  ;;  %v6696_v2 = vadd.f32 1e-06, %v6604_v22  ;;  %v3465_v54 = vadd.f32 %v3457_v24, %v3446_v36  ;;  %v3266_v24 = vld [vmem:[#allocation2 + $0x2f] sm:$0xff] }
 0x5ce   : > { %v3421_v20 = vadd.f32 %v3413_v3, %v3394_v53  ;;  %v3273_v38 = vmul.f32 %v6699_v8, %v3265_v13  ;;  %v6704_v60 = vmul.f32 %v6629_v4, %v6549_v62  ;;  %v2995_v47 = vsub.f32 1.0, %v2994_v59  ;;  %v6713_v53 = vld [vmem:[%s5117_s13 + $0x20] sm:$0xff] }
 0x5cf   : > { %v3458_v14 = vmul.f32 %v6668_v49, %v6622_v63  ;;  %v3376_v0 = vadd.f32 %v3368_v11, %v3349_v42  ;;  %v6708_v25 = vpop.eup %4943  ;;  %v3492_v22 = vadd.f32 %v3484_v39, %v3465_v54  ;;  %v3440_v36 = vmul.f32 %v6638_v26, %v3431_v29  ;;  %7843 = vst [vmem:[#allocation47_spill] sm:$0xff] %v6713_v53 }
 0x5d0   : > { %v3477_v3 = vmul.f32 %v6570_v40, %v3325_v31  ;;  %v3333_v13 = vmul.f32 %v6713_v53, %v3325_v31  ;;  %v4946_v19 = vpop.eup %4945  ;;  %v3485_v15 = vmul.f32 %v6673_v58, %v3476_v27  ;;  %v3387_v63 = vmul.f32 %v6567_v6, %v3299_v46 }
 0x5d1   : > { %v3466_v59 = vadd.f32 %v3458_v14, %v3447_v1  ;;  %v3414_v42 = vmul.f32 %v6580_v33, %v3405_v7  ;;  %4947 = vrcp.f32 %v6696_v2  ;;  %v3308_v39 = vmul.f32 %v6450_v44, %v3299_v46 }
 0x5d2   : > { %v3448_v29 = vadd.f32 %v3440_v36, %v3421_v20  ;;  %v3282_v11 = vmul.f32 %v6447_v5, %v3273_v38  ;;  %v2996_v54 = vmul.f32 %v6654_v12, %v2995_v47  ;;  %v3009_v31 = vmul.f32 %v6708_v25, %v6645_v57  ;;  %v2981_v36 = vpop.f32.mrf.mxu3 }
 0x5d3   : > { %v3395_v40 = vadd.f32 %v3387_v63, %v3376_v0  ;;  %v3432_v1 = vmul.f32 %v6611_v43, %v3266_v24  ;;  %v6729_v27 = vadd.f32 1.0, %v4946_v19  ;;  %v3459_v14 = vmul.f32 %v6668_v49, %v3299_v46 }
 0x5d4   : > { %v3486_v7 = vmul.f32 %v6673_v58, %v3477_v3  ;;  %v3342_v41 = vmul.f32 %v6481_v30, %v3333_v13  ;;  %v3504_v38 = vadd.f32 %v6717_v21, %v3492_v22  ;;  %v3493_v47 = vadd.f32 %v3485_v15, %v3466_v59  ;;  %v3300_v3 = vld [vmem:[#allocation2 + $0x30] sm:$0xff] }
 0x5d5   : > { %v3422_v17 = vadd.f32 %v3414_v42, %v3395_v40  ;;  %v6736_v45 = vadd.f32 1e-06, %v2978_v55  ;;  %v3467_v0 = vadd.f32 %v3459_v14, %v3448_v29  ;;  %v3316_v63 = vadd.f32 %v3308_v39, %v3282_v11  ;;  %v3326_v42 = vld [vmem:[#allocation2 + $0x31] sm:$0xff] }
 0x5d6   : > { %v3360_v19 = vmul.f32 %v6699_v8, %v3266_v24  ;;  %v2997_v43 = vadd.f32 %v6654_v12, %v2996_v54  ;;  %vm2999_vm11 = vweird.f32 %v6654_v12  ;;  %v3010_v46 = vsub.f32 1.0, %v3009_v31  ;;  %v6761_v54 = vld [vmem:[%s5112_s9 + $0x28] sm:$0xff] }
 0x5d7   : > { %v3441_v13 = vmul.f32 %v6638_v26, %v3432_v1  ;;  %v6742_v20 = vpop.eup %4947  ;;  %4949 = vrcp.f32 %v6729_v27  ;;  %v3004_v15 = vand.u32 2147483648, %v6588_v48  ;;  %v3494_v40 = vadd.f32 %v3486_v7, %v3467_v0 }
 0x5d8   : > { %v3350_v55 = vadd.f32 %v3342_v41, %v3316_v63  ;;  %vm2998_vm12 = vweird.f32 %v6588_v48  ;;  %v3002_v22 = vand.u32 2147483647, %v6588_v48  ;;  %v6749_v59 = vadd.f32 %v6717_v21, %v3493_v47 }
 0x5d9   : > { %v3449_v39 = vadd.f32 %v3441_v13, %v3422_v17  ;;  %4951 = vrcp.f32 %v6736_v45  ;;  %vm6754_vm13 = vmor %vm2998_vm12, %vm2999_vm11  ;;  %v3309_v11 = vmul.f32 %v6450_v44, %v3300_v3  ;;  %v3369_v41 = vmul.f32 %v6539_v52, %v3360_v19 }
 0x5da   : > { %v3274_v48 = vmul.f32 %v6761_v54, %v3266_v24  ;;  %v3001_v17 = vsel %vm6754_vm13, %v6654_v12, %v2997_v43  ;;  %v3011_v31 = vmul.f32 %v6708_v25, %v3010_v46  ;;  %v3024_v1 = vmul.f32 %v6742_v20, %v6696_v2  ;;  %v3267_v43 = vld [vmem:[#allocation2 + $0x37] sm:$0xff] }
 0x5db   : > { %v3460_v14 = vmul.f32 %v6668_v49, %v3300_v3  ;;  %v3005_v7 = vor.u32 1.1754944e-38, %v3004_v15  ;;  %v6772_v47 = vadd.f32 %v6717_v21, %v3494_v40  ;;  %v3377_v0 = vadd.f32 %v3369_v41, %v3350_v55  ;;  %v6783_v40 = vld [vmem:[%s5117_s13 + $0x28] sm:$0xff]  ;;  %v2984_v41 = vpop.f32.mrf.mxu3 }
 0x5dc   : > { %v3406_v63 = vmul.f32 %v6713_v53, %v3326_v42  ;;  %vm3003_vm14 = vcmp.eq.f32.partialorder %v3002_v22, 8.507059e+37  ;;  %v3478_v19 = vmul.f32 %v6625_v28, %v3326_v42  ;;  %v3388_v12 = vmul.f32 %v6567_v6, %v3300_v3  ;;  %v3301_v3 = vld [vmem:[#allocation2 + $0x38] sm:$0xff] }
 0x5dd   : > { %v3468_v24 = vadd.f32 %v3460_v14, %v3449_v39  ;;  %v6777_v46 = vpop.eup %4949  ;;  %v6779_v13 = vadd.f32 1e-06, %v2981_v36  ;;  %v3006_v29 = vsel %vm3003_vm14, %v3005_v7, %v3001_v17  ;;  %v3283_v15 = vmul.f32 %v6447_v5, %v3274_v48 }
 0x5de   : > { %v3334_v55 = vmul.f32 %v6783_v40, %v3326_v42  ;;  %v3012_v39 = vadd.f32 %v6708_v25, %v3011_v31  ;;  %vm3014_vm15 = vweird.f32 %v6708_v25  ;;  %v3025_v14 = vsub.f32 1.0, %v3024_v1 }
 0x5df   : > { %v6788_v28 = vpop.eup %4951  ;;  %v3019_v36 = vand.u32 2147483648, %v6645_v57  ;;  %v3396_v17 = vadd.f32 %v3388_v12, %v3377_v0  ;;  %v3415_v7 = vmul.f32 %v6580_v33, %v3406_v63  ;;  %v3433_v48 = vmul.f32 %v6699_v8, %v3267_v43 }
 0x5e0   : > { %vm3013_vm2 = vweird.f32 %v6645_v57  ;;  %v3487_v42 = vmul.f32 %v6673_v58, %v3478_v19  ;;  %4953 = vrcp.f32 %v6779_v13  ;;  %v3310_v1 = vmul.f32 %v6450_v44, %v3301_v3 }
 0x5e1   : > { %vm6797_vm3 = vmor %vm3013_vm2, %vm3014_vm15  ;;  %v3317_v0 = vadd.f32 %v3309_v11, %v3283_v15  ;;  %v3343_v63 = vmul.f32 %v6481_v30, %v3334_v55  ;;  %v3039_v19 = vmul.f32 %v6788_v28, %v6736_v45  ;;  %v3461_v8 = vmul.f32 %v6668_v49, %v3301_v3 }
 0x5e2   : > { %v3361_v11 = vmul.f32 %v6761_v54, %v3267_v43  ;;  %v3442_v15 = vmul.f32 %v6638_v26, %v3433_v48  ;;  %v6815_v55 = vadd.f32 1e-06, %v2984_v41  ;;  %vm3029_vm5 = vweird.f32 %v6742_v20 }
 0x5e3   : > { %v3351_v31 = vadd.f32 %v3343_v63, %v3317_v0  ;;  %v3034_v41 = vand.u32 2147483648, %v6696_v2  ;;  %v2987_v63 = vpop.f32.mrf.mxu3  ;;  %vm3028_vm6 = vweird.f32 %v6696_v2  ;;  %vm3044_vm9 = vweird.f32 %v6788_v28 }
 0x5e4   : > { %v3370_v0 = vmul.f32 %v6539_v52, %v3361_v11  ;;  %4955 = vrcp.f32 %v6815_v55  ;;  %vm6840_vm7 = vmor %vm3028_vm6, %vm3029_vm5  ;;  %vm3043_vm11 = vweird.f32 %v6736_v45  ;;  %vm3058_vm15 = vweird.f32 %v6779_v13 }
 0x5e5   : > { %vm6881_vm12 = vmor %vm3043_vm11, %vm3044_vm9  ;;  %vm1867_vm6 = vweird.f32 %v6549_v62 }
 0x5e6   : > { %v6825_v48 = vpop.eup %4953  ;;  %v3378_v37 = vadd.f32 %v3370_v0, %v3351_v31  ;;  %v3049_v0 = vand.u32 2147483648, %v6736_v45 }
 0x5e7   : > { %vm3059_vm14 = vweird.f32 %v6825_v48 }
 0x5e8   : > { %vm6920_vm2 = vmor %vm3058_vm15, %vm3059_vm14 }
 0x5f8   : > { %v3220_v61 = vpop.f32.mrf.mxu1 }
 0x5f9   : > { %v3244_v22 = vmul.f32 %v3220_v61, %v3006_v29  ;;  %v3017_v61 = vand.u32 2147483647, %v6645_v57  ;;  %v3026_v57 = vmul.f32 %v6742_v20, %v3025_v14  ;;  %v3020_v29 = vor.u32 1.1754944e-38, %v3019_v36  ;;  %v6818_v36 = vld [vmem:[%s5112_s9 + $0x30] sm:$0xff] }
 0x5fb   : > { %v3512_v35 = vadd.f32 %v3504_v38, %v3244_v22  ;;  %v3016_v38 = vsel %vm6797_vm3, %v6708_v25, %v3012_v39  ;;  %v3423_v22 = vadd.f32 %v3415_v7, %v3396_v17  ;;  %vm3018_vm4 = vcmp.eq.f32.partialorder %v3017_v61, 8.507059e+37  ;;  %v6823_v61 = vld [vmem:[#allocation2 + $0x40] sm:$0xff] }
 0x5fc   : > { %v3389_v25 = vmul.f32 %v6567_v6, %v3301_v3  ;;  %v3021_v39 = vsel %vm3018_vm4, %v3020_v29, %v3016_v38  ;;  %v3275_v17 = vmul.f32 %v6818_v36, %v3267_v43  ;;  %v3032_v38 = vand.u32 2147483647, %v6696_v2 }
 0x5fd   : > { %v3520_v12 = vmul.f32 %v3512_v35, %v6484_v32  ;;  %v3495_v32 = vadd.f32 %v3487_v42, %v3468_v24  ;;  %v3327_v35 = vld [vmem:[#allocation2 + $0x39] sm:$0xff]  ;;  %v3040_v24 = vsub.f32 1.0, %v3039_v19  ;;  %v3450_v3 = vadd.f32 %v3442_v15, %v3423_v22 }
 0x5fe   : > { %v3479_v42 = vmul.f32 %v6713_v53, %v3327_v35  ;;  %v6849_v11 = vmul.f32 %v6450_v44, %v6823_v61  ;;  %v3284_v2 = vmul.f32 %v6447_v5, %v3275_v17  ;;  %v3407_v10 = vmul.f32 %v6783_v40, %v3327_v35 }
 0x5ff   : > { %4733 = vmatmul.msk.f32.vlgmr.msra.gmra.mxu2 %vm1128_vm1, %v3520_v12  ;;  %v3027_v12 = vadd.f32 %v6742_v20, %v3026_v57  ;;  %v6834_v57 = vld [vmem:[%s5117_s13 + $0x30] sm:$0xff]  ;;  %v6845_v22 = vadd.f32 %v6717_v21, %v3495_v32  ;;  %v3035_v32 = vor.u32 1.1754944e-38, %v3034_v41  ;;  %v3469_v53 = vadd.f32 %v3461_v8, %v3450_v3  ;;  %v3328_v3 = vld [vmem:[#allocation2 + $0x41] sm:$0xff] }
 0x600   : > { %v3223_v14 = vpop.f32.mrf.mxu1  ;;  %v3335_v19 = vmul.f32 %v6834_v57, %v3327_v35  ;;  %vm3033_vm8 = vcmp.eq.f32.partialorder %v3032_v38, 8.507059e+37  ;;  %v3488_v44 = vmul.f32 %v6673_v58, %v3479_v42  ;;  %v6864_v17 = vadd.f32 1e-06, %v2987_v63  ;;  %v6869_v42 = vpop.eup %4955 }
 0x601   : > { %v3245_v7 = vmul.f32 %v3223_v14, %v3021_v39  ;;  %v3031_v39 = vsel %vm6840_vm7, %v6742_v20, %v3027_v12  ;;  %v3041_v14 = vmul.f32 %v6788_v28, %v3040_v24  ;;  %v3397_v38 = vadd.f32 %v3389_v25, %v3378_v37  ;;  %v6889_v25 = vld [vmem:[%s5117_s13 + $0x38] sm:$0xff] }
 0x602   : > { %v3344_v20 = vmul.f32 %v6481_v30, %v3335_v19  ;;  %v3036_v12 = vsel %vm3033_vm8, %v3035_v32, %v3031_v39  ;;  %v3416_v63 = vmul.f32 %v6580_v33, %v3407_v10  ;;  %v6874_v19 = vld [vmem:[%s5112_s9 + $0x38] sm:$0xff]  ;;  %4957 = vrcp.f32 %v6864_v17 }
 0x603   : > { %v3513_v43 = vadd.f32 %v6749_v59, %v3245_v7  ;;  %v3268_v59 = vld [vmem:[#allocation2 + $0x3f] sm:$0xff]  ;;  %v3054_v7 = vmul.f32 %v6825_v48, %v6779_v13  ;;  %v3042_v35 = vadd.f32 %v6788_v28, %v3041_v14  ;;  %v3462_v37 = vmul.f32 %v6668_v49, %v6823_v61 }
 0x604   : > { %v3362_v8 = vmul.f32 %v6818_v36, %v3268_v59  ;;  %v3069_v32 = vmul.f32 %v6869_v42, %v6815_v55  ;;  %vm1868_vm4 = vweird.f32 %v6629_v4  ;;  %vm3074_vm7 = vweird.f32 %v6869_v42 }
 0x605   : > { %v3521_v15 = vmul.f32 %v3513_v43, %v6487_v16  ;;  %v3434_v16 = vmul.f32 %v6761_v54, %v3268_v59  ;;  %v3318_v43 = vadd.f32 %v3310_v1, %v3284_v2  ;;  %v3055_v41 = vsub.f32 1.0, %v3054_v7 }
 0x606   : > { %v3276_v1 = vmul.f32 %v6874_v19, %v3268_v59  ;;  %v3047_v2 = vand.u32 2147483647, %v6736_v45  ;;  %v3371_v10 = vmul.f32 %v6539_v52, %v3362_v8  ;;  %v2990_v59 = vpop.f32.mrf.mxu3  ;;  %v3046_v45 = vsel %vm6881_vm12, %v6788_v28, %v3042_v35 }
 0x607   : > { %4734 = vmatmul.msk.f32.gmra.mxu2 %vm1128_vm1, %v3521_v15  ;;  %v3352_v15 = vadd.f32 %v3344_v20, %v3318_v43  ;;  %v3056_v7 = vmul.f32 %v6825_v48, %v3055_v41  ;;  %v3050_v20 = vor.u32 1.1754944e-38, %v3049_v0  ;;  %v3424_v8 = vadd.f32 %v3416_v63, %v3397_v38 }
 0x608   : > { %v3226_v24 = vpop.f32.mrf.mxu1  ;;  %v3285_v43 = vmul.f32 %v6447_v5, %v3276_v1  ;;  %vm3048_vm13 = vcmp.eq.f32.partialorder %v3047_v2, 8.507059e+37  ;;  %v3390_v28 = vmul.f32 %v6567_v6, %v6823_v61  ;;  %v6904_v35 = vadd.f32 1e-06, %v2990_v59  ;;  %v6910_v38 = vpop.eup %4957 }
 0x609   : > { %v3246_v31 = vmul.f32 %v3226_v24, %v3036_v12  ;;  %v3496_v12 = vadd.f32 %v3488_v44, %v3469_v53  ;;  %v3443_v24 = vmul.f32 %v6638_v26, %v3434_v16  ;;  %v3051_v41 = vsel %vm3048_vm13, %v3050_v20, %v3046_v45 }
 0x60a   : > { %v3408_v0 = vmul.f32 %v6834_v57, %v3328_v3  ;;  %v3057_v5 = vadd.f32 %v6825_v48, %v3056_v7  ;;  %v3070_v16 = vsub.f32 1.0, %v3069_v32  ;;  %v3064_v63 = vand.u32 2147483648, %v6779_v13 }
 0x60b   : > { %v3514_v29 = vadd.f32 %v6772_v47, %v3246_v31  ;;  %v3336_v47 = vmul.f32 %v6889_v25, %v3328_v3  ;;  %v3379_v31 = vadd.f32 %v3371_v10, %v3352_v15  ;;  %v3480_v61 = vmul.f32 %v6783_v40, %v3328_v3  ;;  %v3428_v10 = vld [vmem:[#allocation2 + $0x4f] sm:$0xff] }
 0x60c   : > { %v3319_v1 = vadd.f32 %v6849_v11, %v3285_v43  ;;  %v3451_v39 = vadd.f32 %v3443_v24, %v3424_v8  ;;  %4959 = vrcp.f32 %v6904_v35  ;;  %v3417_v3 = vmul.f32 %v6580_v33, %v3408_v0  ;;  %v3382_v8 = vld [vmem:[#allocation2 + $0x48] sm:$0xff] }
 0x60d   : > { %v3522_v14 = vmul.f32 %v3514_v29, %v6523_v56  ;;  %v3355_v56 = vld [vmem:[#allocation2 + $0x47] sm:$0xff]  ;;  %v3345_v53 = vmul.f32 %v6481_v30, %v3336_v47  ;;  %v3062_v30 = vand.u32 2147483647, %v6779_v13  ;;  %v3398_v47 = vadd.f32 %v3390_v28, %v3379_v31 }
 0x60e   : > { %v3363_v2 = vmul.f32 %v6874_v19, %v3355_v56  ;;  %v3084_v13 = vmul.f32 %v6910_v38, %v6864_v17  ;;  %v7854_v45 = vand.u32 2147483647, %v6411_v18  ;;  %v3065_v32 = vor.u32 1.1754944e-38, %v3064_v63  ;;  %v3401_v31 = vld [vmem:[#allocation2 + $0x49] sm:$0xff] }
 0x60f   : > { %4735 = vmatmul.msk.f32.gmra.mxu2 %vm1128_vm1, %v3522_v14  ;;  %v3353_v59 = vadd.f32 %v3345_v53, %v3319_v1  ;;  %v3071_v14 = vmul.f32 %v6869_v42, %v3070_v16  ;;  %vm3063_vm5 = vcmp.eq.f32.partialorder %v3062_v30, 8.507059e+37  ;;  %v3508_v18 = vadd.f32 %v6717_v21, %v3496_v12 }
 0x610   : > { %v3229_v29 = vpop.f32.mrf.mxu1  ;;  %vm6934_vm3 = vcmp.eq.f32.partialorder %v7854_v45, 8.507059e+37  ;;  %v3372_v20 = vmul.f32 %v6539_v52, %v3363_v2  ;;  %v3470_v43 = vadd.f32 %v3462_v37, %v3451_v39  ;;  %v3085_v53 = vsub.f32 1.0, %v3084_v13  ;;  %v7861_v45 = vld [vmem:[#allocation40_spill] sm:$0xff] }
 0x611   : > { %v3247_v44 = vmul.f32 %v3229_v29, %v3051_v41  ;;  %v3425_v29 = vadd.f32 %v3417_v3, %v3398_v47  ;;  %v3079_v37 = vand.u32 2147483648, %v6815_v55  ;;  %v3391_v12 = vmul.f32 %v6567_v6, %v3382_v8 }
 0x612   : > { %v3380_v52 = vadd.f32 %v3372_v20, %v3353_v59  ;;  %v1878_v63 = vmul.f32 %v6777_v46, %v6729_v27  ;;  %vm3073_vm8 = vweird.f32 %v6815_v55  ;;  %v3077_v1 = vand.u32 2147483647, %v6815_v55 }
 0x613   : > { %v3515_v15 = vadd.f32 %v6845_v22, %v3247_v44  ;;  %v3061_v22 = vsel %vm6920_vm2, %v6825_v48, %v3057_v5  ;;  %v7857_v48 = vsub.f32 1.0, %v6704_v60  ;;  %v3072_v60 = vadd.f32 %v6869_v42, %v3071_v14  ;;  %v6950_v44 = vpop.eup %4959  ;;  %vm6961_vm9 = vmor %vm3073_vm8, %vm3074_vm7 }
 0x614   : > { %v3066_v28 = vsel %vm3063_vm5, %v3065_v32, %v3061_v22  ;;  %v3409_v5 = vmul.f32 %v6889_v25, %v3401_v31  ;;  %v3399_v39 = vadd.f32 %v3391_v12, %v3380_v52  ;;  %v3086_v59 = vmul.f32 %v6910_v38, %v3085_v53 }
 0x615   : > { %v3523_v11 = vmul.f32 %v3515_v15, %v6562_v9  ;;  %v3435_v9 = vmul.f32 %v6818_v36, %v3355_v56  ;;  %v1865_v24 = vmul.f32 %v6629_v4, %v7857_v48  ;;  %v3489_v56 = vmul.f32 %v6673_v58, %v3480_v61 }
 0x616   : > { %v3076_v3 = vsel %vm6961_vm9, %v6869_v42, %v3072_v60  ;;  %v3099_v55 = vmul.f32 %v6950_v44, %v6904_v35  ;;  %v3463_v22 = vmul.f32 %v6668_v49, %v3382_v8  ;;  %v3481_v14 = vmul.f32 %v6834_v57, %v3401_v31  ;;  %v3474_v8 = vld [vmem:[#allocation2 + $0x51] sm:$0xff]  ;;  %v7864_v31 = vld [vmem:[#allocation32_spill] sm:$0xff] }
 0x617   : > { %4736 = vmatmul.msk.f32.gmra.mxu2 %vm1128_vm1, %v3523_v11  ;;  %v3444_v16 = vmul.f32 %v6638_v26, %v3435_v9  ;;  %v1866_v2 = vadd.f32 %v6629_v4, %v1865_v24  ;;  %v3497_v30 = vadd.f32 %v3489_v56, %v3470_v43  ;;  %v3080_v11 = vor.u32 1.1754944e-38, %v3079_v37  ;;  %v6996_v43 = vld [vmem:[#allocation2 + $0x50] sm:$0xff] }
 0x618   : > { %v3232_v41 = vpop.f32.mrf.mxu1  ;;  %v3418_v13 = vmul.f32 %v6580_v33, %v3409_v5  ;;  %v1879_v32 = vsub.f32 1.0, %v1878_v63  ;;  %vm3078_vm11 = vcmp.eq.f32.partialorder %v3077_v1, 8.507059e+37  ;;  %v3436_v9 = vmul.f32 %v6874_v19, %v3428_v10 }
 0x619   : > { %v3248_v0 = vmul.f32 %v3232_v41, %v3066_v28  ;;  %v3452_v6 = vadd.f32 %v3444_v16, %v3425_v29  ;;  %v3081_v20 = vsel %vm3078_vm11, %v3080_v11, %v3076_v3  ;;  %v3509_v24 = vadd.f32 %v6717_v21, %v3497_v30  ;;  %v7869_v3 = vld [vmem:[#allocation33_spill] sm:$0xff] }
 0x61a   : > { %v3087_v50 = vadd.f32 %v6910_v38, %v3086_v59  ;;  %vm3089_vm12 = vweird.f32 %v6910_v38  ;;  %v3100_v7 = vsub.f32 1.0, %v3099_v55  ;;  %v3094_v56 = vand.u32 2147483648, %v6864_v17 }
 0x61b   : > { %v3516_v61 = vadd.f32 %v3508_v18, %v3248_v0  ;;  %v3471_v33 = vadd.f32 %v3463_v22, %v3452_v6  ;;  %v3426_v18 = vadd.f32 %v3418_v13, %v3399_v39  ;;  %v3490_v29 = vmul.f32 %v6673_v58, %v3481_v14 }
 0x61c   : > { %vm3088_vm13 = vweird.f32 %v6864_v17  ;;  %v3092_v0 = vand.u32 2147483647, %v6864_v17  ;;  %v3445_v60 = vmul.f32 %v6638_v26, %v3436_v9  ;;  %v1880_v53 = vmul.f32 %v6777_v46, %v1879_v32 }
 0x61d   : > { %v3524_v47 = vmul.f32 %v3516_v61, %v6615_v34  ;;  %v7860_v34 = vsel %vm6660_vm10, %v6490_v51, %v6632_v23  ;;  %vm6990_vm10 = vmor %vm1867_vm6, %vm1868_vm4  ;;  %v3498_v12 = vadd.f32 %v3490_v29, %v3471_v33  ;;  %v7015_v5 = vmul.f32 %v6889_v25, %v3474_v8  ;;  %v7875_v8 = vld [vmem:[#allocation26_spill] sm:$0xff] }
 0x61e   : > { %v1860_v42 = vsel %vm6934_vm3, %v7861_v45, %v7860_v34  ;;  %v1870_v41 = vsel %vm6990_vm10, %v6629_v4, %v1866_v2  ;;  %vm7008_vm14 = vmor %vm3088_vm13, %vm3089_vm12  ;;  %v3464_v4 = vmul.f32 %v6668_v49, %v6996_v43  ;;  %v3101_v26 = vmul.f32 %v6950_v44, %v3100_v7  ;;  %v7868_v2 = vld [vmem:[#allocation45_spill] sm:$0xff]  ;;  %v7876_v29 = vld [vmem:[#allocation34_spill] sm:$0xff] }
 0x61f   : > { %4737 = vmatmul.msk.f32.gmra.mxu2 %vm1128_vm1, %v3524_v47  ;;  %v1897_v28 = vmul.f32 %v1860_v42, %v7864_v31  ;;  %v3091_v17 = vsel %vm7008_vm14, %v6910_v38, %v3087_v50  ;;  %v3453_v63 = vadd.f32 %v3445_v60, %v3426_v18  ;;  %v7867_v61 = vand.u32 2147483647, %v6549_v62 }
 0x620   : > { %v3235_v48 = vpop.f32.mrf.mxu1  ;;  %v3095_v1 = vor.u32 1.1754944e-38, %v3094_v56  ;;  %vm1883_vm2 = vweird.f32 %v6777_v46  ;;  %vm3093_vm3 = vcmp.eq.f32.partialorder %v3092_v0, 8.507059e+37  ;;  %v1881_v49 = vadd.f32 %v6777_v46, %v1880_v53  ;;  %v7877_v0 = vld [vmem:[#allocation35_spill] sm:$0xff]  ;;  %v7878_v53 = vld [vmem:[#allocation29_spill] sm:$0xff] }
 0x621   : > { %v3249_v51 = vmul.f32 %v3235_v48, %v3081_v20  ;;  %vm1872_vm15 = vcmp.eq.f32.partialorder %v7867_v61, 8.507059e+37  ;;  %v3510_v38 = vadd.f32 %v6717_v21, %v3498_v12  ;;  %v3491_v39 = vmul.f32 %v6673_v58, %v7015_v5  ;;  %v7077_v12 = vld [vmem:[%s7873_s10 + $0x2] ss:$0 sm:$0xff] }
 0x622   : > { %v1875_v15 = vsel %vm1872_vm15, %v7868_v2, %v1870_v41  ;;  %v3096_v30 = vsel %vm3093_vm3, %v3095_v1, %v3091_v17  ;;  %v3102_v62 = vadd.f32 %v6950_v44, %v3101_v26  ;;  %vm3104_vm4 = vweird.f32 %v6950_v44  ;;  %v7879_v26 = vld [vmem:[#allocation36_spill] sm:$0xff]  ;;  %v5042_v61 = vld [vmem:[%s5112_s9] sm:$0xff] }
 0x623   : > { %v3517_v52 = vadd.f32 %v3509_v24, %v3249_v51  ;;  %v3472_v47 = vadd.f32 %v3464_v4, %v3453_v63  ;;  %v1898_v59 = vmul.f32 %v1875_v15, %v7869_v3  ;;  %vm1882_vm5 = vweird.f32 %v6729_v27  ;;  %v7054_v51 = vld [vmem:[%s7872_s16] ss:$0 sm:$0xff]  ;;  %v7084_v2 = vld [vmem:[%s7873_s10 + $0x3] ss:$0 sm:$0xff]  ;;  %v7880_v15 = vld [vmem:[#allocation37_spill] sm:$0xff]  ;;  %s7885_s16 = sld [smem:[#allocation19_spill]] }
 0x624   : > { %v1888_v55 = vand.u32 2147483648, %v6729_v27  ;;  %v3109_v11 = vand.u32 2147483648, %v6904_v35  ;;  %vm7038_vm6 = vmor %vm1882_vm5, %vm1883_vm2  ;;  %v1886_v58 = vand.u32 2147483647, %v6729_v27  ;;  %vm3103_vm7 = vweird.f32 %v6904_v35  ;;  %v7881_v3 = vld [vmem:[#allocation27_spill] sm:$0xff] }
 0x625   : > { %v3525_v16 = vmul.f32 %v3517_v52, %v1897_v28  ;;  %v3107_v13 = vand.u32 2147483647, %v6904_v35  ;;  %vm3105_vm8 = vmor %vm3103_vm7, %vm3104_vm4  ;;  %v1885_v34 = vsel %vm7038_vm6, %v6777_v46, %v1881_v49  ;;  %v3499_v32 = vadd.f32 %v3491_v39, %v3472_v47  ;;  %v7874_v46 = vld [vmem:[#allocation42_spill] sm:$0xff]  ;;  %v7066_v28 = vld [vmem:[%s7873_s10 + $0x1] ss:$0 sm:$0xff] }
 0x626   : > { %v3106_v42 = vsel %vm3105_vm8, %v6950_v44, %v3102_v62  ;;  %v1889_v9 = vor.u32 1.1754944e-38, %v1888_v55  ;;  %v3110_v20 = vor.u32 1.1754944e-38, %v3109_v11  ;;  %vm1887_vm9 = vcmp.eq.f32.partialorder %v1886_v58, 8.507059e+37  ;;  %v7091_v47 = vld [vmem:[%s7873_s10 + $0x4] ss:$0 sm:$0xff] }
 0x627   : > { %4738 = vmatmul.msk.f32.gmra.mxu2 %vm1128_vm1, %v3525_v16  ;;  %vm3108_vm11 = vcmp.eq.f32.partialorder %v3107_v13, 8.507059e+37  ;;  %v3511_v33 = vadd.f32 %v6717_v21, %v3499_v32  ;;  %v7063_v21 = vld [vmem:[%s7873_s10] ss:$0 sm:$0xff]  ;;  %v3659_v60 = vmul.f32 %v7066_v28, %v7877_v0 }
 0x628   : > { %v3238_v6 = vpop.f32.mrf.mxu1  ;;  %v1890_v27 = vsel %vm1887_vm9, %v1889_v9, %v1885_v34  ;;  %v3111_v35 = vsel %vm3108_vm11, %v3110_v20, %v3106_v42  ;;  %v3633_v52 = vmul.f32 %v7063_v21, %v7876_v29  ;;  %v7882_v34 = vld [vmem:[#allocation38_spill] sm:$0xff]  ;;  %v5043_v9 = vld [vmem:[%s5117_s13] sm:$0xff] }
 0x629   : > { %v3250_v10 = vmul.f32 %v3238_v6, %v3096_v30  ;;  %v1899_v18 = vmul.f32 %v1890_v27, %v7874_v46  ;;  %v7884_v0 = vld [vmem:[#allocation23_spill] sm:$0xff] }
 0x62a   : > { %v3667_v17 = vadd.f32 %v3659_v60, %v3633_v52 }
 0x62b   : > { %v3518_v14 = vadd.f32 %v3510_v38, %v3250_v10 }
 0x62d   : > { %v3526_v45 = vmul.f32 %v3518_v14, %v1898_v59  ;;  %v7098_v14 = vld [vmem:[%s7873_s10 + $0x5] ss:$0 sm:$0xff] }
 0x62f   : > { %4739 = vmatmul.msk.f32.gmra.mxu2 %vm1128_vm1, %v3526_v45 }
 0x630   : > { %v3241_v48 = vpop.f32.mrf.mxu1 }
 0x631   : > { %v3251_v24 = vmul.f32 %v3241_v48, %v3111_v35  ;;  %v7108_v35 = vld [vmem:[%s7873_s10 + $0x6] ss:$0 sm:$0xff] }
 0x632   : > { %v7883_v48 = vld [vmem:[#allocation39_spill] sm:$0xff] }
 0x633   : > { %v3519_v44 = vadd.f32 %v3511_v33, %v3251_v24 }
 0x635   : > { %v3527_v23 = vmul.f32 %v3519_v44, %v1899_v18 }
 0x637   : > { %4740 = vmatmul.msk.f32.gmra.mxu2 %vm1128_vm1, %v3527_v23 }
 0x682   : > { %v3575_v50 = vpop.f32.mrf.mxu2 }
 0x683   : > { %v3576_v7 = vadd.f32 %v7054_v51, %v3575_v50 }
 0x685   : > { %v7058_v31 = vadd.f32 %v3576_v7, %v7875_v8  ;;  %v7115_v8 = vld [vmem:[%s7873_s10 + $0x7] ss:$0 sm:$0xff] }
 0x687   : > { %3607 = vst.msk [vmem:[#allocation2 + $0x10] sm:$0xff] %vm1128_vm1, %v7058_v31 }
 0x68a   : > { %v3578_v41 = vpop.f32.mrf.mxu2 }
 0x68b   : > { %v3579_v56 = vadd.f32 %v7054_v51, %v3578_v41 }
 0x68d   : > { %v7074_v37 = vadd.f32 %v3579_v56, %v7878_v53 }
 0x68e   : > { %v3617_v4 = vld [vmem:[#allocation2 + $0xf] sm:$0xff] }
 0x68f   : > { %v3676_v16 = vld [vmem:[#allocation2 + $0x9] sm:$0xff]  ;;  %3608 = vst.msk [vmem:[#allocation2 + $0x18] sm:$0xff] %vm1128_vm1, %v7074_v37  ;;  %v3711_v1 = vmul.f32 %v5042_v61, %v3617_v4  ;;  %v3625_v49 = vmul.f32 %v7880_v15, %v3617_v4  ;;  %v7124_v4 = vld [vmem:[%s7873_s10 + $0x8] ss:$0 sm:$0xff] }
 0x690   : > { %v3684_v63 = vmul.f32 %v7879_v26, %v3676_v16  ;;  %v3651_v10 = vld [vmem:[#allocation2 + $0x10] sm:$0xff] }
 0x691   : > { %v3720_v62 = vmul.f32 %v7084_v2, %v3711_v1  ;;  %v3634_v55 = vmul.f32 %v7063_v21, %v3625_v49  ;;  %v3660_v13 = vmul.f32 %v7066_v28, %v3651_v10  ;;  %v3739_v32 = vmul.f32 %v7091_v47, %v3651_v10  ;;  %v7886_v49 = vld [vmem:[#allocation41_spill] sm:$0xff] }
 0x692   : > { %v3693_v30 = vmul.f32 %v7077_v12, %v3684_v63  ;;  %v3581_v6 = vpop.f32.mrf.mxu2 }
 0x693   : > { %v3582_v38 = vadd.f32 %v7054_v51, %v3581_v6  ;;  %v3668_v33 = vadd.f32 %v3660_v13, %v3634_v55  ;;  %v5044_v6 = vld [vmem:[%s5117_s13 + $0x8] sm:$0xff]  ;;  %v7887_v13 = vld [vmem:[#allocation43_spill] sm:$0xff] }
 0x694   : > { %v3701_v39 = vadd.f32 %v3693_v30, %v3667_v17 }
 0x695   : > { %v7094_v59 = vadd.f32 %v3582_v38, %v7881_v3 }
 0x696   : > { %v3618_v11 = vld [vmem:[#allocation2 + $0x17] sm:$0xff]  ;;  %v3728_v58 = vadd.f32 %v3720_v62, %v3701_v39 }
 0x697   : > { %v3677_v22 = vld [vmem:[#allocation2 + $0x11] sm:$0xff]  ;;  %3609 = vst.msk [vmem:[#allocation2 + $0x20] sm:$0xff] %vm1128_vm1, %v7094_v59  ;;  %v3712_v42 = vmul.f32 %v7880_v15, %v3618_v11  ;;  %v3784_v27 = vmul.f32 %v5042_v61, %v3618_v11  ;;  %v3626_v24 = vmul.f32 %v7883_v48, %v3618_v11  ;;  %v7136_v11 = vld [vmem:[%s7885_s16] ss:$0 sm:$0xff]  ;;  %s7896_s16 = sld [smem:[#allocation22_spill]] }
 0x698   : > { %v3685_v45 = vmul.f32 %v7882_v34, %v3677_v22  ;;  %v3757_v20 = vmul.f32 %v5043_v9, %v3677_v22  ;;  %v3747_v44 = vadd.f32 %v3739_v32, %v3728_v58  ;;  %v3652_v7 = vld [vmem:[#allocation2 + $0x18] sm:$0xff]  ;;  %v5045_v32 = vld [vmem:[%s5112_s9 + $0x8] sm:$0xff] }
 0x699   : > { %v3793_v29 = vmul.f32 %v7108_v35, %v3784_v27  ;;  %v3721_v52 = vmul.f32 %v7084_v2, %v3712_v42  ;;  %v3635_v53 = vmul.f32 %v7063_v21, %v3626_v24  ;;  %v3661_v16 = vmul.f32 %v7066_v28, %v3652_v7 }
 0x69a   : > { %v3694_v46 = vmul.f32 %v7077_v12, %v3685_v45  ;;  %v3584_v18 = vpop.f32.mrf.mxu2  ;;  %v3766_v23 = vmul.f32 %v7098_v14, %v3757_v20  ;;  %v3812_v1 = vmul.f32 %v7115_v8, %v3652_v7  ;;  %v3740_v39 = vmul.f32 %v7091_v47, %v3652_v7 }
 0x69b   : > { %v3585_v50 = vadd.f32 %v7054_v51, %v3584_v18  ;;  %v3669_v62 = vadd.f32 %v3661_v16, %v3635_v53  ;;  %v7889_v16 = vld [vmem:[#allocation44_spill] sm:$0xff] }
 0x69c   : > { %v3702_v41 = vadd.f32 %v3694_v46, %v3668_v33  ;;  %v3774_v56 = vadd.f32 %v3766_v23, %v3747_v44  ;;  %v7888_v44 = vld [vmem:[#allocation28_spill] sm:$0xff] }
 0x69d   : > { %v7120_v60 = vadd.f32 %v3585_v50, %v7884_v0 }
 0x69e   : > { %v3678_v17 = vld [vmem:[#allocation2 + $0x19] sm:$0xff]  ;;  %v3801_v26 = vadd.f32 %v3793_v29, %v3774_v56  ;;  %v3729_v61 = vadd.f32 %v3721_v52, %v3702_v41 }
 0x69f   : > { %v3619_v63 = vld [vmem:[#allocation2 + $0x1f] sm:$0xff]  ;;  %3610 = vst.msk [vmem:[#allocation2 + $0x28] sm:$0xff] %vm1128_vm1, %v7120_v60  ;;  %v3830_v15 = vmul.f32 %v5043_v9, %v3678_v17  ;;  %v3686_v30 = vmul.f32 %v7886_v49, %v3678_v17  ;;  %v3758_v38 = vmul.f32 %v5044_v6, %v3678_v17 }
 0x6a0   : > { %v3713_v10 = vmul.f32 %v7883_v48, %v3619_v63  ;;  %v3820_v3 = vadd.f32 %v3812_v1, %v3801_v26  ;;  %v3627_v34 = vmul.f32 %v7887_v13, %v3619_v63  ;;  %v3748_v45 = vadd.f32 %v3740_v39, %v3729_v61  ;;  %v3653_v48 = vld [vmem:[#allocation2 + $0x20] sm:$0xff]  ;;  %v5046_v26 = vld [vmem:[%s5117_s13 + $0x10] sm:$0xff]  ;;  %v5047_v39 = vld [vmem:[%s5112_s9 + $0x18] sm:$0xff] }
 0x6a1   : > { %v3839_v55 = vmul.f32 %v7124_v4, %v3830_v15  ;;  %v3695_v22 = vmul.f32 %v7077_v12, %v3686_v30  ;;  %v3767_v42 = vmul.f32 %v7098_v14, %v3758_v38  ;;  %v3785_v9 = vmul.f32 %v5045_v32, %v3619_v63 }
 0x6a2   : > { %v3587_v58 = vpop.f32.mrf.mxu2  ;;  %v3722_v18 = vmul.f32 %v7084_v2, %v3713_v10  ;;  %v3636_v7 = vmul.f32 %v7063_v21, %v3627_v34  ;;  %v3813_v29 = vmul.f32 %v7115_v8, %v3653_v48  ;;  %v3662_v1 = vmul.f32 %v7066_v28, %v3653_v48 }
 0x6a3   : > { %v3588_v20 = vadd.f32 %v7054_v51, %v3587_v58  ;;  %v3847_v27 = vadd.f32 %v3839_v55, %v3820_v3  ;;  %v3703_v24 = vadd.f32 %v3695_v22, %v3669_v62  ;;  %v3775_v33 = vadd.f32 %v3767_v42, %v3748_v45  ;;  %v5048_v55 = vld [vmem:[%s5112_s9 + $0x10] sm:$0xff]  ;;  %v7890_v45 = vld [vmem:[#allocation46_spill] sm:$0xff] }
 0x6a4   : > { %v3794_v46 = vmul.f32 %v7108_v35, %v3785_v9  ;;  %v3741_v15 = vmul.f32 %v7091_v47, %v3653_v48  ;;  %v3670_v13 = vadd.f32 %v3662_v1, %v3636_v7 }
 0x6a5   : > { %v7146_v23 = vadd.f32 %v3588_v20, %v7888_v44  ;;  %v3859_v50 = vadd.f32 %v7136_v11, %v3847_v27  ;;  %v3730_v52 = vadd.f32 %v3722_v18, %v3703_v24  ;;  %v7891_v27 = vld [vmem:[#allocation30_spill] sm:$0xff] }
 0x6a6   : > { %v3679_v41 = vld [vmem:[#allocation2 + $0x21] sm:$0xff]  ;;  %v3802_v56 = vadd.f32 %v3794_v46, %v3775_v33 }
 0x6a7   : > { %3611 = vst.msk [vmem:[#allocation2 + $0x30] sm:$0xff] %vm1128_vm1, %v7146_v23  ;;  %v7154_v0 = vadd.f32 %v3859_v50, %v7058_v31  ;;  %v3831_v53 = vmul.f32 %v5044_v6, %v3679_v41  ;;  %v3687_v17 = vmul.f32 %v7889_v16, %v3679_v41  ;;  %v3759_v63 = vmul.f32 %v5046_v26, %v3679_v41  ;;  %v3620_v61 = vld [vmem:[#allocation2 + $0x27] sm:$0xff] }
 0x6a8   : > { %v3821_v30 = vadd.f32 %v3813_v29, %v3802_v56  ;;  %v3714_v10 = vmul.f32 %v5047_v39, %v3620_v61  ;;  %v3749_v62 = vadd.f32 %v3741_v15, %v3730_v52  ;;  %v3786_v22 = vmul.f32 %v5048_v55, %v3620_v61  ;;  %v3654_v32 = vld [vmem:[#allocation2 + $0x28] sm:$0xff]  ;;  %v7892_v56 = vld [vmem:[#allocation47_spill] sm:$0xff] }
 0x6a9   : > { %v3877_v49 = vsel %vm1128_vm1, %v7154_v0, 0.0  ;;  %v3840_v38 = vmul.f32 %v7124_v4, %v3831_v53  ;;  %v3696_v31 = vmul.f32 %v7077_v12, %v3687_v17  ;;  %v3768_v3 = vmul.f32 %v7098_v14, %v3759_v63  ;;  %v5049_v53 = vld [vmem:[%s5117_s13 + $0x18] sm:$0xff] }
 0x6aa   : > { %3878 = vadd.xlane.f32.xlu2 %v3877_v49  ;;  %v3590_v6 = vpop.f32.mrf.mxu2  ;;  %v3628_v42 = vmul.f32 %v7890_v45, %v3620_v61  ;;  %v3795_v20 = vmul.f32 %v7108_v35, %v3786_v22  ;;  %v3723_v44 = vmul.f32 %v7084_v2, %v3714_v10  ;;  %v3814_v7 = vmul.f32 %v7115_v8, %v3654_v32 }
 0x6ab   : > { %v3591_v58 = vadd.f32 %v7054_v51, %v3590_v6  ;;  %v3848_v34 = vadd.f32 %v3840_v38, %v3821_v30  ;;  %v3776_v9 = vadd.f32 %v3768_v3, %v3749_v62  ;;  %v3704_v33 = vadd.f32 %v3696_v31, %v3670_v13 }
 0x6ac   : > { %v3637_v52 = vmul.f32 %v7063_v21, %v3628_v42  ;;  %v3742_v30 = vmul.f32 %v7091_v47, %v3654_v32 }
 0x6ad   : > { %v7171_v48 = vadd.f32 %v3591_v58, %v7891_v27  ;;  %v3860_v24 = vadd.f32 %v7136_v11, %v3848_v34  ;;  %v3803_v18 = vadd.f32 %v3795_v20, %v3776_v9  ;;  %v3731_v63 = vadd.f32 %v3723_v44, %v3704_v33  ;;  %v7893_v58 = vld [vmem:[#allocation24_spill] sm:$0xff] }
 0x6ae   : > { %v3680_v46 = vld [vmem:[#allocation2 + $0x29] sm:$0xff] }
 0x6af   : > { %3612 = vst.msk [vmem:[#allocation2 + $0x38] sm:$0xff] %vm1128_vm1, %v7171_v48  ;;  %v7178_v50 = vadd.f32 %v3860_v24, %v7074_v37  ;;  %v3832_v41 = vmul.f32 %v5046_v26, %v3680_v46  ;;  %v3688_v29 = vmul.f32 %v7892_v56, %v3680_v46  ;;  %v3760_v16 = vmul.f32 %v5049_v53, %v3680_v46  ;;  %v3621_v17 = vld [vmem:[#allocation2 + $0x2f] sm:$0xff] }
 0x6b0   : > { %v3822_v1 = vadd.f32 %v3814_v7, %v3803_v18  ;;  %v3629_v37 = vmul.f32 %v6761_v54, %v3621_v17  ;;  %v3663_v26 = vmul.f32 %v7066_v28, %v3654_v32  ;;  %v3715_v31 = vmul.f32 %v7890_v45, %v3621_v17  ;;  %v3655_v32 = vld [vmem:[#allocation2 + $0x30] sm:$0xff] }
 0x6b1   : > { %v3880_v61 = vsel %vm1128_vm1, %v7178_v50, 0.0  ;;  %v3841_v15 = vmul.f32 %v7124_v4, %v3832_v41  ;;  %v3697_v38 = vmul.f32 %v7077_v12, %v3688_v29  ;;  %v3750_v3 = vadd.f32 %v3742_v30, %v3731_v63 }
 0x6b2   : > { %3881 = vadd.xlane.f32.xlu0 %v3880_v61  ;;  %v3593_v49 = vpop.f32.mrf.mxu2  ;;  %v3671_v62 = vadd.f32 %v3663_v26, %v3637_v52  ;;  %v3769_v55 = vmul.f32 %v7098_v14, %v3760_v16  ;;  %v3787_v22 = vmul.f32 %v5047_v39, %v3621_v17  ;;  %v3638_v42 = vmul.f32 %v7063_v21, %v3629_v37 }
 0x6b3   : > { %v3594_v6 = vadd.f32 %v7054_v51, %v3593_v49  ;;  %v3849_v10 = vadd.f32 %v3841_v15, %v3822_v1  ;;  %v3724_v27 = vmul.f32 %v7084_v2, %v3715_v31  ;;  %v3664_v39 = vmul.f32 %v7066_v28, %v3655_v32 }
 0x6b4   : > { %v3777_v9 = vadd.f32 %v3769_v55, %v3750_v3  ;;  %v3796_v20 = vmul.f32 %v7108_v35, %v3787_v22  ;;  %v3705_v45 = vadd.f32 %v3697_v38, %v3671_v62  ;;  %v3815_v18 = vmul.f32 %v7115_v8, %v3655_v32  ;;  %v5050_v38 = vld [vmem:[%s5112_s9 + $0x20] sm:$0xff] }
 0x6b5   : > { %v7195_v13 = vadd.f32 %v3594_v6, %v7893_v58  ;;  %v3861_v34 = vadd.f32 %v7136_v11, %v3849_v10  ;;  %v3672_v17 = vadd.f32 %v3664_v39, %v3638_v42  ;;  %v3743_v63 = vmul.f32 %v7091_v47, %v3655_v32  ;;  %v7894_v6 = vld [vmem:[#allocation25_spill] sm:$0xff] }
 0x6b6   : > { %v3681_v33 = vld [vmem:[#allocation2 + $0x31] sm:$0xff]  ;;  %v3804_v46 = vadd.f32 %v3796_v20, %v3777_v9  ;;  %v3732_v7 = vadd.f32 %v3724_v27, %v3705_v45  ;;  %v5051_v27 = vld [vmem:[%s5117_s13 + $0x20] sm:$0xff] }
 0x6b7   : > { %3613 = vst.msk [vmem:[#allocation2 + $0x40] sm:$0xff] %vm1128_vm1, %v7195_v13  ;;  %v7204_v24 = vadd.f32 %v3861_v34, %v7094_v59  ;;  %v3622_v44 = vld [vmem:[#allocation2 + $0x37] sm:$0xff]  ;;  %v3833_v29 = vmul.f32 %v5049_v53, %v3681_v33  ;;  %v3689_v52 = vmul.f32 %v6783_v40, %v3681_v33  ;;  %v3761_v16 = vmul.f32 %v7892_v56, %v3681_v33 }
 0x6b8   : > { %v3630_v61 = vmul.f32 %v6818_v36, %v3622_v44  ;;  %v3656_v1 = vld [vmem:[#allocation2 + $0x38] sm:$0xff]  ;;  %v3716_v15 = vmul.f32 %v6761_v54, %v3622_v44  ;;  %v3823_v49 = vadd.f32 %v3815_v18, %v3804_v46  ;;  %v3751_v30 = vadd.f32 %v3743_v63, %v3732_v7 }
 0x6b9   : > { %v3883_v41 = vsel %vm1128_vm1, %v7204_v24, 0.0  ;;  %v3842_v53 = vmul.f32 %v7124_v4, %v3833_v29  ;;  %v3698_v26 = vmul.f32 %v7077_v12, %v3689_v52  ;;  %v3770_v56 = vmul.f32 %v7098_v14, %v3761_v16 }
 0x6ba   : > { %3884 = vadd.xlane.f32.xlu2 %v3883_v41  ;;  %v3596_v59 = vpop.f32.mrf.mxu2  ;;  %v3788_v31 = vmul.f32 %v5050_v38, %v3622_v44  ;;  %v3744_v3 = vmul.f32 %v7091_v47, %v3656_v1  ;;  %v3725_v32 = vmul.f32 %v7084_v2, %v3716_v15  ;;  %v3816_v45 = vmul.f32 %v7115_v8, %v3656_v1 }
 0x6bb   : > { %v3597_v37 = vadd.f32 %v7054_v51, %v3596_v59  ;;  %v3850_v62 = vadd.f32 %v3842_v53, %v3823_v49  ;;  %v3706_v55 = vadd.f32 %v3698_v26, %v3672_v17  ;;  %v3639_v51 = vmul.f32 %v7063_v21, %v3630_v61 }
 0x6bc   : > { %v3778_v34 = vadd.f32 %v3770_v56, %v3751_v30  ;;  %v3797_v42 = vmul.f32 %v7108_v35, %v3788_v31  ;;  %v3665_v41 = vmul.f32 %v7066_v28, %v3656_v1 }
 0x6bd   : > { %v7221_v10 = vadd.f32 %v3597_v37, %v7894_v6  ;;  %v3862_v20 = vadd.f32 %v7136_v11, %v3850_v62  ;;  %v3733_v44 = vadd.f32 %v3725_v32, %v3706_v55 }
 0x6be   : > { %v3623_v22 = vld [vmem:[#allocation2 + $0x3f] sm:$0xff]  ;;  %v3805_v33 = vadd.f32 %v3797_v42, %v3778_v34 }
 0x6bf   : > { %v3682_v58 = vld [vmem:[#allocation2 + $0x39] sm:$0xff]  ;;  %3614 = vst.msk [vmem:[#allocation2 + $0x48] sm:$0xff] %vm1128_vm1, %v7221_v10  ;;  %v3631_v9 = vmul.f32 %v6874_v19, %v3623_v22  ;;  %v7236_v7 = vadd.f32 %v3862_v20, %v7120_v60  ;;  %v3789_v52 = vmul.f32 %v6761_v54, %v3623_v22  ;;  %v3752_v17 = vadd.f32 %v3744_v3, %v3733_v44 }
 0x6c0   : > { %v3834_v39 = vmul.f32 %v5051_v27, %v3682_v58  ;;  %v3690_v46 = vmul.f32 %v6834_v57, %v3682_v58  ;;  %v3762_v18 = vmul.f32 %v6783_v40, %v3682_v58  ;;  %v3824_v16 = vadd.f32 %v3816_v45, %v3805_v33  ;;  %v3657_v15 = vld [vmem:[#allocation2 + $0x40] sm:$0xff] }
 0x6c1   : > { %v3640_v61 = vmul.f32 %v7063_v21, %v3631_v9  ;;  %v3886_v37 = vsel %vm1128_vm1, %v7236_v7, 0.0  ;;  %v3673_v60 = vadd.f32 %v3665_v41, %v3639_v51  ;;  %v3798_v53 = vmul.f32 %v7108_v35, %v3789_v52 }
 0x6c2   : > { %v3843_v29 = vmul.f32 %v7124_v4, %v3834_v39  ;;  %v3699_v59 = vmul.f32 %v7077_v12, %v3690_v46  ;;  %v3771_v63 = vmul.f32 %v7098_v14, %v3762_v18  ;;  %3887 = vadd.xlane.f32.xlu0 %v3886_v37  ;;  %v3717_v54 = vmul.f32 %v6818_v36, %v3623_v22 }
 0x6c3   : > { %v3666_v30 = vmul.f32 %v7066_v28, %v3657_v15  ;;  %v3817_v6 = vmul.f32 %v7115_v8, %v3657_v15 }
 0x6c4   : > { %v3851_v49 = vadd.f32 %v3843_v29, %v3824_v16  ;;  %v3779_v1 = vadd.f32 %v3771_v63, %v3752_v17  ;;  %v3707_v26 = vadd.f32 %v3699_v59, %v3673_v60  ;;  %v3726_v58 = vmul.f32 %v7084_v2, %v3717_v54 }
 0x6c5   : > { %v3674_v22 = vadd.f32 %v3666_v30, %v3640_v61 }
 0x6c6   : > { %v3683_v56 = vld [vmem:[#allocation2 + $0x41] sm:$0xff]  ;;  %v3863_v31 = vadd.f32 %v7136_v11, %v3851_v49  ;;  %v3806_v21 = vadd.f32 %v3798_v53, %v3779_v1  ;;  %v3756_v55 = vld [vmem:[#allocation2 + $0x49] sm:$0xff]  ;;  %v3734_v9 = vadd.f32 %v3726_v58, %v3707_v26 }
 0x6c7   : > { %v3710_v38 = vld [vmem:[#allocation2 + $0x47] sm:$0xff]  ;;  %v3691_v62 = vmul.f32 %v6889_v25, %v3683_v56  ;;  %v3835_v51 = vmul.f32 %v6783_v40, %v3683_v56  ;;  %v3764_v45 = vmul.f32 %v6889_v25, %v3756_v55  ;;  %v3783_v27 = vld [vmem:[#allocation2 + $0x4f] sm:$0xff]  ;;  %v3745_v40 = vmul.f32 %v7091_v47, %v3657_v15 }
 0x6c8   : > { %v3718_v3 = vmul.f32 %v6874_v19, %v3710_v38  ;;  %v7256_v34 = vadd.f32 %v3863_v31, %v7146_v23  ;;  %v3825_v42 = vadd.f32 %v3817_v6, %v3806_v21  ;;  %v3737_v20 = vld [vmem:[#allocation2 + $0x48] sm:$0xff]  ;;  %v3763_v33 = vmul.f32 %v6834_v57, %v3683_v56 }
 0x6c9   : > { %v3700_v28 = vmul.f32 %v7077_v12, %v3691_v62  ;;  %v3844_v32 = vmul.f32 %v7124_v4, %v3835_v51  ;;  %v3790_v18 = vmul.f32 %v6818_v36, %v3710_v38  ;;  %v3753_v44 = vadd.f32 %v3745_v40, %v3734_v9  ;;  %v7895_v38 = vld [vmem:[#allocation31_spill] sm:$0xff] }
 0x6ca   : > { %v3889_v39 = vsel %vm1128_vm1, %v7256_v34, 0.0  ;;  %v3727_v23 = vmul.f32 %v7084_v2, %v3718_v3  ;;  %v3772_v41 = vmul.f32 %v7098_v14, %v3763_v33  ;;  %v3746_v25 = vmul.f32 %v7091_v47, %v3737_v20 }
 0x6cb   : > { %v3708_v46 = vadd.f32 %v3700_v28, %v3674_v22  ;;  %3890 = vadd.xlane.f32.xlu2 %v3889_v39  ;;  %v3852_v12 = vadd.f32 %v3844_v32, %v3825_v42  ;;  %v3791_v52 = vmul.f32 %v6874_v19, %v3783_v27  ;;  %v3799_v17 = vmul.f32 %v7108_v35, %v3790_v18 }
 0x6cc   : > { %v3780_v59 = vadd.f32 %v3772_v41, %v3753_v44  ;;  %v3836_v63 = vmul.f32 %v6834_v57, %v3756_v55  ;;  %v3773_v61 = vmul.f32 %v7098_v14, %v3764_v45  ;;  %v3818_v37 = vmul.f32 %v7115_v8, %v3737_v20 }
 0x6cd   : > { %v3735_v29 = vadd.f32 %v3727_v23, %v3708_v46  ;;  %v3864_v16 = vadd.f32 %v7136_v11, %v3852_v12  ;;  %v3800_v47 = vmul.f32 %v7108_v35, %v3791_v52  ;;  %v3819_v19 = vmul.f32 %v7115_v8, %v6996_v43 }
 0x6ce   : > { %v3807_v15 = vadd.f32 %v3799_v17, %v3780_v59  ;;  %v3845_v1 = vmul.f32 %v7124_v4, %v3836_v63 }
 0x6cf   : > { %v3754_v2 = vadd.f32 %v3746_v25, %v3735_v29  ;;  %v7275_v36 = vadd.f32 %v3864_v16, %v7171_v48  ;;  %v3846_v48 = vmul.f32 %v7124_v4, %v7015_v5 }
 0x6d0   : > { %v3826_v57 = vadd.f32 %v3818_v37, %v3807_v15 }
 0x6d1   : > { %v3781_v60 = vadd.f32 %v3773_v61, %v3754_v2  ;;  %v3892_v49 = vsel %vm1128_vm1, %v7275_v36, 0.0 }
 0x6d2   : > { %3893 = vadd.xlane.f32.xlu0 %v3892_v49  ;;  %v3853_v53 = vadd.f32 %v3845_v1, %v3826_v57 }
 0x6d3   : > { %v3808_v14 = vadd.f32 %v3800_v47, %v3781_v60 }
 0x6d4   : > { %v3865_v26 = vadd.f32 %v7136_v11, %v3853_v53 }
 0x6d5   : > { %v3827_v54 = vadd.f32 %v3819_v19, %v3808_v14 }
 0x6d6   : > { %v7288_v35 = vadd.f32 %v3865_v26, %v7195_v13 }
 0x6d7   : > { %v3854_v30 = vadd.f32 %v3846_v48, %v3827_v54 }
 0x6d8   : > { %v3895_v8 = vsel %vm1128_vm1, %v7288_v35, 0.0 }
 0x6d9   : > { %v3866_v43 = vadd.f32 %v7136_v11, %v3854_v30  ;;  %v4076_v30 = vld [vmem:[%s7896_s16 + $0x8] sm:$0xff] }
 0x6da   : > { %3896 = vadd.xlane.f32.xlu0 %v3895_v8  ;;  %4119 = vmatpush.msra.mxu3 %v4076_v30 }
 0x6db   : > { %v7294_v56 = vadd.f32 %v3866_v43, %v7221_v10  ;;  %v4075_v43 = vld [vmem:[%s7896_s16] sm:$0xff] }
 0x6dc   : > { %4120 = vmatpush.msra.mxu3 %v4075_v43 }
 0x6dd   : > { %v3898_v5 = vsel %vm1128_vm1, %v7294_v56, 0.0 }
 0x6e2   : > { %3899 = vadd.xlane.f32.xlu0 %v3898_v5 }
 0x71d   : > { %v3879_v4 = vpop.xlane.xlu2 %3878 }
 0x71e   : > { %v3901_v31 = vmul.f32 %v3879_v4, %v7895_v38 }
 0x720   : > { %v7300_v21 = vsub.f32 %v7154_v0, %v3901_v31 }
 0x722   : > { %v3917_v11 = vmul.f32 %v7300_v21, %v7300_v21 }
 0x724   : > { %v3925_v13 = vsel %vm1128_vm1, %v3917_v11, 0.0 }
 0x725   : > { %v3882_v6 = vpop.xlane.xlu0 %3881  ;;  %3926 = vadd.xlane.f32.xlu2 %v3925_v13 }
 0x726   : > { %v3902_v10 = vmul.f32 %v3882_v6, %v7895_v38  ;;  %v7360_v6 = vld [vmem:[%s7897_s0] ss:$0 sm:$0xff] }
 0x728   : > { %v7307_v62 = vsub.f32 %v7178_v50, %v3902_v10 }
 0x72a   : > { %v3918_v3 = vmul.f32 %v7307_v62, %v7307_v62 }
 0x72c   : > { %v3928_v55 = vsel %vm1128_vm1, %v3918_v3, 0.0 }
 0x72d   : > { %v3885_v51 = vpop.xlane.xlu2 %3884  ;;  %3929 = vadd.xlane.f32.xlu2 %v3928_v55 }
 0x72e   : > { %v3903_v58 = vmul.f32 %v3885_v51, %v7895_v38  ;;  %v7364_v51 = vld [vmem:[%s7898_s2] ss:$0 sm:$0xff] }
 0x730   : > { %v7314_v22 = vsub.f32 %v7204_v24, %v3903_v58 }
 0x732   : > { %v3919_v28 = vmul.f32 %v7314_v22, %v7314_v22 }
 0x734   : > { %v3931_v42 = vsel %vm1128_vm1, %v3919_v28, 0.0 }
 0x735   : > { %3932 = vadd.xlane.f32.xlu2 %v3931_v42  ;;  %v3888_v32 = vpop.xlane.xlu0 %3887 }
 0x736   : > { %v3904_v9 = vmul.f32 %v3888_v32, %v7895_v38 }
 0x738   : > { %v7321_v20 = vsub.f32 %v7236_v7, %v3904_v9 }
 0x73a   : > { %v3920_v45 = vmul.f32 %v7321_v20, %v7321_v20 }
 0x73c   : > { %v3934_v39 = vsel %vm1128_vm1, %v3920_v45, 0.0 }
 0x73d   : > { %3935 = vadd.xlane.f32.xlu0 %v3934_v39 }
 0x73e   : > { %v3891_v27 = vpop.xlane.xlu2 %3890 }
 0x73f   : > { %v3905_v40 = vmul.f32 %v3891_v27, %v7895_v38 }
 0x741   : > { %v7328_v33 = vsub.f32 %v7256_v34, %v3905_v40 }
 0x743   : > { %v3921_v46 = vmul.f32 %v7328_v33, %v7328_v33 }
 0x745   : > { %v3937_v23 = vsel %vm1128_vm1, %v3921_v46, 0.0  ;;  %v3894_v12 = vpop.xlane.xlu0 %3893 }
 0x746   : > { %3938 = vadd.xlane.f32.xlu2 %v3937_v23  ;;  %v3906_v18 = vmul.f32 %v3894_v12, %v7895_v38 }
 0x748   : > { %v7335_v44 = vsub.f32 %v7275_v36, %v3906_v18 }
 0x74a   : > { %v3922_v41 = vmul.f32 %v7335_v44, %v7335_v44 }
 0x74c   : > { %v3940_v29 = vsel %vm1128_vm1, %v3922_v41, 0.0 }
 0x74d   : > { %3941 = vadd.xlane.f32.xlu0 %v3940_v29  ;;  %v3897_v25 = vpop.xlane.xlu0 %3896 }
 0x74e   : > { %v3907_v52 = vmul.f32 %v3897_v25, %v7895_v38 }
 0x750   : > { %v7342_v16 = vsub.f32 %v7288_v35, %v3907_v52 }
 0x752   : > { %v3923_v59 = vmul.f32 %v7342_v16, %v7342_v16 }
 0x754   : > { %v3943_v17 = vsel %vm1128_vm1, %v3923_v59, 0.0 }
 0x755   : > { %3944 = vadd.xlane.f32.xlu2 %v3943_v17  ;;  %v3900_v63 = vpop.xlane.xlu0 %3899 }
 0x756   : > { %v3908_v2 = vmul.f32 %v3900_v63, %v7895_v38 }
 0x758   : > { %v7349_v61 = vsub.f32 %v7294_v56, %v3908_v2 }
 0x75a   : > { %v3924_v15 = vmul.f32 %v7349_v61, %v7349_v61 }
 0x75c   : > { %v3946_v37 = vsel %vm1128_vm1, %v3924_v15, 0.0 }
 0x75d   : > { %3947 = vadd.xlane.f32.xlu0 %v3946_v37 }
 0x798   : > { %v3927_v60 = vpop.xlane.xlu2 %3926 }
 0x799   : > { %v3949_v47 = vmul.f32 %v3927_v60, %v7895_v38 }
 0x79b   : > { %v3957_v19 = vadd.f32 1e-05, %v3949_v47 }
 0x79d   : > { %4961 = vrsqrt.f32 %v3957_v19  ;;  %vm3971_vm12 = vweird.f32 %v3957_v19 }
 0x7a0   : > { %v3930_v49 = vpop.xlane.xlu2 %3929 }
 0x7a1   : > { %v3950_v57 = vmul.f32 %v3930_v49, %v7895_v38 }
 0x7a3   : > { %v4962_v1 = vpop.eup %4961  ;;  %v3958_v14 = vadd.f32 1e-05, %v3950_v57 }
 0x7a4   : > { %v3966_v48 = vmul.f32 %v4962_v1, %v3957_v19  ;;  %vm3972_vm10 = vweird.f32 %v4962_v1 }
 0x7a5   : > { %4963 = vrsqrt.f32 %v3958_v14  ;;  %vm3973_vm13 = vmor %vm3971_vm12, %vm3972_vm10  ;;  %vm3981_vm15 = vweird.f32 %v3958_v14 }
 0x7a6   : > { %v3967_v53 = vmul.f32 %v4962_v1, %v3966_v48 }
 0x7a8   : > { %v3968_v54 = vmul.f32 0.5, %v3967_v53  ;;  %v3933_v26 = vpop.xlane.xlu2 %3932 }
 0x7a9   : > { %v3951_v8 = vmul.f32 %v3933_v26, %v7895_v38 }
 0x7aa   : > { %v3969_v5 = vsub.f32 1.5, %v3968_v54 }
 0x7ab   : > { %v4964_v4 = vpop.eup %4963  ;;  %v3959_v31 = vadd.f32 1e-05, %v3951_v8 }
 0x7ac   : > { %v3970_v11 = vmul.f32 %v4962_v1, %v3969_v5  ;;  %v3976_v13 = vmul.f32 %v4964_v4, %v3958_v14  ;;  %vm3982_vm14 = vweird.f32 %v4964_v4 }
 0x7ad   : > { %4965 = vrsqrt.f32 %v3959_v31  ;;  %vm3983_vm2 = vmor %vm3981_vm15, %vm3982_vm14  ;;  %vm3991_vm4 = vweird.f32 %v3959_v31 }
 0x7ae   : > { %v3974_v10 = vsel %vm3973_vm13, %v4962_v1, %v3970_v11  ;;  %v3977_v3 = vmul.f32 %v4964_v4, %v3976_v13 }
 0x7af   : > { %v4045_v55 = vmul.f32 %v3974_v10, %v7300_v21 }
 0x7b0   : > { %v3978_v58 = vmul.f32 0.5, %v3977_v3  ;;  %v3936_v32 = vpop.xlane.xlu0 %3935 }
 0x7b1   : > { %v4056_v28 = vmul.f32 %v7360_v6, %v4045_v55  ;;  %v3952_v45 = vmul.f32 %v3936_v32, %v7895_v38 }
 0x7b2   : > { %v3979_v42 = vsub.f32 1.5, %v3978_v58 }
 0x7b3   : > { %v4966_v9 = vpop.eup %4965  ;;  %v4067_v27 = vadd.f32 %v7364_v51, %v4056_v28  ;;  %v3960_v46 = vadd.f32 1e-05, %v3952_v45 }
 0x7b4   : > { %v3980_v39 = vmul.f32 %v4964_v4, %v3979_v42  ;;  %v3986_v40 = vmul.f32 %v4966_v9, %v3959_v31  ;;  %vm3992_vm3 = vweird.f32 %v4966_v9 }
 0x7b5   : > { %4741 = vmatmul.msk.f32.vlgmr.msra.gmra.mxu3 %vm1128_vm1, %v4067_v27  ;;  %4967 = vrsqrt.f32 %v3960_v46  ;;  %vm3993_vm5 = vmor %vm3991_vm4, %vm3992_vm3  ;;  %vm4001_vm7 = vweird.f32 %v3960_v46 }
 0x7b6   : > { %v3984_v21 = vsel %vm3983_vm2, %v4964_v4, %v3980_v39  ;;  %v3987_v23 = vmul.f32 %v4966_v9, %v3986_v40 }
 0x7b7   : > { %v4046_v12 = vmul.f32 %v3984_v21, %v7307_v62 }
 0x7b8   : > { %v3988_v18 = vmul.f32 0.5, %v3987_v23 }
 0x7b9   : > { %v3939_v41 = vpop.xlane.xlu2 %3938  ;;  %v4057_v29 = vmul.f32 %v7360_v6, %v4046_v12 }
 0x7ba   : > { %v3989_v25 = vsub.f32 1.5, %v3988_v18  ;;  %v3953_v52 = vmul.f32 %v3939_v41, %v7895_v38 }
 0x7bb   : > { %v4068_v59 = vadd.f32 %v7364_v51, %v4057_v29  ;;  %v4968_v2 = vpop.eup %4967 }
 0x7bc   : > { %v3990_v17 = vmul.f32 %v4966_v9, %v3989_v25  ;;  %v3961_v63 = vadd.f32 1e-05, %v3953_v52  ;;  %v3996_v37 = vmul.f32 %v4968_v2, %v3960_v46  ;;  %vm4002_vm6 = vweird.f32 %v4968_v2 }
 0x7bd   : > { %4742 = vmatmul.msk.f32.gmra.mxu3 %vm1128_vm1, %v4068_v59  ;;  %vm4003_vm8 = vmor %vm4001_vm7, %vm4002_vm6 }
 0x7be   : > { %v3994_v15 = vsel %vm3993_vm5, %v4966_v9, %v3990_v17  ;;  %4969 = vrsqrt.f32 %v3961_v63  ;;  %v3997_v60 = vmul.f32 %v4968_v2, %v3996_v37  ;;  %vm4011_vm11 = vweird.f32 %v3961_v63 }
 0x7bf   : > { %v4047_v62 = vmul.f32 %v3994_v15, %v7314_v22 }
 0x7c0   : > { %v3942_v47 = vpop.xlane.xlu0 %3941  ;;  %v3998_v57 = vmul.f32 0.5, %v3997_v60 }
 0x7c1   : > { %v3954_v19 = vmul.f32 %v3942_v47, %v7895_v38  ;;  %v4058_v49 = vmul.f32 %v7360_v6, %v4047_v62 }
 0x7c2   : > { %v3999_v53 = vsub.f32 1.5, %v3998_v57 }
 0x7c3   : > { %v3962_v1 = vadd.f32 1e-05, %v3954_v19  ;;  %v4069_v14 = vadd.f32 %v7364_v51, %v4058_v49 }
 0x7c4   : > { %v4970_v48 = vpop.eup %4969  ;;  %v4000_v26 = vmul.f32 %v4968_v2, %v3999_v53 }
 0x7c5   : > { %v4006_v54 = vmul.f32 %v4970_v48, %v3961_v63  ;;  %4971 = vrsqrt.f32 %v3962_v1  ;;  %4743 = vmatmul.msk.f32.gmra.mxu3 %vm1128_vm1, %v4069_v14  ;;  %vm4012_vm9 = vweird.f32 %v4970_v48  ;;  %vm4021_vm13 = vweird.f32 %v3962_v1 }
 0x7c6   : > { %v4004_v30 = vsel %vm4003_vm8, %v4968_v2, %v4000_v26  ;;  %vm4013_vm10 = vmor %vm4011_vm11, %vm4012_vm9 }
 0x7c7   : > { %v4007_v22 = vmul.f32 %v4970_v48, %v4006_v54  ;;  %v4048_v5 = vmul.f32 %v4004_v30, %v7321_v20 }
 0x7c8   : > { %v3945_v8 = vpop.xlane.xlu2 %3944 }
 0x7c9   : > { %v4008_v43 = vmul.f32 0.5, %v4007_v22  ;;  %v3955_v4 = vmul.f32 %v3945_v8, %v7895_v38  ;;  %v4059_v13 = vmul.f32 %v7360_v6, %v4048_v5 }
 0x7cb   : > { %v4972_v31 = vpop.eup %4971  ;;  %v4009_v11 = vsub.f32 1.5, %v4008_v43  ;;  %v3963_v3 = vadd.f32 1e-05, %v3955_v4  ;;  %v4070_v58 = vadd.f32 %v7364_v51, %v4059_v13 }
 0x7cc   : > { %v4016_v10 = vmul.f32 %v4972_v31, %v3962_v1  ;;  %vm4022_vm12 = vweird.f32 %v4972_v31 }
 0x7cd   : > { %v4010_v55 = vmul.f32 %v4970_v48, %v4009_v11  ;;  %4973 = vrsqrt.f32 %v3963_v3  ;;  %4744 = vmatmul.msk.f32.gmra.mxu3 %vm1128_vm1, %v4070_v58  ;;  %vm4023_vm14 = vmor %vm4021_vm13, %vm4022_vm12  ;;  %vm4031_vm2 = vweird.f32 %v3963_v3 }
 0x7ce   : > { %v4017_v28 = vmul.f32 %v4972_v31, %v4016_v10 }
 0x7cf   : > { %v4014_v42 = vsel %vm4013_vm10, %v4970_v48, %v4010_v55 }
 0x7d0   : > { %v4018_v20 = vmul.f32 0.5, %v4017_v28  ;;  %v4049_v32 = vmul.f32 %v4014_v42, %v7328_v33  ;;  %v3948_v9 = vpop.xlane.xlu0 %3947 }
 0x7d1   : > { %v3956_v27 = vmul.f32 %v3948_v9, %v7895_v38 }
 0x7d2   : > { %v4019_v45 = vsub.f32 1.5, %v4018_v20  ;;  %v4060_v39 = vmul.f32 %v7360_v6, %v4049_v32 }
 0x7d3   : > { %v4974_v40 = vpop.eup %4973  ;;  %v3964_v21 = vadd.f32 1e-05, %v3956_v27 }
 0x7d4   : > { %v4020_v46 = vmul.f32 %v4972_v31, %v4019_v45  ;;  %v4071_v23 = vadd.f32 %v7364_v51, %v4060_v39  ;;  %v4026_v12 = vmul.f32 %v4974_v40, %v3963_v3  ;;  %vm4032_vm15 = vweird.f32 %v4974_v40 }
 0x7d5   : > { %4975 = vrsqrt.f32 %v3964_v21  ;;  %vm4033_vm3 = vmor %vm4031_vm2, %vm4032_vm15  ;;  %vm4041_vm5 = vweird.f32 %v3964_v21 }
 0x7d6   : > { %v4024_v18 = vsel %vm4023_vm14, %v4972_v31, %v4020_v46  ;;  %v4027_v41 = vmul.f32 %v4974_v40, %v4026_v12  ;;  %4745 = vmatmul.msk.f32.gmra.mxu3 %vm1128_vm1, %v4071_v23 }
 0x7d7   : > { %v4050_v33 = vmul.f32 %v4024_v18, %v7335_v44 }
 0x7d8   : > { %v4028_v29 = vmul.f32 0.5, %v4027_v41 }
 0x7d9   : > { %v4061_v38 = vmul.f32 %v7360_v6, %v4050_v33 }
 0x7da   : > { %v4029_v25 = vsub.f32 1.5, %v4028_v29 }
 0x7db   : > { %v4072_v52 = vadd.f32 %v7364_v51, %v4061_v38  ;;  %v4976_v59 = vpop.eup %4975 }
 0x7dc   : > { %v4030_v17 = vmul.f32 %v4974_v40, %v4029_v25  ;;  %v4036_v63 = vmul.f32 %v4976_v59, %v3964_v21  ;;  %vm4042_vm4 = vweird.f32 %v4976_v59 }
 0x7dd   : > { %vm4043_vm6 = vmor %vm4041_vm5, %vm4042_vm4 }
 0x7de   : > { %v4034_v2 = vsel %vm4033_vm3, %v4974_v40, %v4030_v17  ;;  %v4037_v15 = vmul.f32 %v4976_v59, %v4036_v63  ;;  %4746 = vmatmul.msk.f32.gmra.mxu3 %vm1128_vm1, %v4072_v52 }
 0x7df   : > { %v4051_v37 = vmul.f32 %v4034_v2, %v7342_v16  ;;  %v7403_v16 = vld [vmem:[%s5267_s27] ss:$0 sm:$0xff]  ;;  %v4473_v2 = vld [vmem:[%s5272_s4 + $0x38] sm:$0xff] }
 0x7e0   : > { %v4038_v44 = vmul.f32 0.5, %v4037_v15  ;;  %v4472_v15 = vld [vmem:[%s5272_s4 + $0x30] sm:$0xff]  ;;  %4510 = vmatpush.msrb.mxu0 %v4473_v2  ;;  %v4467_v2 = vld [vmem:[%s5272_s4 + $0x8] sm:$0xff] }
 0x7e1   : > { %v4062_v62 = vmul.f32 %v7360_v6, %v4051_v37 }
 0x7e2   : > { %v4039_v60 = vsub.f32 1.5, %v4038_v44  ;;  %4511 = vmatpush.msrb.mxu0 %v4472_v15 }
 0x7e3   : > { %v4073_v47 = vadd.f32 %v7364_v51, %v4062_v62 }
 0x7e4   : > { %v4040_v19 = vmul.f32 %v4976_v59, %v4039_v60 }
 0x7e6   : > { %v4044_v49 = vsel %vm4043_vm6, %v4976_v59, %v4040_v19  ;;  %4747 = vmatmul.msk.f32.gmra.mxu3 %vm1128_vm1, %v4073_v47 }
 0x7e7   : > { %v4052_v57 = vmul.f32 %v4044_v49, %v7349_v61 }
 0x7e9   : > { %v4063_v1 = vmul.f32 %v7360_v6, %v4052_v57  ;;  %v4471_v57 = vld [vmem:[%s5272_s4 + $0x28] sm:$0xff] }
 0x7ea   : > { %4512 = vmatpush.msrb.mxu0 %v4471_v57 }
 0x7eb   : > { %v4074_v14 = vadd.f32 %v7364_v51, %v4063_v1 }
 0x7ee   : > { %4748 = vmatmul.msk.f32.gmra.mxu3 %vm1128_vm1, %v4074_v14 }
 0x838   : > { %v4122_v48 = vpop.f32.mrf.mxu3 }
 0x839   : > { %v7406_v53 = vadd.f32 %v7403_v16, %v4122_v48 }
 0x83b   : > { %v7409_v54 = vmul.f32 0.70710677, %v7406_v53 }
 0x83d   : > { %v4162_v26 = vand.u32 2147483647, %v7409_v54  ;;  %v4378_v9 = vsub.f32 0.0, %v7409_v54  ;;  %vm4426_vm4 = vcmp.ge.f32.partialorder %v7409_v54, 0.0 }
 0x83f   : > { %v4170_v22 = vmul.f32 0.3275911, %v4162_v26  ;;  %v4386_v18 = vmul.f32 %v4378_v9, %v7409_v54 }
 0x840   : > { %v4125_v61 = vpop.f32.mrf.mxu3 }
 0x841   : > { %v4178_v30 = vadd.f32 1.0, %v4170_v22  ;;  %v7413_v6 = vadd.f32 %v7403_v16, %v4125_v61  ;;  %v4394_v17 = vmul.f32 1.442695, %v4386_v18 }
 0x843   : > { %4977 = vrcp.f32 %v4178_v30  ;;  %v7416_v51 = vmul.f32 0.70710677, %v7413_v6  ;;  %v4197_v3 = vand.u32 2147483648, %v4178_v30  ;;  %v4195_v28 = vand.u32 2147483647, %v4178_v30 }
 0x844   : > { %vm4191_vm8 = vweird.f32 %v4178_v30 }
 0x845   : > { %v4163_v43 = vand.u32 2147483647, %v7416_v51  ;;  %v4198_v32 = vor.u32 1.1754944e-38, %v4197_v3  ;;  %vm4196_vm11 = vcmp.eq.f32.partialorder %v4195_v28, 8.507059e+37  ;;  %v4379_v29 = vsub.f32 0.0, %v7416_v51  ;;  %v4470_v28 = vld [vmem:[%s5272_s4 + $0x20] sm:$0xff] }
 0x846   : > { %4513 = vmatpush.msrb.mxu0 %v4470_v28 }
 0x847   : > { %v4171_v4 = vmul.f32 0.3275911, %v4163_v43  ;;  %v4387_v62 = vmul.f32 %v4379_v29, %v7416_v51 }
 0x848   : > { %v4128_v31 = vpop.f32.mrf.mxu3 }
 0x849   : > { %v4978_v8 = vpop.eup %4977  ;;  %v7420_v11 = vadd.f32 %v7403_v16, %v4128_v31  ;;  %v7422_v10 = vadd.f32 1.0, %v4171_v4  ;;  %v4396_v31 = vmul.f32 1.442695, %v4387_v62 }
 0x84a   : > { %v4187_v5 = vmul.f32 %v4978_v8, %v4178_v30  ;;  %vm4192_vm7 = vweird.f32 %v4978_v8 }
 0x84b   : > { %v7425_v55 = vmul.f32 0.70710677, %v7420_v11  ;;  %4979 = vrcp.f32 %v7422_v10  ;;  %vm4193_vm9 = vmor %vm4191_vm8, %vm4192_vm7  ;;  %v4212_v44 = vand.u32 2147483648, %v7422_v10  ;;  %vm4206_vm12 = vweird.f32 %v7422_v10 }
 0x84c   : > { %v4188_v13 = vsub.f32 1.0, %v4187_v5  ;;  %v4210_v14 = vand.u32 2147483647, %v7422_v10 }
 0x84d   : > { %v4164_v42 = vand.u32 2147483647, %v7425_v55  ;;  %v4213_v4 = vor.u32 1.1754944e-38, %v4212_v44 }
 0x84e   : > { %v4189_v58 = vmul.f32 %v4978_v8, %v4188_v13  ;;  %v4380_v13 = vsub.f32 0.0, %v7425_v55  ;;  %vm4211_vm14 = vcmp.eq.f32.partialorder %v4210_v14, 8.507059e+37 }
 0x84f   : > { %v4172_v45 = vmul.f32 0.3275911, %v4164_v42  ;;  %v4469_v42 = vld [vmem:[%s5272_s4 + $0x18] sm:$0xff] }
 0x850   : > { %v4190_v20 = vadd.f32 %v4978_v8, %v4189_v58  ;;  %v4131_v39 = vpop.f32.mrf.mxu3  ;;  %4514 = vmatpush.msrb.mxu0 %v4469_v42 }
 0x851   : > { %v7432_v46 = vadd.f32 1.0, %v4172_v45  ;;  %v7435_v21 = vadd.f32 %v7403_v16, %v4131_v39  ;;  %v4980_v23 = vpop.eup %4979 }
 0x852   : > { %v4194_v27 = vsel %vm4193_vm9, %v4978_v8, %v4190_v20  ;;  %v4202_v41 = vmul.f32 %v4980_v23, %v7422_v10  ;;  %vm4207_vm10 = vweird.f32 %v4980_v23 }
 0x853   : > { %v7430_v40 = vsel %vm4196_vm11, %v4198_v32, %v4194_v27  ;;  %4981 = vrcp.f32 %v7432_v46  ;;  %v7443_v38 = vmul.f32 0.70710677, %v7435_v21  ;;  %vm7465_vm13 = vmor %vm4206_vm12, %vm4207_vm10  ;;  %v7485_v32 = vmul.f32 0.5, %v7406_v53 }
 0x854   : > { %v4306_v12 = vmul.f32 1.0614054, %v7430_v40  ;;  %v4203_v25 = vsub.f32 1.0, %v4202_v41  ;;  %4983 = vpow2.f32 %v4394_v17  ;;  %v4227_v9 = vand.u32 2147483648, %v7432_v46 }
 0x855   : > { %v4165_v59 = vand.u32 2147483647, %v7443_v38  ;;  %vm4221_vm2 = vweird.f32 %v7432_v46  ;;  %v4225_v41 = vand.u32 2147483647, %v7432_v46  ;;  %v4388_v53 = vmul.f32 %v4380_v13, %v7425_v55 }
 0x856   : > { %v4314_v33 = vadd.f32 -1.4531521, %v4306_v12  ;;  %v4204_v63 = vmul.f32 %v4980_v23, %v4203_v25  ;;  %v4468_v12 = vld [vmem:[%s5272_s4 + $0x10] sm:$0xff]  ;;  %v4228_v62 = vor.u32 1.1754944e-38, %v4227_v9  ;;  %vm4427_vm12 = vcmp.ge.f32.partialorder %v7416_v51, 0.0 }
 0x857   : > { %v4173_v60 = vmul.f32 0.3275911, %v4165_v59  ;;  %4515 = vmatpush.msrb.mxu0 %v4468_v12  ;;  %vm4226_vm5 = vcmp.eq.f32.partialorder %v4225_v41, 8.507059e+37 }
 0x858   : > { %v4322_v52 = vmul.f32 %v4314_v33, %v7430_v40  ;;  %v4205_v1 = vadd.f32 %v4980_v23, %v4204_v63  ;;  %v4381_v63 = vsub.f32 0.0, %v7443_v38 }
 0x859   : > { %v4134_v47 = vpop.f32.mrf.mxu3  ;;  %v7451_v19 = vpop.eup %4981  ;;  %v7462_v22 = vadd.f32 1.0, %v4173_v60  ;;  %4516 = vmatpush.msrb.mxu0 %v4467_v2 }
 0x85a   : > { %v4330_v37 = vadd.f32 1.4214138, %v4322_v52  ;;  %v7455_v49 = vadd.f32 %v7403_v16, %v4134_v47  ;;  %v4217_v26 = vmul.f32 %v7451_v19, %v7432_v46  ;;  %v4209_v43 = vsel %vm7465_vm13, %v4980_v23, %v4205_v1  ;;  %v4984_v33 = vpop.eup %4983 }
 0x85b   : > { %4985 = vrcp.f32 %v7462_v22  ;;  %v7481_v20 = vsel %vm4211_vm14, %v4213_v4, %v4209_v43  ;;  %vm4222_vm15 = vweird.f32 %v7451_v19  ;;  %v4398_v47 = vmul.f32 1.442695, %v4388_v53 }
 0x85c   : > { %v4338_v48 = vmul.f32 %v4330_v37, %v7430_v40  ;;  %v7470_v61 = vmul.f32 0.70710677, %v7455_v49  ;;  %v4218_v5 = vsub.f32 1.0, %v4217_v26  ;;  %v4307_v27 = vmul.f32 1.0614054, %v7481_v20  ;;  %vm7501_vm3 = vmor %vm4221_vm2, %vm4222_vm15 }
 0x85d   : > { %v7515_v37 = vmul.f32 0.5, %v7413_v6  ;;  %v4389_v14 = vmul.f32 %v4381_v63, %v7443_v38  ;;  %vm4236_vm6 = vweird.f32 %v7462_v22  ;;  %v4242_v4 = vand.u32 2147483648, %v7462_v22 }
 0x85e   : > { %v4346_v8 = vadd.f32 -0.28449672, %v4338_v48  ;;  %v4166_v10 = vand.u32 2147483647, %v7470_v61  ;;  %v4219_v58 = vmul.f32 %v7451_v19, %v4218_v5  ;;  %v4315_v52 = vadd.f32 -1.4531521, %v4307_v27 }
 0x85f   : > { %v4382_v43 = vsub.f32 0.0, %v7470_v61  ;;  %v4243_v54 = vor.u32 1.1754944e-38, %v4242_v4  ;;  %vm4428_vm2 = vcmp.ge.f32.partialorder %v7425_v55, 0.0 }
 0x860   : > { %v4354_v3 = vmul.f32 %v4346_v8, %v7430_v40  ;;  %v4174_v45 = vmul.f32 0.3275911, %v4166_v10  ;;  %v4220_v18 = vadd.f32 %v7451_v19, %v4219_v58  ;;  %v4240_v10 = vand.u32 2147483647, %v7462_v22 }
 0x861   : > { %v4137_v23 = vpop.f32.mrf.mxu3  ;;  %v7505_v17 = vpop.eup %4985 }
 0x862   : > { %v4362_v39 = vadd.f32 0.2548296, %v4354_v3  ;;  %v7494_v29 = vadd.f32 1.0, %v4174_v45  ;;  %v7497_v25 = vadd.f32 %v7403_v16, %v4137_v23  ;;  %v4224_v15 = vsel %vm7501_vm3, %v7451_v19, %v4220_v18 }
 0x863   : > { %v4232_v44 = vmul.f32 %v7505_v17, %v7462_v22  ;;  %v4323_v19 = vmul.f32 %v4315_v52, %v7481_v20  ;;  %v7524_v6 = vsel %vm4226_vm5, %v4228_v62, %v4224_v15  ;;  %vm4237_vm7 = vweird.f32 %v7505_v17  ;;  %v4466_v62 = vld [vmem:[%s5272_s4] sm:$0xff] }
 0x864   : > { %v4370_v46 = vmul.f32 %v4362_v39, %v7430_v40  ;;  %4987 = vrcp.f32 %v7494_v29  ;;  %v7521_v60 = vmul.f32 0.70710677, %v7497_v25  ;;  %v4308_v26 = vmul.f32 1.0614054, %v7524_v6  ;;  %vm4238_vm11 = vmor %vm4236_vm6, %vm4237_vm7  ;;  %4517 = vmatpush.msrb.mxu0 %v4466_v62 }
 0x865   : > { %4989 = vpow2.f32 %v4396_v31  ;;  %v4233_v57 = vsub.f32 1.0, %v4232_v44  ;;  %v4331_v8 = vadd.f32 1.4214138, %v4323_v19  ;;  %v4390_v18 = vmul.f32 %v4382_v43, %v7470_v61 }
 0x866   : > { %v4410_v40 = vmul.f32 %v4984_v33, %v4370_v46  ;;  %v4167_v48 = vand.u32 2147483647, %v7521_v60  ;;  %v4316_v42 = vadd.f32 -1.4531521, %v4308_v26  ;;  %vm4241_vm8 = vcmp.eq.f32.partialorder %v4240_v10, 8.507059e+37 }
 0x867   : > { %v4234_v30 = vmul.f32 %v7505_v17, %v4233_v57  ;;  %v4339_v28 = vmul.f32 %v4331_v8, %v7481_v20  ;;  %vm4251_vm9 = vweird.f32 %v7494_v29  ;;  %v4257_v59 = vand.u32 2147483648, %v7494_v29 }
 0x868   : > { %v4418_v1 = vsub.f32 1.0, %v4410_v40  ;;  %v4175_v31 = vmul.f32 0.3275911, %v4167_v48  ;;  %v4324_v15 = vmul.f32 %v4316_v42, %v7524_v6  ;;  %v4255_v57 = vand.u32 2147483647, %v7494_v29 }
 0x869   : > { %v4140_v13 = vpop.f32.mrf.mxu3  ;;  %v4235_v23 = vadd.f32 %v7505_v17, %v4234_v30  ;;  %v4347_v33 = vadd.f32 -0.28449672, %v4339_v28  ;;  %v4400_v30 = vmul.f32 1.442695, %v4389_v14  ;;  %v4402_v10 = vmul.f32 1.442695, %v4390_v18 }
 0x86a   : > { %v4434_v5 = vsub.f32 0.0, %v4418_v1  ;;  %v7534_v3 = vpop.eup %4987  ;;  %v7537_v58 = vadd.f32 %v7403_v16, %v4140_v13  ;;  %v7545_v39 = vadd.f32 1.0, %v4175_v31  ;;  %v7593_v31 = vmul.f32 0.5, %v7420_v11 }
 0x86b   : > { %v4990_v9 = vpop.eup %4989  ;;  %v4247_v27 = vmul.f32 %v7534_v3, %v7494_v29  ;;  %v4355_v2 = vmul.f32 %v4347_v33, %v7481_v20  ;;  %v4239_v44 = vsel %vm4238_vm11, %v7505_v17, %v4235_v23  ;;  %vm4252_vm10 = vweird.f32 %v7534_v3 }
 0x86c   : > { %v4442_v45 = vsel %vm4426_vm4, %v4418_v1, %v4434_v5  ;;  %v7550_v41 = vmul.f32 0.70710677, %v7537_v58  ;;  %4991 = vrcp.f32 %v7545_v39  ;;  %v7566_v40 = vsel %vm4241_vm8, %v4243_v54, %v4239_v44  ;;  %vm7581_vm13 = vmor %vm4251_vm9, %vm4252_vm10 }
 0x86d   : > { %v4450_v12 = vadd.f32 1.0, %v4442_v45  ;;  %v4248_v53 = vsub.f32 1.0, %v4247_v27  ;;  %v4363_v22 = vadd.f32 0.2548296, %v4355_v2  ;;  %v4332_v1 = vadd.f32 1.4214138, %v4324_v15 }
 0x86e   : > { %v4168_v46 = vand.u32 2147483647, %v7550_v41  ;;  %v4309_v48 = vmul.f32 1.0614054, %v7566_v40  ;;  %4993 = vpow2.f32 %v4398_v47  ;;  %v4258_v13 = vor.u32 1.1754944e-38, %v4257_v59 }
 0x86f   : > { %v4458_v52 = vmul.f32 %v4450_v12, %v7485_v32  ;;  %v4249_v63 = vmul.f32 %v7534_v3, %v4248_v53  ;;  %v4371_v47 = vmul.f32 %v4363_v22, %v7481_v20  ;;  %v4340_v14 = vmul.f32 %v4332_v1, %v7524_v6 }
 0x870   : > { %v4176_v32 = vmul.f32 0.3275911, %v4168_v46  ;;  %v4317_v4 = vadd.f32 -1.4531521, %v4309_v48  ;;  %vm4256_vm14 = vcmp.eq.f32.partialorder %v4255_v57, 8.507059e+37  ;;  %v7605_v11 = vmul.f32 0.5, %v7435_v21 }
 0x871   : > { %v4143_v19 = vpop.f32.mrf.mxu3  ;;  %v4250_v26 = vadd.f32 %v7534_v3, %v4249_v63  ;;  %4749 = vmatmul.msk.f32.vlgmr.msrb.gmra.mxu0 %vm3145_vm0, %v4458_v52  ;;  %v4411_v20 = vmul.f32 %v4990_v9, %v4371_v47  ;;  %v4348_v45 = vadd.f32 -0.28449672, %v4340_v14  ;;  %v4383_v52 = vsub.f32 0.0, %v7521_v60 }
 0x872   : > { %v7572_v43 = vadd.f32 1.0, %v4176_v32  ;;  %v7575_v17 = vadd.f32 %v7403_v16, %v4143_v19  ;;  %v7585_v5 = vpop.eup %4991  ;;  %v4325_v27 = vmul.f32 %v4317_v4, %v7566_v40  ;;  %v4270_v47 = vand.u32 2147483647, %v7545_v39 }
 0x873   : > { %v4254_v16 = vsel %vm7581_vm13, %v7534_v3, %v4250_v26  ;;  %v4262_v29 = vmul.f32 %v7585_v5, %v7545_v39  ;;  %v4419_v12 = vsub.f32 1.0, %v4411_v20  ;;  %v4356_v53 = vmul.f32 %v4348_v45, %v7524_v6 }
 0x874   : > { %4995 = vrcp.f32 %v7572_v43  ;;  %v7599_v28 = vmul.f32 0.70710677, %v7575_v17  ;;  %v7602_v3 = vsel %vm4256_vm14, %v4258_v13, %v4254_v16  ;;  %v4994_v33 = vpop.eup %4993  ;;  %v4333_v9 = vadd.f32 1.4214138, %v4325_v27 }
 0x875   : > { %v4263_v42 = vsub.f32 1.0, %v4262_v29  ;;  %4997 = vpow2.f32 %v4400_v30  ;;  %v4310_v54 = vmul.f32 1.0614054, %v7602_v3  ;;  %v4435_v46 = vsub.f32 0.0, %v4419_v12 }
 0x876   : > { %v4169_v23 = vand.u32 2147483647, %v7599_v28  ;;  %4999 = vpow2.f32 %v4402_v10  ;;  %v4364_v21 = vadd.f32 0.2548296, %v4356_v53  ;;  %v4341_v2 = vmul.f32 %v4333_v9, %v7566_v40 }
 0x877   : > { %v4264_v18 = vmul.f32 %v7585_v5, %v4263_v42  ;;  %v4318_v15 = vadd.f32 -1.4531521, %v4310_v54  ;;  %vm4267_vm15 = vweird.f32 %v7585_v5  ;;  %v4443_v62 = vsel %vm4427_vm12, %v4419_v12, %v4435_v46 }
 0x878   : > { %v4177_v59 = vmul.f32 0.3275911, %v4169_v23  ;;  %v4451_v19 = vadd.f32 1.0, %v4443_v62  ;;  %v4372_v22 = vmul.f32 %v4364_v21, %v7524_v6  ;;  %v4349_v1 = vadd.f32 -0.28449672, %v4341_v2 }
 0x879   : > { %v4265_v57 = vadd.f32 %v7585_v5, %v4264_v18  ;;  %v4326_v48 = vmul.f32 %v4318_v15, %v7602_v3  ;;  %v4272_v30 = vand.u32 2147483648, %v7545_v39  ;;  %vm4266_vm3 = vweird.f32 %v7545_v39 }
 0x87a   : > { %v7612_v63 = vpop.eup %4995  ;;  %v7618_v32 = vadd.f32 1.0, %v4177_v59  ;;  %v4391_v51 = vmul.f32 %v4383_v52, %v7521_v60  ;;  %v4459_v14 = vmul.f32 %v4451_v19, %v7515_v37  ;;  %v4412_v4 = vmul.f32 %v4994_v33, %v4372_v22  ;;  %vm7637_vm4 = vmor %vm4266_vm3, %vm4267_vm15 }
 0x87b   : > { %v4277_v44 = vmul.f32 %v7612_v63, %v7572_v43  ;;  %v4998_v26 = vpop.eup %4997  ;;  %v4384_v29 = vsub.f32 0.0, %v7550_v41  ;;  %v4357_v13 = vmul.f32 %v4349_v1, %v7566_v40  ;;  %v4334_v10 = vadd.f32 1.4214138, %v4326_v48 }
 0x87c   : > { %5001 = vrcp.f32 %v7618_v32  ;;  %v5000_v16 = vpop.eup %4999  ;;  %vm4281_vm5 = vweird.f32 %v7572_v43  ;;  %v4287_v39 = vand.u32 2147483648, %v7572_v43  ;;  %4750 = vmatmul.msk.f32.gmra.mxu0 %vm3145_vm0, %v4459_v14  ;;  %v4420_v37 = vsub.f32 1.0, %v4412_v4 }
 0x87d   : > { %v4278_v8 = vsub.f32 1.0, %v4277_v44  ;;  %v4269_v42 = vsel %vm7637_vm4, %v7585_v5, %v4265_v57  ;;  %v4365_v45 = vadd.f32 0.2548296, %v4357_v13  ;;  %v4342_v27 = vmul.f32 %v4334_v10, %v7602_v3 }
 0x87e   : > { %vm4271_vm6 = vcmp.eq.f32.partialorder %v4270_v47, 8.507059e+37  ;;  %v4273_v23 = vor.u32 1.1754944e-38, %v4272_v30  ;;  %v4436_v12 = vsub.f32 0.0, %v4420_v37  ;;  %vm4429_vm7 = vcmp.ge.f32.partialorder %v7443_v38, 0.0 }
 0x87f   : > { %v4279_v6 = vmul.f32 %v7612_v63, %v4278_v8  ;;  %vm4282_vm8 = vweird.f32 %v7612_v63  ;;  %v4285_v18 = vand.u32 2147483647, %v7572_v43  ;;  %v4300_v9 = vand.u32 2147483647, %v7618_v32 }
 0x880   : > { %v4373_v54 = vmul.f32 %v4365_v45, %v7566_v40  ;;  %v4350_v5 = vadd.f32 -0.28449672, %v4342_v27  ;;  %v7654_v52 = vsel %vm4271_vm6, %v4273_v23, %v4269_v42  ;;  %v4444_v46 = vsel %vm4428_vm2, %v4420_v37, %v4436_v12  ;;  %vm4283_vm9 = vmor %vm4281_vm5, %vm4282_vm8 }
 0x881   : > { %v4280_v33 = vadd.f32 %v7612_v63, %v4279_v6  ;;  %v4311_v21 = vmul.f32 1.0614054, %v7654_v52  ;;  %v4288_v2 = vor.u32 1.1754944e-38, %v4287_v39  ;;  %v4452_v15 = vadd.f32 1.0, %v4444_v46 }
 0x882   : > { %v5002_v53 = vpop.eup %5001  ;;  %v4413_v44 = vmul.f32 %v4998_v26, %v4373_v54  ;;  %v4358_v62 = vmul.f32 %v4350_v5, %v7602_v3  ;;  %v4302_v19 = vand.u32 2147483648, %v7618_v32  ;;  %vm4286_vm11 = vcmp.eq.f32.partialorder %v4285_v18, 8.507059e+37 }
 0x883   : > { %v4292_v59 = vmul.f32 %v5002_v53, %v7618_v32  ;;  %v4284_v40 = vsel %vm4283_vm9, %v7612_v63, %v4280_v33  ;;  %v4319_v22 = vadd.f32 -1.4531521, %v4311_v21  ;;  %v4460_v55 = vmul.f32 %v4452_v15, %v7593_v31 }
 0x884   : > { %v4421_v1 = vsub.f32 1.0, %v4413_v44  ;;  %v4366_v48 = vadd.f32 0.2548296, %v4358_v62  ;;  %v4289_v30 = vsel %vm4286_vm11, %v4288_v2, %v4284_v40  ;;  %vm4297_vm10 = vweird.f32 %v5002_v53 }
 0x885   : > { %v4293_v57 = vsub.f32 1.0, %v4292_v59  ;;  %v4327_v43 = vmul.f32 %v4319_v22, %v7654_v52  ;;  %v4312_v47 = vmul.f32 1.0614054, %v4289_v30  ;;  %v4404_v26 = vmul.f32 1.442695, %v4391_v51  ;;  %4751 = vmatmul.msk.f32.gmra.mxu0 %vm3145_vm0, %v4460_v55 }
 0x886   : > { %v4392_v14 = vmul.f32 %v4384_v29, %v7550_v41  ;;  %v4437_v63 = vsub.f32 0.0, %v4421_v1  ;;  %v4374_v4 = vmul.f32 %v4366_v48, %v7602_v3  ;;  %vm4296_vm12 = vweird.f32 %v7618_v32 }
 0x887   : > { %v4294_v8 = vmul.f32 %v5002_v53, %v4293_v57  ;;  %v4335_v31 = vadd.f32 1.4214138, %v4327_v43  ;;  %v4320_v13 = vadd.f32 -1.4531521, %v4312_v47  ;;  %vm4298_vm13 = vmor %vm4296_vm12, %vm4297_vm10  ;;  %vm4301_vm14 = vcmp.eq.f32.partialorder %v4300_v9, 8.507059e+37 }
 0x888   : > { %v4303_v10 = vor.u32 1.1754944e-38, %v4302_v19  ;;  %v4445_v20 = vsel %vm4429_vm7, %v4421_v1, %v4437_v63  ;;  %v4414_v39 = vmul.f32 %v5000_v16, %v4374_v4  ;;  %v4385_v3 = vsub.f32 0.0, %v7599_v28 }
 0x889   : > { %v4295_v6 = vadd.f32 %v5002_v53, %v4294_v8  ;;  %v4453_v37 = vadd.f32 1.0, %v4445_v20  ;;  %v4343_v29 = vmul.f32 %v4335_v31, %v7654_v52  ;;  %v4328_v42 = vmul.f32 %v4320_v13, %v4289_v30 }
 0x88a   : > { %v4422_v27 = vsub.f32 1.0, %v4414_v39  ;;  %5003 = vpow2.f32 %v4404_v26  ;;  %v4406_v18 = vmul.f32 1.442695, %v4392_v14  ;;  %vm4430_vm15 = vcmp.ge.f32.partialorder %v7470_v61, 0.0 }
 0x88b   : > { %v4299_v51 = vsel %vm4298_vm13, %v5002_v53, %v4295_v6  ;;  %v4461_v32 = vmul.f32 %v4453_v37, %v7605_v11  ;;  %v4351_v12 = vadd.f32 -0.28449672, %v4343_v29  ;;  %v4336_v33 = vadd.f32 1.4214138, %v4328_v42 }
 0x88c   : > { %v4304_v45 = vsel %vm4301_vm14, %v4303_v10, %v4299_v51  ;;  %v4438_v9 = vsub.f32 0.0, %v4422_v27  ;;  %v4393_v54 = vmul.f32 %v4385_v3, %v7599_v28  ;;  %v4150_v2 = vmul.f32 0.5, %v7455_v49 }
 0x88d   : > { %v4313_v23 = vmul.f32 1.0614054, %v4304_v45  ;;  %v4359_v16 = vmul.f32 %v4351_v12, %v7654_v52  ;;  %v4344_v53 = vmul.f32 %v4336_v33, %v4289_v30  ;;  %4752 = vmatmul.msk.f32.gmra.mxu0 %vm3145_vm0, %v4461_v32  ;;  %5005 = vpow2.f32 %v4406_v18 }
 0x88e   : > { %v4446_v5 = vsel %vm4430_vm15, %v4422_v27, %v4438_v9  ;;  %v4408_v40 = vmul.f32 1.442695, %v4393_v54  ;;  %vm4431_vm2 = vcmp.ge.f32.partialorder %v7521_v60, 0.0  ;;  %v4151_v4 = vmul.f32 0.5, %v7497_v25  ;;  %v4860_v27 = vld [vmem:[%s5277_s12] ss:$0 sm:$0xff] }
 0x88f   : > { %v4321_v38 = vadd.f32 -1.4531521, %v4313_v23  ;;  %v4454_v46 = vadd.f32 1.0, %v4446_v5  ;;  %v4367_v21 = vadd.f32 0.2548296, %v4359_v16  ;;  %vm4432_vm3 = vcmp.ge.f32.partialorder %v7550_v41, 0.0 }
 0x890   : > { %v4352_v11 = vadd.f32 -0.28449672, %v4344_v53  ;;  %v5004_v61 = vpop.eup %5003  ;;  %5007 = vpow2.f32 %v4408_v40  ;;  %v4152_v37 = vmul.f32 0.5, %v7537_v58  ;;  %vm4433_vm4 = vcmp.ge.f32.partialorder %v7599_v28, 0.0 }
 0x891   : > { %v4329_v59 = vmul.f32 %v4321_v38, %v4304_v45  ;;  %v4375_v44 = vmul.f32 %v4367_v21, %v7654_v52  ;;  %v4462_v57 = vmul.f32 %v4454_v46, %v4150_v2  ;;  %v4153_v41 = vmul.f32 0.5, %v7575_v17 }
 0x892   : > { %v4360_v62 = vmul.f32 %v4352_v11, %v4289_v30 }
 0x893   : > { %v4337_v15 = vadd.f32 1.4214138, %v4329_v59  ;;  %v4415_v22 = vmul.f32 %v5004_v61, %v4375_v44  ;;  %v5006_v43 = vpop.eup %5005 }
 0x894   : > { %v4368_v55 = vadd.f32 0.2548296, %v4360_v62 }
 0x895   : > { %v4345_v19 = vmul.f32 %v4337_v15, %v4304_v45  ;;  %v4423_v48 = vsub.f32 1.0, %v4415_v22  ;;  %4753 = vmatmul.msk.f32.gmra.mxu0 %vm3145_vm0, %v4462_v57 }
 0x896   : > { %v4376_v8 = vmul.f32 %v4368_v55, %v4289_v30  ;;  %v5008_v10 = vpop.eup %5007 }
 0x897   : > { %v4353_v1 = vadd.f32 -0.28449672, %v4345_v19  ;;  %v4439_v49 = vsub.f32 0.0, %v4423_v48 }
 0x898   : > { %v4416_v26 = vmul.f32 %v5006_v43, %v4376_v8 }
 0x899   : > { %v4361_v47 = vmul.f32 %v4353_v1, %v4304_v45  ;;  %v4447_v14 = vsel %vm4431_vm2, %v4423_v48, %v4439_v49 }
 0x89a   : > { %v4424_v63 = vsub.f32 1.0, %v4416_v26  ;;  %v4455_v6 = vadd.f32 1.0, %v4447_v14 }
 0x89b   : > { %v4369_v52 = vadd.f32 0.2548296, %v4361_v47 }
 0x89c   : > { %v4440_v13 = vsub.f32 0.0, %v4424_v63  ;;  %v4463_v20 = vmul.f32 %v4455_v6, %v4151_v4 }
 0x89d   : > { %v4377_v31 = vmul.f32 %v4369_v52, %v4304_v45 }
 0x89e   : > { %v4448_v39 = vsel %vm4432_vm3, %v4424_v63, %v4440_v13  ;;  %4754 = vmatmul.msk.f32.gmra.mxu0 %vm3145_vm0, %v4463_v20 }
 0x89f   : > { %v4417_v30 = vmul.f32 %v5008_v10, %v4377_v31  ;;  %v4456_v51 = vadd.f32 1.0, %v4448_v39 }
 0x8a1   : > { %v4425_v60 = vsub.f32 1.0, %v4417_v30  ;;  %v4464_v25 = vmul.f32 %v4456_v51, %v4152_v37 }
 0x8a3   : > { %v4441_v29 = vsub.f32 0.0, %v4425_v60 }
 0x8a5   : > { %v4449_v42 = vsel %vm4433_vm4, %v4425_v60, %v4441_v29 }
 0x8a6   : > { %v4457_v45 = vadd.f32 1.0, %v4449_v42  ;;  %4755 = vmatmul.msk.f32.gmra.mxu0 %vm3145_vm0, %v4464_v25 }
 0x8a8   : > { %v4465_v3 = vmul.f32 %v4457_v45, %v4153_v41 }
 0x8ae   : > { %4756 = vmatmul.msk.f32.gmra.mxu0 %vm3145_vm0, %v4465_v3 }
 0x8ee   : > { %v4519_v23 = vpop.f32.mrf.mxu0 }
 0x8ef   : > { %v4520_v32 = vadd.f32 %v4860_v27, %v4519_v23 }
 0x8f1   : > { %v4543_v58 = vadd.f32 %v4520_v32, %v7154_v0 }
 0x8f3   : > { %4551 = vst.msk [vmem:[%s5296_s1] sm:$0xff] %vm1128_vm1, %v4543_v58 }
 0x8f9   : > { %v4522_v28 = vpop.f32.mrf.mxu0 }
 0x8fa   : > { %v4523_v12 = vadd.f32 %v4860_v27, %v4522_v28 }
 0x8fc   : > { %v4544_v33 = vadd.f32 %v4523_v12, %v7178_v50 }
 0x8fe   : > { %4552 = vst.msk [vmem:[%s5296_s1 + $0x8] sm:$0xff] %vm1128_vm1, %v4544_v33 }
 0x902   : > { %v4525_v17 = vpop.f32.mrf.mxu0 }
 0x903   : > { %v4526_v18 = vadd.f32 %v4860_v27, %v4525_v17 }
 0x905   : > { %v4545_v9 = vadd.f32 %v4526_v18, %v7204_v24 }
 0x907   : > { %4553 = vst.msk [vmem:[%s5296_s1 + $0x10] sm:$0xff] %vm1128_vm1, %v4545_v9 }
 0x90a   : > { %v4528_v38 = vpop.f32.mrf.mxu0 }
 0x90b   : > { %v4529_v16 = vadd.f32 %v4860_v27, %v4528_v38 }
 0x90d   : > { %v4546_v0 = vadd.f32 %v4529_v16, %v7236_v7 }
 0x90f   : > { %4554 = vst.msk [vmem:[%s5296_s1 + $0x18] sm:$0xff] %vm1128_vm1, %v4546_v0 }
 0x912   : > { %v4531_v53 = vpop.f32.mrf.mxu0 }
 0x913   : > { %v4532_v54 = vadd.f32 %v4860_v27, %v4531_v53 }
 0x915   : > { %v4547_v50 = vadd.f32 %v4532_v54, %v7256_v34 }
 0x917   : > { %4555 = vst.msk [vmem:[%s5296_s1 + $0x20] sm:$0xff] %vm1128_vm1, %v4547_v50 }
 0x91b   : > { %v4534_v5 = vpop.f32.mrf.mxu0 }
 0x91c   : > { %v4535_v59 = vadd.f32 %v4860_v27, %v4534_v5 }
 0x91e   : > { %v4548_v24 = vadd.f32 %v4535_v59, %v7275_v36 }
 0x920   : > { %4556 = vst.msk [vmem:[%s5296_s1 + $0x28] sm:$0xff] %vm1128_vm1, %v4548_v24 }
 0x923   : > { %v4537_v46 = vpop.f32.mrf.mxu0 }
 0x924   : > { %v4538_v21 = vadd.f32 %v4860_v27, %v4537_v46 }
 0x926   : > { %v4549_v11 = vadd.f32 %v4538_v21, %v7288_v35 }
 0x928   : > { %4557 = vst.msk [vmem:[%s5296_s1 + $0x30] sm:$0xff] %vm1128_vm1, %v4549_v11 }
 0x92b   : > { %v4540_v7 = vpop.f32.mrf.mxu0 }
 0x92c   : > { %v4541_v2 = vadd.f32 %v4860_v27, %v4540_v7 }
 0x92e   : > { %v4550_v15 = vadd.f32 %v4541_v2, %v7294_v56 }
 0x930   : > { %4558 = vst.msk [vmem:[%s5296_s1 + $0x38] sm:$0xff] %vm1128_vm1, %v4550_v15 }
 0x931 PF: > { %s81_s22 = sadd.s32 1, %s5058_s22  }
 0x932   : > { %p78_p5 = scmp.ge.s32.totalorder %s81_s22, 4  }
 0x934   :  { %80 = sbr.rel (!%p78_p5) target bundleno = 65 (0x41), region = 229 }

</bundles_post_ra>
